<compile_context>
chip_gen: v7x
topology: tpu7x:2x2x1
jax: 0.10.0
libtpu: 0.0.40
codegen_flags: <defaults>
</compile_context>

<pallas_src>
import math
from functools import partial

import jax
import jax.numpy as jnp
from jax.experimental import pallas as pl
from jax.experimental.pallas import tpu as pltpu


# ----------------------------- in-kernel helpers ----------------------------

def _layer_norm(x, g, b, eps=1e-5):
    mean = jnp.mean(x, axis=-1, keepdims=True)
    c = x - mean
    var = jnp.mean(c * c, axis=-1, keepdims=True)
    return c * jax.lax.rsqrt(var + eps) * g + b


def _erf(x):
    # Abramowitz & Stegun 7.1.26 polynomial (|err| < 1.5e-7 ~ f32 eps): keeps
    # nn.GELU()'s exact-erf semantics using only ops guaranteed to lower in
    # Mosaic (abs / exp / mul / add / where / div).
    a1, a2, a3, a4, a5 = (0.254829592, -0.284496736, 1.421413741,
                          -1.453152027, 1.061405429)
    p = 0.3275911
    ax = jnp.abs(x)
    t = 1.0 / (1.0 + p * ax)
    poly = ((((a5 * t + a4) * t + a3) * t + a2) * t + a1) * t
    y = 1.0 - poly * jnp.exp(-ax * ax)
    return jnp.where(x >= 0, y, -y)


def _gelu_exact(x):
    return 0.5 * x * (1.0 + _erf(x * (1.0 / math.sqrt(2.0))))


# --------------------------------- kernel -----------------------------------

def _vit_kernel(
    # ---- constant inputs (whole arrays, VMEM-resident) ----
    patches_ref,      # (B*S_pad, C*p*p)  zero rows at cls / pad positions
    patch_w_ref,      # (C*p*p, D)
    embed_add_ref,    # (S_pad, D)        cls+pos0 / conv_bias+pos / 0 rows
    head_block_ref,   # (D, D)            block-diag ones / sqrt(head_dim)
    norm_g_ref, norm_b_ref,      # (1, D) final LayerNorm
    head_w_ref,       # (D, num_classes)
    head_b_ref,       # (1, num_classes)
    # ---- stacked per-block weights (leading depth axis) ----
    ln1_g_ref, ln1_b_ref,        # (depth, 1, D)
    qkv_w_ref, qkv_b_ref,        # (depth, D, 3D), (depth, 1, 3D)
    out_w_ref, out_b_ref,        # (depth, D, D), (depth, 1, D)
    ln2_g_ref, ln2_b_ref,        # (depth, 1, D)
    fc1_w_ref, fc1_b_ref,        # (depth, D, MLP), (depth, 1, MLP)
    fc2_w_ref, fc2_b_ref,        # (depth, MLP, D), (depth, 1, D)
    # ---- output ----
    logits_ref,       # (B, num_classes)
    # ---- scratch ----
    x_scr,            # VMEM (B*S_pad, D): resident activations
    ctx_scr,          # VMEM (B*S_pad, D): attention context assembly
    *, depth, num_imgs, seq_pad, embed_dim,
):
    D = embed_dim

    # Fused patch-embed; cls token / conv-bias / positional encoding come in
    # as a per-image (S_pad, D) additive term broadcast over images here.
    pe = jnp.dot(patches_ref[...], patch_w_ref[...],
                 preferred_element_type=jnp.float32)          # (M, D)
    ea = embed_add_ref[...]                                    # (S_pad, D)
    for i in range(num_imgs):
        x_scr[pl.ds(i * seq_pad, seq_pad), :] = (
            pe[i * seq_pad:(i + 1) * seq_pad, :] + ea)

    hb = head_block_ref[...]                                   # (D, D)

    for d in range(depth):                                     # depth is tiny & static
        x = x_scr[...]                                         # (M, D)

        # -------------- attention branch: x + Wo @ MHA(LN1(x)) --------------
        ln1 = _layer_norm(x, ln1_g_ref[d], ln1_b_ref[d])
        qkv = (jnp.dot(ln1, qkv_w_ref[d],
                       preferred_element_type=jnp.float32)
               + qkv_b_ref[d])                                 # (M, 3D)
        q = qkv[:, 0:D]
        k = qkv[:, D:2 * D]
        v = qkv[:, 2 * D:3 * D]

        # torch batch_first=False default: images = attention sequence axis,
        # token positions = attention batch axis, so image i attends over
        # images j at the same token position, independently per head.
        # Scores are lane-dense (S_pad, D): (q*k) @ head_block sums each
        # head's lanes and replicates the (pre-scaled) score across them.
        for i in range(num_imgs):
            qi = q[i * seq_pad:(i + 1) * seq_pad, :]
            # online softmax over j: running max / denom / context
            k0 = k[0:seq_pad, :]
            v0 = v[0:seq_pad, :]
            m = jnp.dot(qi * k0, hb, preferred_element_type=jnp.float32)
            denom = jnp.ones_like(m)                           # exp(s0-s0)=1
            ctx = v0
            for j in range(1, num_imgs):
                kj = k[j * seq_pad:(j + 1) * seq_pad, :]
                vj = v[j * seq_pad:(j + 1) * seq_pad, :]
                s = jnp.dot(qi * kj, hb, preferred_element_type=jnp.float32)
                m_new = jnp.maximum(m, s)
                alpha = jnp.exp(m - m_new)
                p = jnp.exp(s - m_new)
                denom = alpha * denom + p
                ctx = alpha * ctx + p * vj
                m = m_new
            # exact divide (parity); write aligned 24-row slice, no concatenate
            ctx_scr[pl.ds(i * seq_pad, seq_pad), :] = ctx / denom

        attn_out = (jnp.dot(ctx_scr[...], out_w_ref[d],
                            preferred_element_type=jnp.float32)
                    + out_b_ref[d])
        x = x + attn_out
        # TODO(synk): attention-weight / MLP dropout treated as identity (eval mode).

        # -------------- MLP branch: x + W2 @ GELU(W1 @ LN2(x)) --------------
        ln2 = _layer_norm(x, ln2_g_ref[d], ln2_b_ref[d])
        h = (jnp.dot(ln2, fc1_w_ref[d], preferred_element_type=jnp.float32)
             + fc1_b_ref[d])
        h = _gelu_exact(h)
        mlp_out = (jnp.dot(h, fc2_w_ref[d], preferred_element_type=jnp.float32)
                   + fc2_b_ref[d])
        x_scr[...] = x + mlp_out

    # Final LayerNorm + classification head on the cls rows only; cls rows sit
    # at static 8-aligned offsets i*S_pad (S_pad is a multiple of 8).
    x = x_scr[...]
    cls_rows = [x[i * seq_pad:i * seq_pad + 1, :] for i in range(num_imgs)]
    cls = cls_rows[0] if num_imgs == 1 else jnp.concatenate(cls_rows, axis=0)
    cls = _layer_norm(cls, norm_g_ref[...], norm_b_ref[...])
    logits_ref[...] = (jnp.dot(cls, head_w_ref[...],
                               preferred_element_type=jnp.float32)
                       + head_b_ref[...])


# -------------------------------- forward -----------------------------------

@partial(jax.jit, static_argnames=("patch_size",))
def vit_forward(x, params, *, patch_size):
    B, C, H, W = x.shape
    p = patch_size
    Hp, Wp = H // p, W // p
    P = Hp * Wp
    Cpp = C * p * p
    S_pad, D = params["embed_add"].shape
    depth = params["ln1_g"].shape[0]
    num_classes = params["head_w"].shape[1]
    M = B * S_pad

    # input glue: image -> zero-padded per-token patch matrix (B*S_pad, Cpp)
    patches = (x.reshape(B, C, Hp, p, Wp, p)
                 .transpose(0, 2, 4, 1, 3, 5)
                 .reshape(B, P, Cpp))
    patches_padded = (jnp.zeros((B, S_pad, Cpp), jnp.float32)
                        .at[:, 1:1 + P, :].set(patches)
                        .reshape(M, Cpp))

    inputs = [
        patches_padded, params["patch_w"], params["embed_add"],
        params["head_block"], params["norm_g"], params["norm_b"],
        params["head_w"], params["head_b"],
        params["ln1_g"], params["ln1_b"], params["qkv_w"], params["qkv_b"],
        params["out_w"], params["out_b"], params["ln2_g"], params["ln2_b"],
        params["fc1_w"], params["fc1_b"], params["fc2_w"], params["fc2_b"],
    ]

    kernel = partial(_vit_kernel, depth=depth, num_imgs=B, seq_pad=S_pad,
                     embed_dim=D)

    # Single invocation (no grid): all inputs live whole in VMEM, activations
    # stay in VMEM scratch — one kernel launch for the entire forward.
    return pl.pallas_call(
        kernel,
        out_shape=jax.ShapeDtypeStruct((B, num_classes), jnp.float32),
        scratch_shapes=[pltpu.VMEM((M, D), jnp.float32),
                        pltpu.VMEM((M, D), jnp.float32)],
    )(*inputs)


# --------------------------- deterministic params ---------------------------

def init_params(key, *, img_size, patch_size, in_chans, num_classes,
                embed_dim, depth, num_heads, mlp_dim):
    P = (img_size // patch_size) ** 2
    S = P + 1
    S_pad = ((S + 7) // 8) * 8           # pad token axis to 8 sublanes
    D = embed_dim
    hd = D // num_heads
    keys = iter(jax.random.split(key, 16 + 8 * depth))

    def nrm(shape, scale=0.02):
        return scale * jax.random.normal(next(keys), shape, jnp.float32)

    params = {}
    conv_w = nrm((D, in_chans, patch_size, patch_size))   # torch Conv2d weight
    params["patch_w"] = conv_w.reshape(D, -1).T           # (C*p*p, D)
    patch_b = nrm((D,))
    cls_token = nrm((1, 1, D))
    pos_embed = nrm((1, S, D))

    # Fused additive embedding term per image: row 0 = cls + pos[0] (no conv
    # bias), rows 1..P = conv bias + pos[1..P], padding rows = 0 (inert).
    embed_add = jnp.zeros((S_pad, D), jnp.float32)
    embed_add = embed_add.at[0:1, :].set(cls_token[0] + pos_embed[0, 0:1, :])
    embed_add = embed_add.at[1:S, :].set(patch_b[None, :] + pos_embed[0, 1:, :])
    params["embed_add"] = embed_add

    # Block-diagonal head-broadcast matrix with 1/sqrt(head_dim) folded in:
    # (q*k) @ head_block = per-head scaled score replicated over that head's
    # lanes (heads are contiguous lane blocks of D).
    d_idx = jnp.arange(D)
    same_head = (d_idx[:, None] // hd) == (d_idx[None, :] // hd)
    params["head_block"] = same_head.astype(jnp.float32) / math.sqrt(hd)

    per = {n: [] for n in ("ln1_g", "ln1_b", "qkv_w", "qkv_b", "out_w",
                           "out_b", "ln2_g", "ln2_b", "fc1_w", "fc1_b",
                           "fc2_w", "fc2_b")}
    for _ in range(depth):
        in_proj_w = nrm((3 * D, D))        # torch MHA in_proj_weight layout
        in_proj_b = nrm((3 * D,))
        per["qkv_w"].append(in_proj_w.T)                 # (D, 3D), cols [q|k|v]
        per["qkv_b"].append(in_proj_b.reshape(1, 3 * D))
        per["out_w"].append(nrm((D, D)).T)
        per["out_b"].append(nrm((D,)).reshape(1, D))
        per["fc1_w"].append(nrm((mlp_dim, D)).T)
        per["fc1_b"].append(nrm((mlp_dim,)).reshape(1, mlp_dim))
        per["fc2_w"].append(nrm((D, mlp_dim)).T)
        per["fc2_b"].append(nrm((D,)).reshape(1, D))
        per["ln1_g"].append(jnp.ones((1, D), jnp.float32))
        per["ln1_b"].append(jnp.zeros((1, D), jnp.float32))
        per["ln2_g"].append(jnp.ones((1, D), jnp.float32))
        per["ln2_b"].append(jnp.zeros((1, D), jnp.float32))
    for n, lst in per.items():
        params[n] = jnp.stack(lst, axis=0)

    params["norm_g"] = jnp.ones((1, D), jnp.float32)
    params["norm_b"] = jnp.zeros((1, D), jnp.float32)
    params["head_w"] = nrm((num_classes, D)).T             # (D, num_classes)
    params["head_b"] = nrm((num_classes,)).reshape(1, num_classes)
    return params


# ---------------------------------- main ------------------------------------

if __name__ == "__main__":
    # Small ViT: img 16x16, patch 4 -> 16 patches (+1 cls = 17 tokens, pad to 24)
    B, C, IMG, PATCH = 2, 4, 16, 4
    EMBED, DEPTH, HEADS, MLP, NUM_CLASSES = 32, 2, 4, 64, 8

    key = jax.random.PRNGKey(0)
    pkey, xkey = jax.random.split(key)
    params = init_params(
        pkey, img_size=IMG, patch_size=PATCH, in_chans=C,
        num_classes=NUM_CLASSES, embed_dim=EMBED, depth=DEPTH,
        num_heads=HEADS, mlp_dim=MLP,
    )
    x = jax.random.normal(xkey, (B, C, IMG, IMG), jnp.float32)

    out = vit_forward(x, params, patch_size=PATCH)
    out = jax.block_until_ready(out)

    assert out.shape == (B, NUM_CLASSES), out.shape
    assert bool(jnp.isfinite(out).all())
    print("KERNEL_OK")
</pallas_src>

<mosaic_0001>
module attributes {stable_mosaic.version = 11 : i64} {
  func.func @_vit_kernel(%arg0: memref<48x64xf32, #tpu.memory_space<vmem>>, %arg1: memref<64x32xf32, #tpu.memory_space<vmem>>, %arg2: memref<24x32xf32, #tpu.memory_space<vmem>>, %arg3: memref<32x32xf32, #tpu.memory_space<vmem>>, %arg4: memref<1x32xf32, #tpu.memory_space<vmem>>, %arg5: memref<1x32xf32, #tpu.memory_space<vmem>>, %arg6: memref<32x8xf32, #tpu.memory_space<vmem>>, %arg7: memref<1x8xf32, #tpu.memory_space<vmem>>, %arg8: memref<2x1x32xf32, #tpu.memory_space<vmem>>, %arg9: memref<2x1x32xf32, #tpu.memory_space<vmem>>, %arg10: memref<2x32x96xf32, #tpu.memory_space<vmem>>, %arg11: memref<2x1x96xf32, #tpu.memory_space<vmem>>, %arg12: memref<2x32x32xf32, #tpu.memory_space<vmem>>, %arg13: memref<2x1x32xf32, #tpu.memory_space<vmem>>, %arg14: memref<2x1x32xf32, #tpu.memory_space<vmem>>, %arg15: memref<2x1x32xf32, #tpu.memory_space<vmem>>, %arg16: memref<2x32x64xf32, #tpu.memory_space<vmem>>, %arg17: memref<2x1x64xf32, #tpu.memory_space<vmem>>, %arg18: memref<2x64x32xf32, #tpu.memory_space<vmem>>, %arg19: memref<2x1x32xf32, #tpu.memory_space<vmem>>, %arg20: memref<2x8xf32, #tpu.memory_space<vmem>>, %arg21: memref<48x32xf32, #tpu.memory_space<vmem>>, %arg22: memref<48x32xf32, #tpu.memory_space<vmem>>) attributes {dimension_semantics = [], scalar_prefetch = 0 : i64, scratch_operands = 2 : i64, tpu.core_type = #tpu.core_type<tc>} {
    %c0 = arith.constant 0 : index
    %c0_0 = arith.constant 0 : index
    %0 = vector.load %arg0[%c0, %c0_0] : memref<48x64xf32, #tpu.memory_space<vmem>>, vector<48x64xf32>
    %c0_1 = arith.constant 0 : index
    %c0_2 = arith.constant 0 : index
    %1 = vector.load %arg1[%c0_1, %c0_2] : memref<64x32xf32, #tpu.memory_space<vmem>>, vector<64x32xf32>
    %cst = arith.constant dense<0.000000e+00> : vector<48x32xf32>
    %2 = tpu.matmul %0, %1, %cst {dimension_numbers = #tpu.dot_dimension_numbers<[1], [0], [0], [1], [0, 0, 1, 1], [], []>} : vector<48x64xf32>, vector<64x32xf32>, vector<48x32xf32> -> vector<48x32xf32>
    %c0_3 = arith.constant 0 : index
    %c0_4 = arith.constant 0 : index
    %3 = vector.load %arg2[%c0_3, %c0_4] : memref<24x32xf32, #tpu.memory_space<vmem>>, vector<24x32xf32>
    %4 = vector.extract_strided_slice %2 {offsets = [0, 0], sizes = [24, 32], strides = [1, 1]} : vector<48x32xf32> to vector<24x32xf32>
    %5 = arith.addf %4, %3 : vector<24x32xf32>
    %c0_5 = arith.constant 0 : index
    %c0_6 = arith.constant 0 : index
    %6 = vector.load %arg21[%c0_5, %c0_6] : memref<48x32xf32, #tpu.memory_space<vmem>>, vector<24x32xf32>
    tpu.vector_store %arg21[%c0_5, %c0_6], %5 {strides = array<i32>} : memref<48x32xf32, #tpu.memory_space<vmem>>, vector<24x32xf32>,
    %7 = vector.extract_strided_slice %2 {offsets = [24, 0], sizes = [24, 32], strides = [1, 1]} : vector<48x32xf32> to vector<24x32xf32>
    %8 = arith.addf %7, %3 : vector<24x32xf32>
    %c24 = arith.constant 24 : index
    %c0_7 = arith.constant 0 : index
    %9 = vector.load %arg21[%c24, %c0_7] : memref<48x32xf32, #tpu.memory_space<vmem>>, vector<24x32xf32>
    tpu.vector_store %arg21[%c24, %c0_7], %8 {strides = array<i32>} : memref<48x32xf32, #tpu.memory_space<vmem>>, vector<24x32xf32>,
    %c0_8 = arith.constant 0 : index
    %c0_9 = arith.constant 0 : index
    %10 = vector.load %arg3[%c0_8, %c0_9] : memref<32x32xf32, #tpu.memory_space<vmem>>, vector<32x32xf32>
    %c0_10 = arith.constant 0 : index
    %c0_11 = arith.constant 0 : index
    %11 = vector.load %arg21[%c0_10, %c0_11] : memref<48x32xf32, #tpu.memory_space<vmem>>, vector<48x32xf32>
    %c0_12 = arith.constant 0 : index
    %c0_13 = arith.constant 0 : index
    %c0_14 = arith.constant 0 : index
    %12 = vector.load %arg8[%c0_12, %c0_13, %c0_14] : memref<2x1x32xf32, #tpu.memory_space<vmem>>, vector<1x1x32xf32>
    %13 = vector.shape_cast %12 : vector<1x1x32xf32> to vector<1x32xf32>
    %c0_15 = arith.constant 0 : index
    %c0_16 = arith.constant 0 : index
    %c0_17 = arith.constant 0 : index
    %14 = vector.load %arg9[%c0_15, %c0_16, %c0_17] : memref<2x1x32xf32, #tpu.memory_space<vmem>>, vector<1x1x32xf32>
    %15 = vector.shape_cast %14 : vector<1x1x32xf32> to vector<1x32xf32>
    %cst_18 = arith.constant dense<0.000000e+00> : vector<48xf32>
    %16 = vector.multi_reduction <add>, %11, %cst_18 [1] : vector<48x32xf32> to vector<48xf32>
    %17 = vector.shape_cast %16 : vector<48xf32> to vector<48x1xf32>
    %cst_19 = arith.constant 3.200000e+01 : f32
    %18 = vector.broadcast %cst_19 : f32 to vector<48x1xf32>
    %19 = arith.divf %17, %18 : vector<48x1xf32>
    %20 = vector.broadcast %19 : vector<48x1xf32> to vector<48x32xf32>
    %21 = arith.subf %11, %20 : vector<48x32xf32>
    %22 = arith.mulf %21, %21 : vector<48x32xf32>
    %cst_20 = arith.constant dense<0.000000e+00> : vector<48xf32>
    %23 = vector.multi_reduction <add>, %22, %cst_20 [1] : vector<48x32xf32> to vector<48xf32>
    %24 = vector.shape_cast %23 : vector<48xf32> to vector<48x1xf32>
    %cst_21 = arith.constant 3.200000e+01 : f32
    %25 = vector.broadcast %cst_21 : f32 to vector<48x1xf32>
    %26 = arith.divf %24, %25 : vector<48x1xf32>
    %cst_22 = arith.constant 9.99999974E-6 : f32
    %27 = vector.broadcast %cst_22 : f32 to vector<48x1xf32>
    %28 = arith.addf %26, %27 : vector<48x1xf32>
    %29 = math.rsqrt %28 : vector<48x1xf32>
    %30 = vector.broadcast %29 : vector<48x1xf32> to vector<48x32xf32>
    %31 = arith.mulf %21, %30 : vector<48x32xf32>
    %32 = vector.broadcast %13 : vector<1x32xf32> to vector<48x32xf32>
    %33 = arith.mulf %31, %32 : vector<48x32xf32>
    %34 = vector.broadcast %15 : vector<1x32xf32> to vector<48x32xf32>
    %35 = arith.addf %33, %34 : vector<48x32xf32>
    %c0_23 = arith.constant 0 : index
    %c0_24 = arith.constant 0 : index
    %c0_25 = arith.constant 0 : index
    %36 = vector.load %arg10[%c0_23, %c0_24, %c0_25] : memref<2x32x96xf32, #tpu.memory_space<vmem>>, vector<1x32x96xf32>
    %37 = vector.shape_cast %36 : vector<1x32x96xf32> to vector<32x96xf32>
    %cst_26 = arith.constant dense<0.000000e+00> : vector<48x96xf32>
    %38 = tpu.matmul %35, %37, %cst_26 {dimension_numbers = #tpu.dot_dimension_numbers<[1], [0], [0], [1], [0, 0, 1, 1], [], []>} : vector<48x32xf32>, vector<32x96xf32>, vector<48x96xf32> -> vector<48x96xf32>
    %c0_27 = arith.constant 0 : index
    %c0_28 = arith.constant 0 : index
    %c0_29 = arith.constant 0 : index
    %39 = vector.load %arg11[%c0_27, %c0_28, %c0_29] : memref<2x1x96xf32, #tpu.memory_space<vmem>>, vector<1x1x96xf32>
    %40 = vector.shape_cast %39 : vector<1x1x96xf32> to vector<1x96xf32>
    %41 = vector.broadcast %40 : vector<1x96xf32> to vector<48x96xf32>
    %42 = arith.addf %38, %41 : vector<48x96xf32>
    %43 = vector.extract_strided_slice %42 {offsets = [0, 0], sizes = [48, 32], strides = [1, 1]} : vector<48x96xf32> to vector<48x32xf32>
    %44 = vector.extract_strided_slice %42 {offsets = [0, 32], sizes = [48, 32], strides = [1, 1]} : vector<48x96xf32> to vector<48x32xf32>
    %45 = vector.extract_strided_slice %42 {offsets = [0, 64], sizes = [48, 32], strides = [1, 1]} : vector<48x96xf32> to vector<48x32xf32>
    %46 = vector.extract_strided_slice %43 {offsets = [0, 0], sizes = [24, 32], strides = [1, 1]} : vector<48x32xf32> to vector<24x32xf32>
    %47 = vector.extract_strided_slice %44 {offsets = [0, 0], sizes = [24, 32], strides = [1, 1]} : vector<48x32xf32> to vector<24x32xf32>
    %48 = vector.extract_strided_slice %45 {offsets = [0, 0], sizes = [24, 32], strides = [1, 1]} : vector<48x32xf32> to vector<24x32xf32>
    %49 = arith.mulf %46, %47 : vector<24x32xf32>
    %cst_30 = arith.constant dense<0.000000e+00> : vector<24x32xf32>
    %50 = tpu.matmul %49, %10, %cst_30 {dimension_numbers = #tpu.dot_dimension_numbers<[1], [0], [0], [1], [0, 0, 1, 1], [], []>} : vector<24x32xf32>, vector<32x32xf32>, vector<24x32xf32> -> vector<24x32xf32>
    %cst_31 = arith.constant 1.000000e+00 : f32
    %51 = vector.broadcast %cst_31 : f32 to vector<24x32xf32>
    %52 = vector.extract_strided_slice %44 {offsets = [24, 0], sizes = [24, 32], strides = [1, 1]} : vector<48x32xf32> to vector<24x32xf32>
    %53 = vector.extract_strided_slice %45 {offsets = [24, 0], sizes = [24, 32], strides = [1, 1]} : vector<48x32xf32> to vector<24x32xf32>
    %54 = arith.mulf %46, %52 : vector<24x32xf32>
    %cst_32 = arith.constant dense<0.000000e+00> : vector<24x32xf32>
    %55 = tpu.matmul %54, %10, %cst_32 {dimension_numbers = #tpu.dot_dimension_numbers<[1], [0], [0], [1], [0, 0, 1, 1], [], []>} : vector<24x32xf32>, vector<32x32xf32>, vector<24x32xf32> -> vector<24x32xf32>
    %56 = arith.maximumf %50, %55 : vector<24x32xf32>
    %57 = arith.subf %50, %56 : vector<24x32xf32>
    %58 = math.exp %57 : vector<24x32xf32>
    %59 = arith.subf %55, %56 : vector<24x32xf32>
    %60 = math.exp %59 : vector<24x32xf32>
    %61 = arith.mulf %58, %51 : vector<24x32xf32>
    %62 = arith.addf %61, %60 : vector<24x32xf32>
    %63 = arith.mulf %58, %48 : vector<24x32xf32>
    %64 = arith.mulf %60, %53 : vector<24x32xf32>
    %65 = arith.addf %63, %64 : vector<24x32xf32>
    %66 = arith.divf %65, %62 : vector<24x32xf32>
    %c0_33 = arith.constant 0 : index
    %c0_34 = arith.constant 0 : index
    %67 = vector.load %arg22[%c0_33, %c0_34] : memref<48x32xf32, #tpu.memory_space<vmem>>, vector<24x32xf32>
    tpu.vector_store %arg22[%c0_33, %c0_34], %66 {strides = array<i32>} : memref<48x32xf32, #tpu.memory_space<vmem>>, vector<24x32xf32>,
    %68 = vector.extract_strided_slice %43 {offsets = [24, 0], sizes = [24, 32], strides = [1, 1]} : vector<48x32xf32> to vector<24x32xf32>
    %69 = vector.extract_strided_slice %44 {offsets = [0, 0], sizes = [24, 32], strides = [1, 1]} : vector<48x32xf32> to vector<24x32xf32>
    %70 = vector.extract_strided_slice %45 {offsets = [0, 0], sizes = [24, 32], strides = [1, 1]} : vector<48x32xf32> to vector<24x32xf32>
    %71 = arith.mulf %68, %69 : vector<24x32xf32>
    %cst_35 = arith.constant dense<0.000000e+00> : vector<24x32xf32>
    %72 = tpu.matmul %71, %10, %cst_35 {dimension_numbers = #tpu.dot_dimension_numbers<[1], [0], [0], [1], [0, 0, 1, 1], [], []>} : vector<24x32xf32>, vector<32x32xf32>, vector<24x32xf32> -> vector<24x32xf32>
    %cst_36 = arith.constant 1.000000e+00 : f32
    %73 = vector.broadcast %cst_36 : f32 to vector<24x32xf32>
    %74 = vector.extract_strided_slice %44 {offsets = [24, 0], sizes = [24, 32], strides = [1, 1]} : vector<48x32xf32> to vector<24x32xf32>
    %75 = vector.extract_strided_slice %45 {offsets = [24, 0], sizes = [24, 32], strides = [1, 1]} : vector<48x32xf32> to vector<24x32xf32>
    %76 = arith.mulf %68, %74 : vector<24x32xf32>
    %cst_37 = arith.constant dense<0.000000e+00> : vector<24x32xf32>
    %77 = tpu.matmul %76, %10, %cst_37 {dimension_numbers = #tpu.dot_dimension_numbers<[1], [0], [0], [1], [0, 0, 1, 1], [], []>} : vector<24x32xf32>, vector<32x32xf32>, vector<24x32xf32> -> vector<24x32xf32>
    %78 = arith.maximumf %72, %77 : vector<24x32xf32>
    %79 = arith.subf %72, %78 : vector<24x32xf32>
    %80 = math.exp %79 : vector<24x32xf32>
    %81 = arith.subf %77, %78 : vector<24x32xf32>
    %82 = math.exp %81 : vector<24x32xf32>
    %83 = arith.mulf %80, %73 : vector<24x32xf32>
    %84 = arith.addf %83, %82 : vector<24x32xf32>
    %85 = arith.mulf %80, %70 : vector<24x32xf32>
    %86 = arith.mulf %82, %75 : vector<24x32xf32>
    %87 = arith.addf %85, %86 : vector<24x32xf32>
    %88 = arith.divf %87, %84 : vector<24x32xf32>
    %c24_38 = arith.constant 24 : index
    %c0_39 = arith.constant 0 : index
    %89 = vector.load %arg22[%c24_38, %c0_39] : memref<48x32xf32, #tpu.memory_space<vmem>>, vector<24x32xf32>
    tpu.vector_store %arg22[%c24_38, %c0_39], %88 {strides = array<i32>} : memref<48x32xf32, #tpu.memory_space<vmem>>, vector<24x32xf32>,
    %c0_40 = arith.constant 0 : index
    %c0_41 = arith.constant 0 : index
    %90 = vector.load %arg22[%c0_40, %c0_41] : memref<48x32xf32, #tpu.memory_space<vmem>>, vector<48x32xf32>
    %c0_42 = arith.constant 0 : index
    %c0_43 = arith.constant 0 : index
    %c0_44 = arith.constant 0 : index
    %91 = vector.load %arg12[%c0_42, %c0_43, %c0_44] : memref<2x32x32xf32, #tpu.memory_space<vmem>>, vector<1x32x32xf32>
    %92 = vector.shape_cast %91 : vector<1x32x32xf32> to vector<32x32xf32>
    %cst_45 = arith.constant dense<0.000000e+00> : vector<48x32xf32>
    %93 = tpu.matmul %90, %92, %cst_45 {dimension_numbers = #tpu.dot_dimension_numbers<[1], [0], [0], [1], [0, 0, 1, 1], [], []>} : vector<48x32xf32>, vector<32x32xf32>, vector<48x32xf32> -> vector<48x32xf32>
    %c0_46 = arith.constant 0 : index
    %c0_47 = arith.constant 0 : index
    %c0_48 = arith.constant 0 : index
    %94 = vector.load %arg13[%c0_46, %c0_47, %c0_48] : memref<2x1x32xf32, #tpu.memory_space<vmem>>, vector<1x1x32xf32>
    %95 = vector.shape_cast %94 : vector<1x1x32xf32> to vector<1x32xf32>
    %96 = vector.broadcast %95 : vector<1x32xf32> to vector<48x32xf32>
    %97 = arith.addf %93, %96 : vector<48x32xf32>
    %98 = arith.addf %11, %97 : vector<48x32xf32>
    %c0_49 = arith.constant 0 : index
    %c0_50 = arith.constant 0 : index
    %c0_51 = arith.constant 0 : index
    %99 = vector.load %arg14[%c0_49, %c0_50, %c0_51] : memref<2x1x32xf32, #tpu.memory_space<vmem>>, vector<1x1x32xf32>
    %100 = vector.shape_cast %99 : vector<1x1x32xf32> to vector<1x32xf32>
    %c0_52 = arith.constant 0 : index
    %c0_53 = arith.constant 0 : index
    %c0_54 = arith.constant 0 : index
    %101 = vector.load %arg15[%c0_52, %c0_53, %c0_54] : memref<2x1x32xf32, #tpu.memory_space<vmem>>, vector<1x1x32xf32>
    %102 = vector.shape_cast %101 : vector<1x1x32xf32> to vector<1x32xf32>
    %cst_55 = arith.constant dense<0.000000e+00> : vector<48xf32>
    %103 = vector.multi_reduction <add>, %98, %cst_55 [1] : vector<48x32xf32> to vector<48xf32>
    %104 = vector.shape_cast %103 : vector<48xf32> to vector<48x1xf32>
    %cst_56 = arith.constant 3.200000e+01 : f32
    %105 = vector.broadcast %cst_56 : f32 to vector<48x1xf32>
    %106 = arith.divf %104, %105 : vector<48x1xf32>
    %107 = vector.broadcast %106 : vector<48x1xf32> to vector<48x32xf32>
    %108 = arith.subf %98, %107 : vector<48x32xf32>
    %109 = arith.mulf %108, %108 : vector<48x32xf32>
    %cst_57 = arith.constant dense<0.000000e+00> : vector<48xf32>
    %110 = vector.multi_reduction <add>, %109, %cst_57 [1] : vector<48x32xf32> to vector<48xf32>
    %111 = vector.shape_cast %110 : vector<48xf32> to vector<48x1xf32>
    %cst_58 = arith.constant 3.200000e+01 : f32
    %112 = vector.broadcast %cst_58 : f32 to vector<48x1xf32>
    %113 = arith.divf %111, %112 : vector<48x1xf32>
    %cst_59 = arith.constant 9.99999974E-6 : f32
    %114 = vector.broadcast %cst_59 : f32 to vector<48x1xf32>
    %115 = arith.addf %113, %114 : vector<48x1xf32>
    %116 = math.rsqrt %115 : vector<48x1xf32>
    %117 = vector.broadcast %116 : vector<48x1xf32> to vector<48x32xf32>
    %118 = arith.mulf %108, %117 : vector<48x32xf32>
    %119 = vector.broadcast %100 : vector<1x32xf32> to vector<48x32xf32>
    %120 = arith.mulf %118, %119 : vector<48x32xf32>
    %121 = vector.broadcast %102 : vector<1x32xf32> to vector<48x32xf32>
    %122 = arith.addf %120, %121 : vector<48x32xf32>
    %c0_60 = arith.constant 0 : index
    %c0_61 = arith.constant 0 : index
    %c0_62 = arith.constant 0 : index
    %123 = vector.load %arg16[%c0_60, %c0_61, %c0_62] : memref<2x32x64xf32, #tpu.memory_space<vmem>>, vector<1x32x64xf32>
    %124 = vector.shape_cast %123 : vector<1x32x64xf32> to vector<32x64xf32>
    %cst_63 = arith.constant dense<0.000000e+00> : vector<48x64xf32>
    %125 = tpu.matmul %122, %124, %cst_63 {dimension_numbers = #tpu.dot_dimension_numbers<[1], [0], [0], [1], [0, 0, 1, 1], [], []>} : vector<48x32xf32>, vector<32x64xf32>, vector<48x64xf32> -> vector<48x64xf32>
    %c0_64 = arith.constant 0 : index
    %c0_65 = arith.constant 0 : index
    %c0_66 = arith.constant 0 : index
    %126 = vector.load %arg17[%c0_64, %c0_65, %c0_66] : memref<2x1x64xf32, #tpu.memory_space<vmem>>, vector<1x1x64xf32>
    %127 = vector.shape_cast %126 : vector<1x1x64xf32> to vector<1x64xf32>
    %128 = vector.broadcast %127 : vector<1x64xf32> to vector<48x64xf32>
    %129 = arith.addf %125, %128 : vector<48x64xf32>
    %cst_67 = arith.constant 5.000000e-01 : f32
    %130 = vector.broadcast %cst_67 : f32 to vector<48x64xf32>
    %131 = arith.mulf %130, %129 : vector<48x64xf32>
    %cst_68 = arith.constant 0.707106769 : f32
    %132 = vector.broadcast %cst_68 : f32 to vector<48x64xf32>
    %133 = arith.mulf %129, %132 : vector<48x64xf32>
    %134 = math.absf %133 : vector<48x64xf32>
    %cst_69 = arith.constant 0.327591091 : f32
    %135 = vector.broadcast %cst_69 : f32 to vector<48x64xf32>
    %136 = arith.mulf %135, %134 : vector<48x64xf32>
    %cst_70 = arith.constant 1.000000e+00 : f32
    %137 = vector.broadcast %cst_70 : f32 to vector<48x64xf32>
    %138 = arith.addf %137, %136 : vector<48x64xf32>
    %cst_71 = arith.constant 1.000000e+00 : f32
    %139 = vector.broadcast %cst_71 : f32 to vector<48x64xf32>
    %140 = arith.divf %139, %138 : vector<48x64xf32>
    %cst_72 = arith.constant 1.06140542 : f32
    %141 = vector.broadcast %cst_72 : f32 to vector<48x64xf32>
    %142 = arith.mulf %141, %140 : vector<48x64xf32>
    %cst_73 = arith.constant -1.45315206 : f32
    %143 = vector.broadcast %cst_73 : f32 to vector<48x64xf32>
    %144 = arith.addf %142, %143 : vector<48x64xf32>
    %145 = arith.mulf %144, %140 : vector<48x64xf32>
    %cst_74 = arith.constant 1.42141378 : f32
    %146 = vector.broadcast %cst_74 : f32 to vector<48x64xf32>
    %147 = arith.addf %145, %146 : vector<48x64xf32>
    %148 = arith.mulf %147, %140 : vector<48x64xf32>
    %cst_75 = arith.constant -0.284496725 : f32
    %149 = vector.broadcast %cst_75 : f32 to vector<48x64xf32>
    %150 = arith.addf %148, %149 : vector<48x64xf32>
    %151 = arith.mulf %150, %140 : vector<48x64xf32>
    %cst_76 = arith.constant 0.254829586 : f32
    %152 = vector.broadcast %cst_76 : f32 to vector<48x64xf32>
    %153 = arith.addf %151, %152 : vector<48x64xf32>
    %154 = arith.mulf %153, %140 : vector<48x64xf32>
    %cst_77 = arith.constant 0.000000e+00 : f32
    %155 = vector.broadcast %cst_77 : f32 to vector<48x64xf32>
    %156 = arith.subf %155, %134 : vector<48x64xf32>
    %157 = arith.mulf %156, %134 : vector<48x64xf32>
    %158 = math.exp %157 : vector<48x64xf32>
    %159 = arith.mulf %154, %158 : vector<48x64xf32>
    %cst_78 = arith.constant 1.000000e+00 : f32
    %160 = vector.broadcast %cst_78 : f32 to vector<48x64xf32>
    %161 = arith.subf %160, %159 : vector<48x64xf32>
    %cst_79 = arith.constant 0.000000e+00 : f32
    %162 = vector.broadcast %cst_79 : f32 to vector<48x64xf32>
    %163 = arith.cmpf oge, %133, %162 : vector<48x64xf32>
    %cst_80 = arith.constant 0.000000e+00 : f32
    %164 = vector.broadcast %cst_80 : f32 to vector<48x64xf32>
    %165 = arith.subf %164, %161 : vector<48x64xf32>
    %166 = arith.select %163, %161, %165 : vector<48x64xi1>, vector<48x64xf32>
    %cst_81 = arith.constant 1.000000e+00 : f32
    %167 = vector.broadcast %cst_81 : f32 to vector<48x64xf32>
    %168 = arith.addf %167, %166 : vector<48x64xf32>
    %169 = arith.mulf %131, %168 : vector<48x64xf32>
    %c0_82 = arith.constant 0 : index
    %c0_83 = arith.constant 0 : index
    %c0_84 = arith.constant 0 : index
    %170 = vector.load %arg18[%c0_82, %c0_83, %c0_84] : memref<2x64x32xf32, #tpu.memory_space<vmem>>, vector<1x64x32xf32>
    %171 = vector.shape_cast %170 : vector<1x64x32xf32> to vector<64x32xf32>
    %cst_85 = arith.constant dense<0.000000e+00> : vector<48x32xf32>
    %172 = tpu.matmul %169, %171, %cst_85 {dimension_numbers = #tpu.dot_dimension_numbers<[1], [0], [0], [1], [0, 0, 1, 1], [], []>} : vector<48x64xf32>, vector<64x32xf32>, vector<48x32xf32> -> vector<48x32xf32>
    %c0_86 = arith.constant 0 : index
    %c0_87 = arith.constant 0 : index
    %c0_88 = arith.constant 0 : index
    %173 = vector.load %arg19[%c0_86, %c0_87, %c0_88] : memref<2x1x32xf32, #tpu.memory_space<vmem>>, vector<1x1x32xf32>
    %174 = vector.shape_cast %173 : vector<1x1x32xf32> to vector<1x32xf32>
    %175 = vector.broadcast %174 : vector<1x32xf32> to vector<48x32xf32>
    %176 = arith.addf %172, %175 : vector<48x32xf32>
    %177 = arith.addf %98, %176 : vector<48x32xf32>
    %c0_89 = arith.constant 0 : index
    %c0_90 = arith.constant 0 : index
    %178 = vector.load %arg21[%c0_89, %c0_90] : memref<48x32xf32, #tpu.memory_space<vmem>>, vector<48x32xf32>
    tpu.vector_store %arg21[%c0_89, %c0_90], %177 {strides = array<i32>} : memref<48x32xf32, #tpu.memory_space<vmem>>, vector<48x32xf32>,
    %c0_91 = arith.constant 0 : index
    %c0_92 = arith.constant 0 : index
    %179 = vector.load %arg21[%c0_91, %c0_92] : memref<48x32xf32, #tpu.memory_space<vmem>>, vector<48x32xf32>
    %c1 = arith.constant 1 : index
    %c0_93 = arith.constant 0 : index
    %c0_94 = arith.constant 0 : index
    %180 = vector.load %arg8[%c1, %c0_93, %c0_94] : memref<2x1x32xf32, #tpu.memory_space<vmem>>, vector<1x1x32xf32>
    %181 = vector.shape_cast %180 : vector<1x1x32xf32> to vector<1x32xf32>
    %c1_95 = arith.constant 1 : index
    %c0_96 = arith.constant 0 : index
    %c0_97 = arith.constant 0 : index
    %182 = vector.load %arg9[%c1_95, %c0_96, %c0_97] : memref<2x1x32xf32, #tpu.memory_space<vmem>>, vector<1x1x32xf32>
    %183 = vector.shape_cast %182 : vector<1x1x32xf32> to vector<1x32xf32>
    %cst_98 = arith.constant dense<0.000000e+00> : vector<48xf32>
    %184 = vector.multi_reduction <add>, %179, %cst_98 [1] : vector<48x32xf32> to vector<48xf32>
    %185 = vector.shape_cast %184 : vector<48xf32> to vector<48x1xf32>
    %cst_99 = arith.constant 3.200000e+01 : f32
    %186 = vector.broadcast %cst_99 : f32 to vector<48x1xf32>
    %187 = arith.divf %185, %186 : vector<48x1xf32>
    %188 = vector.broadcast %187 : vector<48x1xf32> to vector<48x32xf32>
    %189 = arith.subf %179, %188 : vector<48x32xf32>
    %190 = arith.mulf %189, %189 : vector<48x32xf32>
    %cst_100 = arith.constant dense<0.000000e+00> : vector<48xf32>
    %191 = vector.multi_reduction <add>, %190, %cst_100 [1] : vector<48x32xf32> to vector<48xf32>
    %192 = vector.shape_cast %191 : vector<48xf32> to vector<48x1xf32>
    %cst_101 = arith.constant 3.200000e+01 : f32
    %193 = vector.broadcast %cst_101 : f32 to vector<48x1xf32>
    %194 = arith.divf %192, %193 : vector<48x1xf32>
    %cst_102 = arith.constant 9.99999974E-6 : f32
    %195 = vector.broadcast %cst_102 : f32 to vector<48x1xf32>
    %196 = arith.addf %194, %195 : vector<48x1xf32>
    %197 = math.rsqrt %196 : vector<48x1xf32>
    %198 = vector.broadcast %197 : vector<48x1xf32> to vector<48x32xf32>
    %199 = arith.mulf %189, %198 : vector<48x32xf32>
    %200 = vector.broadcast %181 : vector<1x32xf32> to vector<48x32xf32>
    %201 = arith.mulf %199, %200 : vector<48x32xf32>
    %202 = vector.broadcast %183 : vector<1x32xf32> to vector<48x32xf32>
    %203 = arith.addf %201, %202 : vector<48x32xf32>
    %c1_103 = arith.constant 1 : index
    %c0_104 = arith.constant 0 : index
    %c0_105 = arith.constant 0 : index
    %204 = vector.load %arg10[%c1_103, %c0_104, %c0_105] : memref<2x32x96xf32, #tpu.memory_space<vmem>>, vector<1x32x96xf32>
    %205 = vector.shape_cast %204 : vector<1x32x96xf32> to vector<32x96xf32>
    %cst_106 = arith.constant dense<0.000000e+00> : vector<48x96xf32>
    %206 = tpu.matmul %203, %205, %cst_106 {dimension_numbers = #tpu.dot_dimension_numbers<[1], [0], [0], [1], [0, 0, 1, 1], [], []>} : vector<48x32xf32>, vector<32x96xf32>, vector<48x96xf32> -> vector<48x96xf32>
    %c1_107 = arith.constant 1 : index
    %c0_108 = arith.constant 0 : index
    %c0_109 = arith.constant 0 : index
    %207 = vector.load %arg11[%c1_107, %c0_108, %c0_109] : memref<2x1x96xf32, #tpu.memory_space<vmem>>, vector<1x1x96xf32>
    %208 = vector.shape_cast %207 : vector<1x1x96xf32> to vector<1x96xf32>
    %209 = vector.broadcast %208 : vector<1x96xf32> to vector<48x96xf32>
    %210 = arith.addf %206, %209 : vector<48x96xf32>
    %211 = vector.extract_strided_slice %210 {offsets = [0, 0], sizes = [48, 32], strides = [1, 1]} : vector<48x96xf32> to vector<48x32xf32>
    %212 = vector.extract_strided_slice %210 {offsets = [0, 32], sizes = [48, 32], strides = [1, 1]} : vector<48x96xf32> to vector<48x32xf32>
    %213 = vector.extract_strided_slice %210 {offsets = [0, 64], sizes = [48, 32], strides = [1, 1]} : vector<48x96xf32> to vector<48x32xf32>
    %214 = vector.extract_strided_slice %211 {offsets = [0, 0], sizes = [24, 32], strides = [1, 1]} : vector<48x32xf32> to vector<24x32xf32>
    %215 = vector.extract_strided_slice %212 {offsets = [0, 0], sizes = [24, 32], strides = [1, 1]} : vector<48x32xf32> to vector<24x32xf32>
    %216 = vector.extract_strided_slice %213 {offsets = [0, 0], sizes = [24, 32], strides = [1, 1]} : vector<48x32xf32> to vector<24x32xf32>
    %217 = arith.mulf %214, %215 : vector<24x32xf32>
    %cst_110 = arith.constant dense<0.000000e+00> : vector<24x32xf32>
    %218 = tpu.matmul %217, %10, %cst_110 {dimension_numbers = #tpu.dot_dimension_numbers<[1], [0], [0], [1], [0, 0, 1, 1], [], []>} : vector<24x32xf32>, vector<32x32xf32>, vector<24x32xf32> -> vector<24x32xf32>
    %cst_111 = arith.constant 1.000000e+00 : f32
    %219 = vector.broadcast %cst_111 : f32 to vector<24x32xf32>
    %220 = vector.extract_strided_slice %212 {offsets = [24, 0], sizes = [24, 32], strides = [1, 1]} : vector<48x32xf32> to vector<24x32xf32>
    %221 = vector.extract_strided_slice %213 {offsets = [24, 0], sizes = [24, 32], strides = [1, 1]} : vector<48x32xf32> to vector<24x32xf32>
    %222 = arith.mulf %214, %220 : vector<24x32xf32>
    %cst_112 = arith.constant dense<0.000000e+00> : vector<24x32xf32>
    %223 = tpu.matmul %222, %10, %cst_112 {dimension_numbers = #tpu.dot_dimension_numbers<[1], [0], [0], [1], [0, 0, 1, 1], [], []>} : vector<24x32xf32>, vector<32x32xf32>, vector<24x32xf32> -> vector<24x32xf32>
    %224 = arith.maximumf %218, %223 : vector<24x32xf32>
    %225 = arith.subf %218, %224 : vector<24x32xf32>
    %226 = math.exp %225 : vector<24x32xf32>
    %227 = arith.subf %223, %224 : vector<24x32xf32>
    %228 = math.exp %227 : vector<24x32xf32>
    %229 = arith.mulf %226, %219 : vector<24x32xf32>
    %230 = arith.addf %229, %228 : vector<24x32xf32>
    %231 = arith.mulf %226, %216 : vector<24x32xf32>
    %232 = arith.mulf %228, %221 : vector<24x32xf32>
    %233 = arith.addf %231, %232 : vector<24x32xf32>
    %234 = arith.divf %233, %230 : vector<24x32xf32>
    %c0_113 = arith.constant 0 : index
    %c0_114 = arith.constant 0 : index
    %235 = vector.load %arg22[%c0_113, %c0_114] : memref<48x32xf32, #tpu.memory_space<vmem>>, vector<24x32xf32>
    tpu.vector_store %arg22[%c0_113, %c0_114], %234 {strides = array<i32>} : memref<48x32xf32, #tpu.memory_space<vmem>>, vector<24x32xf32>,
    %236 = vector.extract_strided_slice %211 {offsets = [24, 0], sizes = [24, 32], strides = [1, 1]} : vector<48x32xf32> to vector<24x32xf32>
    %237 = vector.extract_strided_slice %212 {offsets = [0, 0], sizes = [24, 32], strides = [1, 1]} : vector<48x32xf32> to vector<24x32xf32>
    %238 = vector.extract_strided_slice %213 {offsets = [0, 0], sizes = [24, 32], strides = [1, 1]} : vector<48x32xf32> to vector<24x32xf32>
    %239 = arith.mulf %236, %237 : vector<24x32xf32>
    %cst_115 = arith.constant dense<0.000000e+00> : vector<24x32xf32>
    %240 = tpu.matmul %239, %10, %cst_115 {dimension_numbers = #tpu.dot_dimension_numbers<[1], [0], [0], [1], [0, 0, 1, 1], [], []>} : vector<24x32xf32>, vector<32x32xf32>, vector<24x32xf32> -> vector<24x32xf32>
    %cst_116 = arith.constant 1.000000e+00 : f32
    %241 = vector.broadcast %cst_116 : f32 to vector<24x32xf32>
    %242 = vector.extract_strided_slice %212 {offsets = [24, 0], sizes = [24, 32], strides = [1, 1]} : vector<48x32xf32> to vector<24x32xf32>
    %243 = vector.extract_strided_slice %213 {offsets = [24, 0], sizes = [24, 32], strides = [1, 1]} : vector<48x32xf32> to vector<24x32xf32>
    %244 = arith.mulf %236, %242 : vector<24x32xf32>
    %cst_117 = arith.constant dense<0.000000e+00> : vector<24x32xf32>
    %245 = tpu.matmul %244, %10, %cst_117 {dimension_numbers = #tpu.dot_dimension_numbers<[1], [0], [0], [1], [0, 0, 1, 1], [], []>} : vector<24x32xf32>, vector<32x32xf32>, vector<24x32xf32> -> vector<24x32xf32>
    %246 = arith.maximumf %240, %245 : vector<24x32xf32>
    %247 = arith.subf %240, %246 : vector<24x32xf32>
    %248 = math.exp %247 : vector<24x32xf32>
    %249 = arith.subf %245, %246 : vector<24x32xf32>
    %250 = math.exp %249 : vector<24x32xf32>
    %251 = arith.mulf %248, %241 : vector<24x32xf32>
    %252 = arith.addf %251, %250 : vector<24x32xf32>
    %253 = arith.mulf %248, %238 : vector<24x32xf32>
    %254 = arith.mulf %250, %243 : vector<24x32xf32>
    %255 = arith.addf %253, %254 : vector<24x32xf32>
    %256 = arith.divf %255, %252 : vector<24x32xf32>
    %c24_118 = arith.constant 24 : index
    %c0_119 = arith.constant 0 : index
    %257 = vector.load %arg22[%c24_118, %c0_119] : memref<48x32xf32, #tpu.memory_space<vmem>>, vector<24x32xf32>
    tpu.vector_store %arg22[%c24_118, %c0_119], %256 {strides = array<i32>} : memref<48x32xf32, #tpu.memory_space<vmem>>, vector<24x32xf32>,
    %c0_120 = arith.constant 0 : index
    %c0_121 = arith.constant 0 : index
    %258 = vector.load %arg22[%c0_120, %c0_121] : memref<48x32xf32, #tpu.memory_space<vmem>>, vector<48x32xf32>
    %c1_122 = arith.constant 1 : index
    %c0_123 = arith.constant 0 : index
    %c0_124 = arith.constant 0 : index
    %259 = vector.load %arg12[%c1_122, %c0_123, %c0_124] : memref<2x32x32xf32, #tpu.memory_space<vmem>>, vector<1x32x32xf32>
    %260 = vector.shape_cast %259 : vector<1x32x32xf32> to vector<32x32xf32>
    %cst_125 = arith.constant dense<0.000000e+00> : vector<48x32xf32>
    %261 = tpu.matmul %258, %260, %cst_125 {dimension_numbers = #tpu.dot_dimension_numbers<[1], [0], [0], [1], [0, 0, 1, 1], [], []>} : vector<48x32xf32>, vector<32x32xf32>, vector<48x32xf32> -> vector<48x32xf32>
    %c1_126 = arith.constant 1 : index
    %c0_127 = arith.constant 0 : index
    %c0_128 = arith.constant 0 : index
    %262 = vector.load %arg13[%c1_126, %c0_127, %c0_128] : memref<2x1x32xf32, #tpu.memory_space<vmem>>, vector<1x1x32xf32>
    %263 = vector.shape_cast %262 : vector<1x1x32xf32> to vector<1x32xf32>
    %264 = vector.broadcast %263 : vector<1x32xf32> to vector<48x32xf32>
    %265 = arith.addf %261, %264 : vector<48x32xf32>
    %266 = arith.addf %179, %265 : vector<48x32xf32>
    %c1_129 = arith.constant 1 : index
    %c0_130 = arith.constant 0 : index
    %c0_131 = arith.constant 0 : index
    %267 = vector.load %arg14[%c1_129, %c0_130, %c0_131] : memref<2x1x32xf32, #tpu.memory_space<vmem>>, vector<1x1x32xf32>
    %268 = vector.shape_cast %267 : vector<1x1x32xf32> to vector<1x32xf32>
    %c1_132 = arith.constant 1 : index
    %c0_133 = arith.constant 0 : index
    %c0_134 = arith.constant 0 : index
    %269 = vector.load %arg15[%c1_132, %c0_133, %c0_134] : memref<2x1x32xf32, #tpu.memory_space<vmem>>, vector<1x1x32xf32>
    %270 = vector.shape_cast %269 : vector<1x1x32xf32> to vector<1x32xf32>
    %cst_135 = arith.constant dense<0.000000e+00> : vector<48xf32>
    %271 = vector.multi_reduction <add>, %266, %cst_135 [1] : vector<48x32xf32> to vector<48xf32>
    %272 = vector.shape_cast %271 : vector<48xf32> to vector<48x1xf32>
    %cst_136 = arith.constant 3.200000e+01 : f32
    %273 = vector.broadcast %cst_136 : f32 to vector<48x1xf32>
    %274 = arith.divf %272, %273 : vector<48x1xf32>
    %275 = vector.broadcast %274 : vector<48x1xf32> to vector<48x32xf32>
    %276 = arith.subf %266, %275 : vector<48x32xf32>
    %277 = arith.mulf %276, %276 : vector<48x32xf32>
    %cst_137 = arith.constant dense<0.000000e+00> : vector<48xf32>
    %278 = vector.multi_reduction <add>, %277, %cst_137 [1] : vector<48x32xf32> to vector<48xf32>
    %279 = vector.shape_cast %278 : vector<48xf32> to vector<48x1xf32>
    %cst_138 = arith.constant 3.200000e+01 : f32
    %280 = vector.broadcast %cst_138 : f32 to vector<48x1xf32>
    %281 = arith.divf %279, %280 : vector<48x1xf32>
    %cst_139 = arith.constant 9.99999974E-6 : f32
    %282 = vector.broadcast %cst_139 : f32 to vector<48x1xf32>
    %283 = arith.addf %281, %282 : vector<48x1xf32>
    %284 = math.rsqrt %283 : vector<48x1xf32>
    %285 = vector.broadcast %284 : vector<48x1xf32> to vector<48x32xf32>
    %286 = arith.mulf %276, %285 : vector<48x32xf32>
    %287 = vector.broadcast %268 : vector<1x32xf32> to vector<48x32xf32>
    %288 = arith.mulf %286, %287 : vector<48x32xf32>
    %289 = vector.broadcast %270 : vector<1x32xf32> to vector<48x32xf32>
    %290 = arith.addf %288, %289 : vector<48x32xf32>
    %c1_140 = arith.constant 1 : index
    %c0_141 = arith.constant 0 : index
    %c0_142 = arith.constant 0 : index
    %291 = vector.load %arg16[%c1_140, %c0_141, %c0_142] : memref<2x32x64xf32, #tpu.memory_space<vmem>>, vector<1x32x64xf32>
    %292 = vector.shape_cast %291 : vector<1x32x64xf32> to vector<32x64xf32>
    %cst_143 = arith.constant dense<0.000000e+00> : vector<48x64xf32>
    %293 = tpu.matmul %290, %292, %cst_143 {dimension_numbers = #tpu.dot_dimension_numbers<[1], [0], [0], [1], [0, 0, 1, 1], [], []>} : vector<48x32xf32>, vector<32x64xf32>, vector<48x64xf32> -> vector<48x64xf32>
    %c1_144 = arith.constant 1 : index
    %c0_145 = arith.constant 0 : index
    %c0_146 = arith.constant 0 : index
    %294 = vector.load %arg17[%c1_144, %c0_145, %c0_146] : memref<2x1x64xf32, #tpu.memory_space<vmem>>, vector<1x1x64xf32>
    %295 = vector.shape_cast %294 : vector<1x1x64xf32> to vector<1x64xf32>
    %296 = vector.broadcast %295 : vector<1x64xf32> to vector<48x64xf32>
    %297 = arith.addf %293, %296 : vector<48x64xf32>
    %cst_147 = arith.constant 5.000000e-01 : f32
    %298 = vector.broadcast %cst_147 : f32 to vector<48x64xf32>
    %299 = arith.mulf %298, %297 : vector<48x64xf32>
    %cst_148 = arith.constant 0.707106769 : f32
    %300 = vector.broadcast %cst_148 : f32 to vector<48x64xf32>
    %301 = arith.mulf %297, %300 : vector<48x64xf32>
    %302 = math.absf %301 : vector<48x64xf32>
    %cst_149 = arith.constant 0.327591091 : f32
    %303 = vector.broadcast %cst_149 : f32 to vector<48x64xf32>
    %304 = arith.mulf %303, %302 : vector<48x64xf32>
    %cst_150 = arith.constant 1.000000e+00 : f32
    %305 = vector.broadcast %cst_150 : f32 to vector<48x64xf32>
    %306 = arith.addf %305, %304 : vector<48x64xf32>
    %cst_151 = arith.constant 1.000000e+00 : f32
    %307 = vector.broadcast %cst_151 : f32 to vector<48x64xf32>
    %308 = arith.divf %307, %306 : vector<48x64xf32>
    %cst_152 = arith.constant 1.06140542 : f32
    %309 = vector.broadcast %cst_152 : f32 to vector<48x64xf32>
    %310 = arith.mulf %309, %308 : vector<48x64xf32>
    %cst_153 = arith.constant -1.45315206 : f32
    %311 = vector.broadcast %cst_153 : f32 to vector<48x64xf32>
    %312 = arith.addf %310, %311 : vector<48x64xf32>
    %313 = arith.mulf %312, %308 : vector<48x64xf32>
    %cst_154 = arith.constant 1.42141378 : f32
    %314 = vector.broadcast %cst_154 : f32 to vector<48x64xf32>
    %315 = arith.addf %313, %314 : vector<48x64xf32>
    %316 = arith.mulf %315, %308 : vector<48x64xf32>
    %cst_155 = arith.constant -0.284496725 : f32
    %317 = vector.broadcast %cst_155 : f32 to vector<48x64xf32>
    %318 = arith.addf %316, %317 : vector<48x64xf32>
    %319 = arith.mulf %318, %308 : vector<48x64xf32>
    %cst_156 = arith.constant 0.254829586 : f32
    %320 = vector.broadcast %cst_156 : f32 to vector<48x64xf32>
    %321 = arith.addf %319, %320 : vector<48x64xf32>
    %322 = arith.mulf %321, %308 : vector<48x64xf32>
    %cst_157 = arith.constant 0.000000e+00 : f32
    %323 = vector.broadcast %cst_157 : f32 to vector<48x64xf32>
    %324 = arith.subf %323, %302 : vector<48x64xf32>
    %325 = arith.mulf %324, %302 : vector<48x64xf32>
    %326 = math.exp %325 : vector<48x64xf32>
    %327 = arith.mulf %322, %326 : vector<48x64xf32>
    %cst_158 = arith.constant 1.000000e+00 : f32
    %328 = vector.broadcast %cst_158 : f32 to vector<48x64xf32>
    %329 = arith.subf %328, %327 : vector<48x64xf32>
    %cst_159 = arith.constant 0.000000e+00 : f32
    %330 = vector.broadcast %cst_159 : f32 to vector<48x64xf32>
    %331 = arith.cmpf oge, %301, %330 : vector<48x64xf32>
    %cst_160 = arith.constant 0.000000e+00 : f32
    %332 = vector.broadcast %cst_160 : f32 to vector<48x64xf32>
    %333 = arith.subf %332, %329 : vector<48x64xf32>
    %334 = arith.select %331, %329, %333 : vector<48x64xi1>, vector<48x64xf32>
    %cst_161 = arith.constant 1.000000e+00 : f32
    %335 = vector.broadcast %cst_161 : f32 to vector<48x64xf32>
    %336 = arith.addf %335, %334 : vector<48x64xf32>
    %337 = arith.mulf %299, %336 : vector<48x64xf32>
    %c1_162 = arith.constant 1 : index
    %c0_163 = arith.constant 0 : index
    %c0_164 = arith.constant 0 : index
    %338 = vector.load %arg18[%c1_162, %c0_163, %c0_164] : memref<2x64x32xf32, #tpu.memory_space<vmem>>, vector<1x64x32xf32>
    %339 = vector.shape_cast %338 : vector<1x64x32xf32> to vector<64x32xf32>
    %cst_165 = arith.constant dense<0.000000e+00> : vector<48x32xf32>
    %340 = tpu.matmul %337, %339, %cst_165 {dimension_numbers = #tpu.dot_dimension_numbers<[1], [0], [0], [1], [0, 0, 1, 1], [], []>} : vector<48x64xf32>, vector<64x32xf32>, vector<48x32xf32> -> vector<48x32xf32>
    %c1_166 = arith.constant 1 : index
    %c0_167 = arith.constant 0 : index
    %c0_168 = arith.constant 0 : index
    %341 = vector.load %arg19[%c1_166, %c0_167, %c0_168] : memref<2x1x32xf32, #tpu.memory_space<vmem>>, vector<1x1x32xf32>
    %342 = vector.shape_cast %341 : vector<1x1x32xf32> to vector<1x32xf32>
    %343 = vector.broadcast %342 : vector<1x32xf32> to vector<48x32xf32>
    %344 = arith.addf %340, %343 : vector<48x32xf32>
    %345 = arith.addf %266, %344 : vector<48x32xf32>
    %c0_169 = arith.constant 0 : index
    %c0_170 = arith.constant 0 : index
    %346 = vector.load %arg21[%c0_169, %c0_170] : memref<48x32xf32, #tpu.memory_space<vmem>>, vector<48x32xf32>
    tpu.vector_store %arg21[%c0_169, %c0_170], %345 {strides = array<i32>} : memref<48x32xf32, #tpu.memory_space<vmem>>, vector<48x32xf32>,
    %c0_171 = arith.constant 0 : index
    %c0_172 = arith.constant 0 : index
    %347 = vector.load %arg21[%c0_171, %c0_172] : memref<48x32xf32, #tpu.memory_space<vmem>>, vector<48x32xf32>
    %348 = vector.extract_strided_slice %347 {offsets = [0, 0], sizes = [1, 32], strides = [1, 1]} : vector<48x32xf32> to vector<1x32xf32>
    %349 = vector.extract_strided_slice %347 {offsets = [24, 0], sizes = [1, 32], strides = [1, 1]} : vector<48x32xf32> to vector<1x32xf32>
    %350 = tpu.concatenate %348, %349 in 0 : vector<1x32xf32>, vector<1x32xf32> -> vector<2x32xf32>
    %c0_173 = arith.constant 0 : index
    %c0_174 = arith.constant 0 : index
    %351 = vector.load %arg4[%c0_173, %c0_174] : memref<1x32xf32, #tpu.memory_space<vmem>>, vector<1x32xf32>
    %c0_175 = arith.constant 0 : index
    %c0_176 = arith.constant 0 : index
    %352 = vector.load %arg5[%c0_175, %c0_176] : memref<1x32xf32, #tpu.memory_space<vmem>>, vector<1x32xf32>
    %cst_177 = arith.constant dense<0.000000e+00> : vector<2xf32>
    %353 = vector.multi_reduction <add>, %350, %cst_177 [1] : vector<2x32xf32> to vector<2xf32>
    %354 = vector.shape_cast %353 : vector<2xf32> to vector<2x1xf32>
    %cst_178 = arith.constant 3.200000e+01 : f32
    %355 = vector.broadcast %cst_178 : f32 to vector<2x1xf32>
    %356 = arith.divf %354, %355 : vector<2x1xf32>
    %357 = vector.broadcast %356 : vector<2x1xf32> to vector<2x32xf32>
    %358 = arith.subf %350, %357 : vector<2x32xf32>
    %359 = arith.mulf %358, %358 : vector<2x32xf32>
    %cst_179 = arith.constant dense<0.000000e+00> : vector<2xf32>
    %360 = vector.multi_reduction <add>, %359, %cst_179 [1] : vector<2x32xf32> to vector<2xf32>
    %361 = vector.shape_cast %360 : vector<2xf32> to vector<2x1xf32>
    %cst_180 = arith.constant 3.200000e+01 : f32
    %362 = vector.broadcast %cst_180 : f32 to vector<2x1xf32>
    %363 = arith.divf %361, %362 : vector<2x1xf32>
    %cst_181 = arith.constant 9.99999974E-6 : f32
    %364 = vector.broadcast %cst_181 : f32 to vector<2x1xf32>
    %365 = arith.addf %363, %364 : vector<2x1xf32>
    %366 = math.rsqrt %365 : vector<2x1xf32>
    %367 = vector.broadcast %366 : vector<2x1xf32> to vector<2x32xf32>
    %368 = arith.mulf %358, %367 : vector<2x32xf32>
    %369 = vector.broadcast %351 : vector<1x32xf32> to vector<2x32xf32>
    %370 = arith.mulf %368, %369 : vector<2x32xf32>
    %371 = vector.broadcast %352 : vector<1x32xf32> to vector<2x32xf32>
    %372 = arith.addf %370, %371 : vector<2x32xf32>
    %c0_182 = arith.constant 0 : index
    %c0_183 = arith.constant 0 : index
    %373 = vector.load %arg6[%c0_182, %c0_183] : memref<32x8xf32, #tpu.memory_space<vmem>>, vector<32x8xf32>
    %cst_184 = arith.constant dense<0.000000e+00> : vector<2x8xf32>
    %374 = tpu.matmul %372, %373, %cst_184 {dimension_numbers = #tpu.dot_dimension_numbers<[1], [0], [0], [1], [0, 0, 1, 1], [], []>} : vector<2x32xf32>, vector<32x8xf32>, vector<2x8xf32> -> vector<2x8xf32>
    %c0_185 = arith.constant 0 : index
    %c0_186 = arith.constant 0 : index
    %375 = vector.load %arg7[%c0_185, %c0_186] : memref<1x8xf32, #tpu.memory_space<vmem>>, vector<1x8xf32>
    %376 = vector.broadcast %375 : vector<1x8xf32> to vector<2x8xf32>
    %377 = arith.addf %374, %376 : vector<2x8xf32>
    %c0_187 = arith.constant 0 : index
    %c0_188 = arith.constant 0 : index
    %378 = vector.load %arg20[%c0_187, %c0_188] : memref<2x8xf32, #tpu.memory_space<vmem>>, vector<2x8xf32>
    tpu.vector_store %arg20[%c0_187, %c0_188], %377 {strides = array<i32>} : memref<2x8xf32, #tpu.memory_space<vmem>>, vector<2x8xf32>,
    return
  }
}

</mosaic_0001>

<bundles_post_ra>
// kernel: vit_forward.1
= control target key start
LH: loop header
LB: loop body
LE: loop exit
PB: predicated region body
PF: predicated region fallthrough
CT: control target
= control target key end

     0   :  { %s5102_s0 = inlined_call_operand.vmem [shape: f32[48,64], index: 0, kind: input, shape index: {}]   ;;  %s5103_s1 = inlined_call_operand.vmem [shape: f32[64,32], index: 1, kind: input, shape index: {}]   ;;  %s5104_s2 = inlined_call_operand.vmem [shape: f32[24,32], index: 2, kind: input, shape index: {}]   ;;  %s5105_s3 = inlined_call_operand.vmem [shape: f32[32,32], index: 3, kind: input, shape index: {}]   ;;  %s5106_s4 = inlined_call_operand.vmem [shape: f32[1,32], index: 4, kind: input, shape index: {}]   ;;  %s5107_s5 = inlined_call_operand.vmem [shape: f32[1,32], index: 5, kind: input, shape index: {}]   ;;  %s5108_s6 = inlined_call_operand.vmem [shape: f32[32,8], index: 6, kind: input, shape index: {}]   ;;  %s5109_s7 = inlined_call_operand.vmem [shape: f32[1,8], index: 7, kind: input, shape index: {}]   ;;  %s5110_s8 = inlined_call_operand.vmem [shape: f32[2,1,32], index: 8, kind: input, shape index: {}]   ;;  %s5111_s9 = inlined_call_operand.vmem [shape: f32[2,1,32], index: 9, kind: input, shape index: {}]   ;;  %s5112_s10 = inlined_call_operand.vmem [shape: f32[2,32,96], index: 10, kind: input, shape index: {}]   ;;  %s5113_s11 = inlined_call_operand.vmem [shape: f32[2,1,96], index: 11, kind: input, shape index: {}]   ;;  %s5114_s12 = inlined_call_operand.vmem [shape: f32[2,32,32], index: 12, kind: input, shape index: {}]   ;;  %s5115_s13 = inlined_call_operand.vmem [shape: f32[2,1,32], index: 13, kind: input, shape index: {}]   ;;  %s5116_s14 = inlined_call_operand.vmem [shape: f32[2,1,32], index: 14, kind: input, shape index: {}]   ;;  %s5117_s15 = inlined_call_operand.vmem [shape: f32[2,1,32], index: 15, kind: input, shape index: {}]   ;;  %s5118_s16 = inlined_call_operand.vmem [shape: f32[2,32,64], index: 16, kind: input, shape index: {}]   ;;  %s5119_s17 = inlined_call_operand.vmem [shape: f32[2,1,64], index: 17, kind: input, shape index: {}]   ;;  %s5120_s18 = inlined_call_operand.vmem [shape: f32[2,64,32], index: 18, kind: input, shape index: {}]   ;;  %s5121_s19 = inlined_call_operand.vmem [shape: f32[2,1,32], index: 19, kind: input, shape index: {}]   ;;  %s5122_s20 = inlined_call_operand.hbm [shape: f32[2,8], index: 20, kind: output, shape index: {}]  }
   0x1   :  { %5127 = sst [smem:[#allocation7_spill]] %s5102_s0 }
   0x2   :  { %5128 = sst [smem:[#allocation8_spill]] %s5103_s1 }
   0x3   :  { %5129 = sst [smem:[#allocation9_spill]] %s5104_s2 }
   0x4   :  { %5130 = sst [smem:[#allocation10_spill]] %s5105_s3 }
   0x5   :  { %5131 = sst [smem:[#allocation11_spill]] %s5106_s4 }
   0x6   :  { %s5132_s23 = sld [smem:[#allocation8_spill]]  ;;  %vm80_vm0 = vcmask 523264   ;;  %s5133_s1 = sld [smem:[#allocation7_spill]] }
   0xc   :  { %v72_v0 = vld [vmem:[%s5132_s23] sm:$0xff]  ;;  %v73_v1 = vld [vmem:[%s5132_s23 + $0x8] sm:$0xff]  ;;  %v74_v2 = vld [vmem:[%s5132_s23 + $0x10] sm:$0xff] }
   0xd   :  { %v3765_v3 = vpack.c.bf16 %v73_v1, %v72_v0  ;;  %v75_v4 = vld [vmem:[%s5132_s23 + $0x18] sm:$0xff]  ;;  %v76_v6 = vld [vmem:[%s5132_s23 + $0x20] sm:$0xff]  ;;  %v77_v7 = vld [vmem:[%s5132_s23 + $0x28] sm:$0xff] }
   0xe   :  { %v3769_v5 = vpack.c.bf16 %v75_v4, %v74_v2  ;;  %v66_v8 = vld [vmem:[%s5133_s1] sm:$0xff] }
   0xf   :  { %3766 = vmatprep.subr.bf16.mxu0 %v3765_v3  ;;  %3457 = vmatprep.mubr.msk.f32.mxu0 %vm80_vm0, %v66_v8 }
  0x10   :  { %3768 = vmatpush3.bf16.msra.mxu0 %v3765_v3 }
  0x11   :  { %25 = vsyncpa [#allocation5], 0  ;;  %3770 = vmatprep.subr.bf16.mxu0 %v3769_v5  ;;  %v3773_v9 = vpack.c.bf16 %v77_v7, %v76_v6  ;;  %v78_v10 = vld [vmem:[%s5132_s23 + $0x30] sm:$0xff]  ;;  %v79_v11 = vld [vmem:[%s5132_s23 + $0x38] sm:$0xff]  ;;  %s5134_s2 = sld [smem:[#allocation9_spill]]  ;;  %vm200_vm1 = vcmask 261120  }
  0x12   :  { %v3777_v12 = vpack.c.bf16 %v79_v11, %v78_v10  ;;  %v67_v13 = vld [vmem:[%s5133_s1 + $0x8] sm:$0xff]  ;;  %v68_v14 = vld [vmem:[%s5133_s1 + $0x10] sm:$0xff]  ;;  %v69_v15 = vld [vmem:[%s5133_s1 + $0x18] sm:$0xff]  ;;  %s5135_s27 = sld [smem:[#allocation10_spill]]  ;;  %vm4116_vm2 = vmmov 0   ;;  %s4118_s22 = smov 96  }
  0x13   :  { %v70_v16 = vld [vmem:[%s5133_s1 + $0x20] sm:$0xff]  ;;  %v71_v17 = vld [vmem:[%s5133_s1 + $0x28] sm:$0xff]  ;;  %s4119_s24 = smov 64   ;;  %vm3020_vm15 = vcmask 1040384   ;;  %s4120_s26 = smov [#allocation4]  }
  0x14   :  { %3772 = vmatpush3.bf16.msra.mxu0 %v3769_v5  ;;  %v325_v11 = vld [vmem:[%s5112_s10] sm:$0xff] }
  0x15   :  { %3774 = vmatprep.subr.bf16.mxu0 %v3773_v9 }
  0x17   :  { %v195_v18 = vld [vmem:[%s5134_s2 + $0x8] sm:$0xff]  ;;  %v194_v19 = vld [vmem:[%s5134_s2] sm:$0xff]  ;;  %v196_v24 = vld [vmem:[%s5134_s2 + $0x10] sm:$0xff] }
  0x18   :  { %3776 = vmatpush3.bf16.msra.mxu0 %v3773_v9 }
  0x19   :  { %3778 = vmatprep.subr.bf16.mxu0 %v3777_v12 }
  0x1c   :  { %3780 = vmatpush3.bf16.msra.mxu0 %v3777_v12  ;;  %v326_v12 = vld [vmem:[%s5112_s10 + $0x8] sm:$0xff] }
  0x1f   :  { %3458 = vmatmul.mubr.msk.f32.vlgmr.msra.gmra.mrb[0].mxu0 %vm80_vm0, %v67_v13  ;;  %v3781_v13 = vpack.c.bf16 %v326_v12, %v325_v11  ;;  %v3160_v11 = vld [vmem:[%s5113_s11] ss:$0 sm:$0xff] }
  0x20   :  { %3460 = vmatprep.mubr.msk.f32.mxu0 %vm80_vm0, %v68_v14  ;;  %v327_v14 = vld [vmem:[%s5112_s10 + $0x10] sm:$0xff] }
  0x21   :  { %3782 = vmatprep.subr.bf16.mxu1 %v3781_v13 }
  0x22   :  { %3784 = vmatpush3.bf16.msra.mxu1 %v3781_v13 }
  0x23   :  { %3461 = vmatmul.mubr.msk.f32.gmra.mrb[2].mxu0 %vm80_vm0, %v69_v15  ;;  %v328_v15 = vld [vmem:[%s5112_s10 + $0x18] sm:$0xff] }
  0x24   :  { %3463 = vmatprep.mubr.msk.f32.mxu0 %vm80_vm0, %v70_v16  ;;  %v3785_v16 = vpack.c.bf16 %v328_v15, %v327_v14 }
  0x26   :  { %3786 = vmatprep.subr.bf16.mxu1 %v3785_v16 }
  0x27   :  { %3464 = vmatmul.mubr.msk.f32.gmra.mrb[4].mxu0 %vm80_vm0, %v71_v17  ;;  %3788 = vmatpush3.bf16.msra.mxu1 %v3785_v16 }
  0xf2   :  { %v3459_v20 = vpop.f32.mrb[0].mxu0 }
  0xf3   :  { %v198_v21 = vadd.f32 %v3459_v20, %v195_v18  ;;  %v165_v22 = vpop.f32.mrb[1].mxu0 }
  0xf4   :  { %v197_v23 = vadd.f32 %v194_v19, %v165_v22 }
  0xf5   :  { %202 = vst.msk [vmem:[#allocation2 + $0x8] sm:$0xff] %vm200_vm1, %v198_v21 }
  0xf6   :  { %201 = vst.msk [vmem:[#allocation2] sm:$0xff] %vm200_vm1, %v197_v23  ;;  %v3462_v25 = vpop.f32.mrb[2].mxu0 }
  0xf7   :  { %v204_v26 = vadd.f32 %v3462_v25, %v194_v19  ;;  %v175_v27 = vpop.f32.mrb[3].mxu0 }
  0xf8   :  { %v199_v28 = vadd.f32 %v196_v24, %v175_v27 }
  0xf9   :  { %207 = vst.msk [vmem:[#allocation2 + $0x18] sm:$0xff] %vm200_vm1, %v204_v26 }
  0xfa   :  { %203 = vst.msk [vmem:[#allocation2 + $0x10] sm:$0xff] %vm200_vm1, %v199_v28  ;;  %v3465_v29 = vpop.f32.mrb[4].mxu0 }
  0xfb   :  { %v206_v30 = vadd.f32 %v3465_v29, %v196_v24  ;;  %v185_v31 = vpop.f32.mrb[5].mxu0 }
  0xfc   :  { %v205_v32 = vadd.f32 %v195_v18, %v185_v31  ;;  %v4293_v35 = vld [vmem:[#allocation2 + $0x8] sm:$0xff] }
  0xfd   :  { %209 = vst.msk [vmem:[#allocation2 + $0x28] sm:$0xff] %vm200_vm1, %v206_v30  ;;  %v4288_v33 = vld [vmem:[#allocation2] sm:$0xff]  ;;  %v225_v37 = vsel %vm200_vm1, %v4293_v35, 0.0 }
  0xfe   :  { %208 = vst.msk [vmem:[#allocation2 + $0x20] sm:$0xff] %vm200_vm1, %v205_v32  ;;  %v222_v34 = vsel %vm200_vm1, %v4288_v33, 0.0 }
  0xff   :  { %223 = vadd.xlane.f32.xlu0 %v222_v34 }
 0x100   :  { %v4301_v39 = vld [vmem:[#allocation2 + $0x18] sm:$0xff] }
 0x101   :  { %v4295_v36 = vld [vmem:[#allocation2 + $0x10] sm:$0xff]  ;;  %v231_v41 = vsel %vm200_vm1, %v4301_v39, 0.0 }
 0x102   :  { %v228_v38 = vsel %vm200_vm1, %v4295_v36, 0.0 }
 0x103   :  { %226 = vadd.xlane.f32.xlu0 %v225_v37  ;;  %229 = vadd.xlane.f32.xlu1 %v228_v38 }
 0x104   :  { %v4309_v43 = vld [vmem:[#allocation2 + $0x28] sm:$0xff] }
 0x105   :  { %v4303_v40 = vld [vmem:[#allocation2 + $0x20] sm:$0xff]  ;;  %v237_v44 = vsel %vm200_vm1, %v4309_v43, 0.0 }
 0x106   :  { %v234_v42 = vsel %vm200_vm1, %v4303_v40, 0.0 }
 0x107   :  { %232 = vadd.xlane.f32.xlu1 %v231_v41  ;;  %235 = vadd.xlane.f32.xlu0 %v234_v42  ;;  %v3158_v41 = vld [vmem:[%s5110_s8] ss:$0 sm:$0xff] }
 0x10b   :  { %238 = vadd.xlane.f32.xlu1 %v237_v44  ;;  %v3159_v44 = vld [vmem:[%s5111_s9] ss:$0 sm:$0xff] }
 0x18c   :  { %v224_v45 = vpop.xlane.xlu0 %223 }
 0x18d   :  { %v241_v46 = vmul.f32 0.03125, %v224_v45 }
 0x18f   :  { %v4314_v47 = vsub.f32 %v4288_v33, %v241_v46 }
 0x190   :  { %v227_v48 = vpop.xlane.xlu0 %226  ;;  %v230_v49 = vpop.xlane.xlu1 %229 }
 0x191   :  { %v242_v50 = vmul.f32 0.03125, %v227_v48  ;;  %v243_v51 = vmul.f32 0.03125, %v230_v49  ;;  %v253_v52 = vmul.f32 %v4314_v47, %v4314_v47 }
 0x193   :  { %v4319_v53 = vsub.f32 %v4293_v35, %v242_v50  ;;  %v4322_v54 = vsub.f32 %v4295_v36, %v243_v51  ;;  %v259_v55 = vsel %vm200_vm1, %v253_v52, 0.0 }
 0x194   :  { %v233_v56 = vpop.xlane.xlu1 %232  ;;  %260 = vadd.xlane.f32.xlu0 %v259_v55  ;;  %v236_v57 = vpop.xlane.xlu0 %235 }
 0x195   :  { %v244_v58 = vmul.f32 0.03125, %v233_v56  ;;  %v245_v59 = vmul.f32 0.03125, %v236_v57  ;;  %v254_v60 = vmul.f32 %v4319_v53, %v4319_v53  ;;  %v255_v61 = vmul.f32 %v4322_v54, %v4322_v54 }
 0x197   :  { %v4330_v62 = vsub.f32 %v4301_v39, %v244_v58  ;;  %v4333_v63 = vsub.f32 %v4303_v40, %v245_v59  ;;  %v262_v0 = vsel %vm200_vm1, %v254_v60, 0.0  ;;  %v265_v1 = vsel %vm200_vm1, %v255_v61, 0.0 }
 0x198   :  { %263 = vadd.xlane.f32.xlu1 %v262_v0  ;;  %v239_v2 = vpop.xlane.xlu1 %238  ;;  %266 = vadd.xlane.f32.xlu0 %v265_v1 }
 0x199   :  { %v246_v3 = vmul.f32 0.03125, %v239_v2  ;;  %v256_v4 = vmul.f32 %v4330_v62, %v4330_v62  ;;  %v257_v5 = vmul.f32 %v4333_v63, %v4333_v63 }
 0x19b   :  { %v4342_v6 = vsub.f32 %v4309_v43, %v246_v3  ;;  %v268_v7 = vsel %vm200_vm1, %v256_v4, 0.0  ;;  %v271_v8 = vsel %vm200_vm1, %v257_v5, 0.0  ;;  %v211_v4 = vld [vmem:[%s5135_s27 + $0x8] sm:$0xff]  ;;  %v4115_v5 = vmov 0.0|0.0  }
 0x19c   :  { %269 = vadd.xlane.f32.xlu1 %v268_v7  ;;  %272 = vadd.xlane.f32.xlu0 %v271_v8  ;;  %v212_v7 = vld [vmem:[%s5135_s27 + $0x10] sm:$0xff]  ;;  %v213_v8 = vld [vmem:[%s5135_s27 + $0x18] sm:$0xff] }
 0x19d   :  { %v258_v9 = vmul.f32 %v4342_v6, %v4342_v6  ;;  %3789 = vmatprep.subr.bf16.mxu1 %v4115_v5  ;;  %3795 = vmatprep.subr.bf16.mxu0 %v4115_v5 }
 0x19f   :  { %v274_v10 = vsel %vm200_vm1, %v258_v9, 0.0  ;;  %v4399_v9 = vpack.c.bf16 %v213_v8, %v212_v7 }
 0x1a0   :  { %275 = vadd.xlane.f32.xlu1 %v274_v10  ;;  %v4117_v10 = vmov 0.0  }
 0x1a1   :  { %3508 = vmatprep.mubr.msk.f32.mxu0 %vm4116_vm2, %v4117_v10 }
 0x221   :  { %v261_v17 = vpop.xlane.xlu0 %260 }
 0x222   :  { %v277_v18 = vmul.f32 0.03125, %v261_v17 }
 0x224   :  { %v283_v19 = vadd.f32 1e-05, %v277_v18 }
 0x225   :  { %v264_v20 = vpop.xlane.xlu1 %263  ;;  %v267_v21 = vpop.xlane.xlu0 %266 }
 0x226   :  { %3921 = vrsqrt.f32 %v283_v19  ;;  %v278_v22 = vmul.f32 0.03125, %v264_v20  ;;  %v279_v23 = vmul.f32 0.03125, %v267_v21 }
 0x228   :  { %v284_v24 = vadd.f32 1e-05, %v278_v22  ;;  %v285_v25 = vadd.f32 1e-05, %v279_v23 }
 0x229   :  { %v270_v26 = vpop.xlane.xlu1 %269  ;;  %v273_v27 = vpop.xlane.xlu0 %272 }
 0x22a   :  { %3923 = vrsqrt.f32 %v284_v24  ;;  %v280_v28 = vmul.f32 0.03125, %v270_v26  ;;  %v281_v29 = vmul.f32 0.03125, %v273_v27 }
 0x22b   :  { %3925 = vrsqrt.f32 %v285_v25 }
 0x22c   :  { %v286_v30 = vadd.f32 1e-05, %v280_v28  ;;  %v287_v31 = vadd.f32 1e-05, %v281_v29 }
 0x22d   :  { %v276_v32 = vpop.xlane.xlu1 %275 }
 0x22e   :  { %3927 = vrsqrt.f32 %v286_v30  ;;  %v282_v34 = vmul.f32 0.03125, %v276_v32 }
 0x22f   :  { %3929 = vrsqrt.f32 %v287_v31 }
 0x230   :  { %v3922_v37 = vpop.eup %3921  ;;  %v288_v38 = vadd.f32 1e-05, %v282_v34 }
 0x231   :  { %v295_v42 = vmul.f32 %v3922_v37, %v4314_v47 }
 0x232   :  { %3931 = vrsqrt.f32 %v288_v38 }
 0x233   :  { %v307_v45 = vmul.f32 %v3158_v41, %v295_v42 }
 0x234   :  { %v3924_v46 = vpop.eup %3923 }
 0x235   :  { %v3926_v48 = vpop.eup %3925  ;;  %v319_v49 = vadd.f32 %v3159_v44, %v307_v45  ;;  %v296_v50 = vmul.f32 %v3924_v46, %v4319_v53 }
 0x236   :  { %v297_v51 = vmul.f32 %v3926_v48, %v4322_v54 }
 0x237   :  { %3474 = vmatprep.mubr.msk.f32.mxu1 %vm200_vm1, %v319_v49  ;;  %v308_v52 = vmul.f32 %v3158_v41, %v296_v50  ;;  %v949_v49 = vld [vmem:[%s5114_s12] sm:$0xff]  ;;  %v950_v50 = vld [vmem:[%s5114_s12 + $0x8] sm:$0xff] }
 0x238   :  { %v3928_v55 = vpop.eup %3927  ;;  %v309_v56 = vmul.f32 %v3158_v41, %v297_v51  ;;  %v3813_v51 = vpack.c.bf16 %v950_v50, %v949_v49 }
 0x239   :  { %v3930_v57 = vpop.eup %3929  ;;  %v320_v47 = vadd.f32 %v3159_v44, %v308_v52  ;;  %v298_v58 = vmul.f32 %v3928_v55, %v4330_v62  ;;  %v951_v52 = vld [vmem:[%s5114_s12 + $0x10] sm:$0xff]  ;;  %v952_v55 = vld [vmem:[%s5114_s12 + $0x18] sm:$0xff] }
 0x23a   :  { %v321_v59 = vadd.f32 %v3159_v44, %v309_v56  ;;  %v299_v60 = vmul.f32 %v3930_v57, %v4333_v63  ;;  %v210_v63 = vld [vmem:[%s5135_s27] sm:$0xff]  ;;  %v3817_v56 = vpack.c.bf16 %v952_v55, %v951_v52  ;;  %s3144_s27 = sshll.u32 %s4120_s26, 4  ;;  %s3145_s27 = int_to_ptr.vmem [resolvable:$true] %s3144_s27 }
 0x23b   :  { %3475 = vmatmul.mubr.msk.f32.vlgmr.msra.gmra.mrb[0].mxu1 %vm200_vm1, %v320_v47  ;;  %v310_v61 = vmul.f32 %v3158_v41, %v298_v58  ;;  %s4091_s1 = scalar_lea.vmem %s3145_s27, 32  ;;  %p4096_p1 = scmp.lt.s32.totalorder %s3145_s27, %s3145_s27 }
 0x23c   :  { %v3932_v0 = vpop.eup %3931  ;;  %3477 = vmatprep.mubr.msk.f32.mxu1 %vm200_vm1, %v321_v59  ;;  %v311_v53 = vmul.f32 %v3158_v41, %v299_v60  ;;  %p4092_p0 = scmp.ne.s32.totalorder %s3145_s27, %s4091_s1  ;;  %p4097_p2 = scmp.lt.s32.totalorder %s4091_s1, %s4091_s1 }
 0x23d   :  { %v322_v54 = vadd.f32 %v3159_v44, %v310_v61  ;;  %v300_v1 = vmul.f32 %v3932_v0, %v4342_v6  ;;  %v4387_v6 = vpack.c.bf16 %v211_v4, %v210_v63 }
 0x23e   :  { %v323_v2 = vadd.f32 %v3159_v44, %v311_v53  ;;  %p4098_p3 = por %p4097_p2, %p4096_p1 }
 0x23f   :  { %3478 = vmatmul.mubr.msk.f32.gmra.mrb[2].mxu1 %vm200_vm1, %v322_v54  ;;  %v312_v3 = vmul.f32 %v3158_v41, %v300_v1  ;;  %3797 = vmatpush3.bf16.msra.mxu0 %v4387_v6 }
 0x240   :  { %3480 = vmatprep.mubr.msk.f32.mxu1 %vm200_vm1, %v323_v2  ;;  %3791 = vmatpush3.bf16.msra.mxu1 %v4387_v6  ;;  %p4099_p4 = pnand %p4098_p3, %p4092_p0 }
 0x241   :  { %v324_v62 = vadd.f32 %v3159_v44, %v312_v3  ;;  %3792 = vmatprep.subr.bf16.mxu1 %v4115_v5  ;;  %3798 = vmatprep.subr.bf16.mxu0 %v4115_v5 }
 0x243   :  { %3481 = vmatmul.mubr.msk.f32.gmra.mrb[4].mxu1 %vm200_vm1, %v324_v62  ;;  %3800 = vmatpush3.bf16.msra.mxu0 %v4399_v9 }
 0x244   :  { %3794 = vmatpush3.bf16.msra.mxu1 %v4399_v9  ;;  %3491 = vmatprep.mubr.msk.f32.mxu1 %vm4116_vm2, %v4117_v10 }
 0x245   :  { %3801 = vmatprep.subr.bf16.mxu1 %v4115_v5  ;;  %3807 = vmatprep.subr.bf16.mxu0 %v4115_v5 }
 0x30e   :  { %v3476_v12 = vpop.f32.mrb[0].mxu1 }
 0x30f   :  { %v426_v13 = vadd.f32 %v3476_v12, %v3160_v11  ;;  %v420_v14 = vpop.f32.mrb[1].mxu1 }
 0x310   :  { %v421_v15 = vadd.f32 %v3160_v11, %v420_v14 }
 0x311   :  { %454 = vrot.lane.b32.xlu1 %v426_v13, %s4118_s22 }
 0x312   :  { %452 = vrot.lane.b32.xlu0 %v421_v15, %s4118_s22  ;;  %v3479_v16 = vpop.f32.mrb[2].mxu1 }
 0x313   :  { %v436_v17 = vadd.f32 %v3479_v16, %v3160_v11  ;;  %v430_v18 = vpop.f32.mrb[3].mxu1 }
 0x314   :  { %v431_v19 = vadd.f32 %v3160_v11, %v430_v18 }
 0x315   :  { %556 = vrot.lane.b32.xlu1 %v436_v17, %s4118_s22 }
 0x316   :  { %456 = vrot.lane.b32.xlu0 %v431_v19, %s4118_s22  ;;  %v3482_v20 = vpop.f32.mrb[4].mxu1 }
 0x317   :  { %v440_v21 = vpop.f32.mrb[5].mxu1  ;;  %v446_v23 = vadd.f32 %v3482_v20, %v3160_v11 }
 0x318   :  { %v441_v22 = vadd.f32 %v3160_v11, %v440_v21 }
 0x31a   :  { %681 = vrot.lane.b32.xlu0 %v421_v15, %s4119_s24  ;;  %558 = vrot.lane.b32.xlu1 %v441_v22, %s4118_s22 }
 0x31e   :  { %683 = vrot.lane.b32.xlu0 %v426_v13, %s4119_s24  ;;  %560 = vrot.lane.b32.xlu1 %v446_v23, %s4118_s22 }
 0x322   :  { %685 = vrot.lane.b32.xlu0 %v431_v19, %s4119_s24  ;;  %693 = vrot.lane.b32.xlu1 %v436_v17, %s4119_s24 }
 0x326   :  { %695 = vrot.lane.b32.xlu1 %v441_v22, %s4119_s24 }
 0x32a   :  { %697 = vrot.lane.b32.xlu1 %v446_v23, %s4119_s24 }
 0x383   :  { %v455_v24 = vpop.permute.xlu1 %454 }
 0x384   :  { %v453_v25 = vpop.permute.xlu0 %452  ;;  %v462_v29 = vmul.f32 %v455_v24, %v426_v13  ;;  %v718_v42 = vmul.f32 %v455_v24, %v441_v22 }
 0x385   :  { %v461_v26 = vmul.f32 %v453_v25, %v421_v15  ;;  %v717_v38 = vmul.f32 %v453_v25, %v436_v17 }
 0x387   :  { %v557_v27 = vpop.permute.xlu1 %556  ;;  %3492 = vmatmul.mubr.msk.f32.vlgmr.msra.gmra.mrb[6].mxu1 %vm200_vm1, %v461_v26 }
 0x388   :  { %v565_v28 = vmul.f32 %v557_v27, %v421_v15  ;;  %3494 = vmatprep.mubr.msk.f32.mxu1 %vm4116_vm2, %v4117_v10  ;;  %3803 = vmatpush3.bf16.msra.mxu1 %v4387_v6  ;;  %v457_v30 = vpop.permute.xlu0 %456  ;;  %v809_v44 = vmul.f32 %v557_v27, %v436_v17 }
 0x389   :  { %3804 = vmatprep.subr.bf16.mxu1 %v4115_v5  ;;  %v463_v32 = vmul.f32 %v457_v30, %v431_v19  ;;  %v719_v45 = vmul.f32 %v457_v30, %v446_v23 }
 0x38a   :  { %3509 = vmatmul.mubr.msk.f32.vlgmr.msra.gmra.mrb[6].mxu0 %vm200_vm1, %v565_v28 }
 0x38b   :  { %3495 = vmatmul.mubr.msk.f32.gmra.mrb[8].mxu1 %vm200_vm1, %v462_v29  ;;  %3809 = vmatpush3.bf16.msra.mxu0 %v4387_v6 }
 0x38c   :  { %v559_v31 = vpop.permute.xlu1 %558  ;;  %3497 = vmatprep.mubr.msk.f32.mxu1 %vm4116_vm2, %v4117_v10  ;;  %3511 = vmatprep.mubr.msk.f32.mxu0 %vm4116_vm2, %v4117_v10 }
 0x38d   :  { %v566_v34 = vmul.f32 %v559_v31, %v426_v13  ;;  %3810 = vmatprep.subr.bf16.mxu0 %v4115_v5  ;;  %3806 = vmatpush3.bf16.msra.mxu1 %v4399_v9  ;;  %v810_v46 = vmul.f32 %v559_v31, %v441_v22 }
 0x38e   :  { %3814 = vmatprep.subr.bf16.mxu1 %v3813_v51 }
 0x38f   :  { %3498 = vmatmul.mubr.msk.f32.gmra.mrb[10].mxu1 %vm200_vm1, %v463_v32  ;;  %3512 = vmatmul.mubr.msk.f32.gmra.mrb[8].mxu0 %vm200_vm1, %v566_v34 }
 0x390   :  { %v561_v37 = vpop.permute.xlu1 %560  ;;  %3812 = vmatpush3.bf16.msra.mxu0 %v4399_v9  ;;  %3514 = vmatprep.mubr.msk.f32.mxu0 %vm4116_vm2, %v4117_v10 }
 0x391   :  { %v567_v41 = vmul.f32 %v561_v37, %v431_v19  ;;  %3525 = vmatprep.mubr.msk.f32.mxu1 %vm4116_vm2, %v4117_v10  ;;  %v811_v48 = vmul.f32 %v561_v37, %v446_v23  ;;  %v4474_v19 = vpop.permute.xlu0 %681 }
 0x393   :  { %3515 = vmatmul.mubr.msk.f32.gmra.mrb[10].mxu0 %vm200_vm1, %v567_v41  ;;  %3526 = vmatmul.mubr.msk.f32.vlgmr.msra.gmra.mrb[12].mxu1 %vm200_vm1, %v717_v38 }
 0x394   :  { %3528 = vmatprep.mubr.msk.f32.mxu1 %vm4116_vm2, %v4117_v10  ;;  %3542 = vmatprep.mubr.msk.f32.mxu0 %vm4116_vm2, %v4117_v10  ;;  %v694_v29 = vpop.permute.xlu1 %693 }
 0x395   :  { %3816 = vmatpush3.bf16.msra.mxu1 %v3813_v51  ;;  %v684_v51 = vpop.permute.xlu0 %683 }
 0x396   :  { %3818 = vmatprep.subr.bf16.mxu1 %v3817_v56 }
 0x397   :  { %3529 = vmatmul.mubr.msk.f32.gmra.mrb[14].mxu1 %vm200_vm1, %v718_v42  ;;  %3543 = vmatmul.mubr.msk.f32.vlgmr.msra.gmra.mrb[12].mxu0 %vm200_vm1, %v809_v44 }
 0x398   :  { %3531 = vmatprep.mubr.msk.f32.mxu1 %vm4116_vm2, %v4117_v10  ;;  %3545 = vmatprep.mubr.msk.f32.mxu0 %vm4116_vm2, %v4117_v10 }
 0x399   :  { %3820 = vmatpush3.bf16.msra.mxu1 %v3817_v56  ;;  %v696_v56 = vpop.permute.xlu1 %695 }
 0x39b   :  { %3532 = vmatmul.mubr.msk.f32.gmra.mrb[16].mxu1 %vm200_vm1, %v719_v45  ;;  %3546 = vmatmul.mubr.msk.f32.gmra.mrb[14].mxu0 %vm200_vm1, %v810_v46 }
 0x39c   :  { %3548 = vmatprep.mubr.msk.f32.mxu0 %vm4116_vm2, %v4117_v10 }
 0x39f   :  { %3549 = vmatmul.mubr.msk.f32.gmra.mrb[16].mxu0 %vm200_vm1, %v811_v48 }
 0x45a   :  { %v539_v57 = vpop.f32.mrb[6].mxu1 }
 0x45b   :  { %v3493_v47 = vpop.f32.mrb[7].mxu1 }
 0x45d   :  { %v643_v58 = vpop.f32.mrb[6].mxu0 }
 0x45e   :  { %v657_v59 = vmax.f32 %v539_v57, %v643_v58  ;;  %v544_v60 = vpop.f32.mrb[8].mxu1  ;;  %v3510_v61 = vpop.f32.mrb[7].mxu0 }
 0x45f   :  { %v3496_v0 = vpop.f32.mrb[9].mxu1 }
 0x460   :  { %v660_v53 = vsub.f32 %v539_v57, %v657_v59  ;;  %v669_v54 = vsub.f32 %v643_v58, %v657_v59 }
 0x462   :  { %v663_v1 = vmul.f32 1.442695, %v660_v53  ;;  %v672_v2 = vmul.f32 1.442695, %v669_v54  ;;  %v549_v3 = vpop.f32.mrb[10].mxu1  ;;  %v648_v62 = vpop.f32.mrb[8].mxu0 }
 0x463   :  { %v658_v63 = vmax.f32 %v544_v60, %v648_v62  ;;  %v3499_v4 = vpop.f32.mrb[11].mxu1  ;;  %v3513_v7 = vpop.f32.mrb[9].mxu0 }
 0x464   :  { %3933 = vpow2.f32 %v663_v1  ;;  %v686_v4 = vpop.permute.xlu0 %685 }
 0x465   :  { %3935 = vpow2.f32 %v672_v2  ;;  %v661_v8 = vsub.f32 %v544_v60, %v658_v63  ;;  %v670_v11 = vsub.f32 %v648_v62, %v658_v63 }
 0x466   :  { %v653_v12 = vpop.f32.mrb[10].mxu0  ;;  %v795_v13 = vpop.f32.mrb[12].mxu1 }
 0x467   :  { %v665_v14 = vmul.f32 1.442695, %v661_v8  ;;  %v674_v15 = vmul.f32 1.442695, %v670_v11  ;;  %v659_v16 = vmax.f32 %v549_v3, %v653_v12  ;;  %v3516_v17 = vpop.f32.mrb[11].mxu0  ;;  %v3527_v18 = vpop.f32.mrb[13].mxu1 }
 0x469   :  { %3937 = vpow2.f32 %v665_v14  ;;  %v662_v20 = vsub.f32 %v549_v3, %v659_v16  ;;  %v671_v21 = vsub.f32 %v653_v12, %v659_v16  ;;  %v698_v12 = vpop.permute.xlu1 %697 }
 0x46a   :  { %3939 = vpow2.f32 %v674_v15  ;;  %v800_v22 = vpop.f32.mrb[14].mxu1  ;;  %v887_v23 = vpop.f32.mrb[12].mxu0 }
 0x46b   :  { %v667_v24 = vmul.f32 1.442695, %v662_v20  ;;  %v676_v25 = vmul.f32 1.442695, %v671_v21  ;;  %v901_v26 = vmax.f32 %v795_v13, %v887_v23  ;;  %v3530_v27 = vpop.f32.mrb[15].mxu1  ;;  %v3544_v28 = vpop.f32.mrb[13].mxu0 }
 0x46d   :  { %3941 = vpow2.f32 %v667_v24  ;;  %v904_v30 = vsub.f32 %v795_v13, %v901_v26  ;;  %v913_v31 = vsub.f32 %v887_v23, %v901_v26 }
 0x46e   :  { %v3934_v32 = vpop.eup %3933  ;;  %3943 = vpow2.f32 %v676_v25  ;;  %v805_v34 = vpop.f32.mrb[16].mxu1 }
 0x46f   :  { %v892_v37 = vpop.f32.mrb[14].mxu0  ;;  %v3936_v38 = vpop.eup %3935  ;;  %v690_v41 = vmul.f32 %v3934_v32, %v4474_v19  ;;  %v907_v42 = vmul.f32 1.442695, %v904_v30  ;;  %v916_v44 = vmul.f32 1.442695, %v913_v31 }
 0x470   :  { %v902_v45 = vmax.f32 %v800_v22, %v892_v37  ;;  %v3533_v46 = vpop.f32.mrb[17].mxu1  ;;  %v3547_v48 = vpop.f32.mrb[15].mxu0  ;;  %v678_v49 = vadd.f32 %v3936_v38, %v3934_v32  ;;  %v702_v50 = vmul.f32 %v3936_v38, %v694_v29 }
 0x471   :  { %3945 = vpow2.f32 %v907_v42 }
 0x472   :  { %v905_v52 = vsub.f32 %v800_v22, %v902_v45  ;;  %v914_v55 = vsub.f32 %v892_v37, %v902_v45  ;;  %v705_v57 = vadd.f32 %v702_v50, %v690_v41  ;;  %3947 = vrcp.f32 %v678_v49  ;;  %v897_v47 = vpop.f32.mrb[16].mxu0 }
 0x473   :  { %v3938_v58 = vpop.eup %3937  ;;  %3949 = vpow2.f32 %v916_v44  ;;  %v903_v61 = vmax.f32 %v805_v34, %v897_v47  ;;  %v3550_v0 = vpop.f32.mrb[17].mxu0 }
 0x474   :  { %v909_v59 = vmul.f32 1.442695, %v905_v52  ;;  %v918_v60 = vmul.f32 1.442695, %v914_v55  ;;  %v3940_v53 = vpop.eup %3939  ;;  %v691_v54 = vmul.f32 %v3938_v58, %v684_v51  ;;  %v3179_v0 = vld [vmem:[%s5115_s13] ss:$0 sm:$0xff] }
 0x475   :  { %v679_v1 = vadd.f32 %v3940_v53, %v3938_v58  ;;  %v703_v2 = vmul.f32 %v3940_v53, %v696_v56  ;;  %v906_v3 = vsub.f32 %v805_v34, %v903_v61  ;;  %v915_v62 = vsub.f32 %v897_v47, %v903_v61 }
 0x476   :  { %3951 = vpow2.f32 %v909_v59 }
 0x477   :  { %3953 = vpow2.f32 %v918_v60  ;;  %v3942_v63 = vpop.eup %3941  ;;  %v706_v7 = vadd.f32 %v703_v2, %v691_v54  ;;  %v911_v8 = vmul.f32 1.442695, %v906_v3  ;;  %v920_v14 = vmul.f32 1.442695, %v915_v62 }
 0x478   :  { %3955 = vrcp.f32 %v679_v1  ;;  %v3944_v11 = vpop.eup %3943  ;;  %v692_v13 = vmul.f32 %v3942_v63, %v686_v4 }
 0x479   :  { %v680_v15 = vadd.f32 %v3944_v11, %v3942_v63  ;;  %v704_v16 = vmul.f32 %v3944_v11, %v698_v12  ;;  %3957 = vpow2.f32 %v911_v8 }
 0x47a   :  { %3959 = vpow2.f32 %v920_v14 }
 0x47b   :  { %v3946_v17 = vpop.eup %3945  ;;  %v707_v18 = vadd.f32 %v704_v16, %v692_v13  ;;  %3961 = vrcp.f32 %v680_v15 }
 0x47c   :  { %v3948_v20 = vpop.eup %3947  ;;  %v925_v21 = vmul.f32 %v3946_v17, %v4474_v19 }
 0x47d   :  { %v3950_v22 = vpop.eup %3949  ;;  %v709_v23 = vmul.f32 %v3948_v20, %v705_v57 }
 0x47e   :  { %v922_v24 = vadd.f32 %v3950_v22, %v3946_v17  ;;  %v928_v25 = vmul.f32 %v3950_v22, %v694_v29 }
 0x47f   :  { %714 = vst.msk [vmem:[#allocation3] sm:$0xff] %vm200_vm1, %v709_v23 }
 0x480   :  { %v3952_v26 = vpop.eup %3951  ;;  %v931_v28 = vadd.f32 %v928_v25, %v925_v21  ;;  %3963 = vrcp.f32 %v922_v24 }
 0x481   :  { %v3954_v27 = vpop.eup %3953  ;;  %v926_v30 = vmul.f32 %v3952_v26, %v684_v51 }
 0x482   :  { %v3956_v31 = vpop.eup %3955  ;;  %v923_v32 = vadd.f32 %v3954_v27, %v3952_v26  ;;  %v929_v34 = vmul.f32 %v3954_v27, %v696_v56 }
 0x483   :  { %v711_v37 = vmul.f32 %v3956_v31, %v706_v7  ;;  %v3958_v38 = vpop.eup %3957 }
 0x484   :  { %v932_v41 = vadd.f32 %v929_v34, %v926_v30  ;;  %3965 = vrcp.f32 %v923_v32  ;;  %v3960_v42 = vpop.eup %3959  ;;  %v927_v19 = vmul.f32 %v3958_v38, %v686_v4 }
 0x485   :  { %715 = vst.msk [vmem:[#allocation3 + $0x8] sm:$0xff] %vm200_vm1, %v711_v37  ;;  %v3962_v44 = vpop.eup %3961  ;;  %v924_v29 = vadd.f32 %v3960_v42, %v3958_v38  ;;  %v930_v45 = vmul.f32 %v3960_v42, %v698_v12 }
 0x486   :  { %v713_v46 = vmul.f32 %v3962_v44, %v707_v18  ;;  %v943_v48 = vld [vmem:[#allocation3] sm:$0xff] }
 0x487   :  { %v933_v49 = vadd.f32 %v930_v45, %v927_v19  ;;  %3967 = vrcp.f32 %v924_v29  ;;  %3559 = vmatprep.mubr.msk.f32.mxu1 %vm200_vm1, %v943_v48 }
 0x488   :  { %716 = vst.msk [vmem:[#allocation3 + $0x10] sm:$0xff] %vm200_vm1, %v713_v46 }
 0x48a   :  { %v3964_v50 = vpop.eup %3963 }
 0x48b   :  { %v935_v51 = vmul.f32 %v3964_v50, %v931_v28 }
 0x48c   :  { %v944_v52 = vld [vmem:[#allocation3 + $0x8] sm:$0xff] }
 0x48d   :  { %3560 = vmatmul.mubr.msk.f32.vlgmr.msra.gmra.mrb[18].mxu1 %vm200_vm1, %v944_v52  ;;  %940 = vst.msk [vmem:[#allocation3 + $0x18] sm:$0xff] %vm200_vm1, %v935_v51 }
 0x48e   :  { %v3966_v55 = vpop.eup %3965 }
 0x48f   :  { %v937_v56 = vmul.f32 %v3966_v55, %v932_v41  ;;  %v945_v57 = vld [vmem:[#allocation3 + $0x10] sm:$0xff] }
 0x490   :  { %3562 = vmatprep.mubr.msk.f32.mxu1 %vm200_vm1, %v945_v57 }
 0x491   :  { %941 = vst.msk [vmem:[#allocation3 + $0x20] sm:$0xff] %vm200_vm1, %v937_v56  ;;  %v3968_v47 = vpop.eup %3967 }
 0x492   :  { %v939_v58 = vmul.f32 %v3968_v47, %v933_v49  ;;  %v1183_v47 = vld [vmem:[%s5118_s16] sm:$0xff] }
 0x494   :  { %942 = vst.msk [vmem:[#allocation3 + $0x28] sm:$0xff] %vm200_vm1, %v939_v58  ;;  %v946_v59 = vld [vmem:[#allocation3 + $0x18] sm:$0xff] }
 0x495   :  { %3563 = vmatmul.mubr.msk.f32.gmra.mrb[20].mxu1 %vm200_vm1, %v946_v59  ;;  %v1184_v58 = vld [vmem:[%s5118_s16 + $0x8] sm:$0xff] }
 0x496   :  { %v3821_v59 = vpack.c.bf16 %v1184_v58, %v1183_v47  ;;  %v1472_v47 = vld [vmem:[%s5120_s18 + $0x18] sm:$0xff] }
 0x498   :  { %v947_v60 = vld [vmem:[#allocation3 + $0x20] sm:$0xff]  ;;  %3822 = vmatprep.subr.bf16.mxu0 %v3821_v59 }
 0x499   :  { %3565 = vmatprep.mubr.msk.f32.mxu1 %vm200_vm1, %v947_v60  ;;  %3824 = vmatpush3.bf16.msra.mxu0 %v3821_v59  ;;  %v1185_v60 = vld [vmem:[%s5118_s16 + $0x10] sm:$0xff]  ;;  %v1473_v59 = vld [vmem:[%s5120_s18 + $0x20] sm:$0xff] }
 0x49b   :  { %v948_v61 = vld [vmem:[#allocation3 + $0x28] sm:$0xff] }
 0x49c   :  { %3566 = vmatmul.mubr.msk.f32.gmra.mrb[22].mxu1 %vm200_vm1, %v948_v61  ;;  %v1186_v61 = vld [vmem:[%s5118_s16 + $0x18] sm:$0xff] }
 0x560   :  { %v3561_v53 = vpop.f32.mrb[18].mxu1 }
 0x561   :  { %v1050_v54 = vadd.f32 %v3561_v53, %v3179_v0  ;;  %v1044_v1 = vpop.f32.mrb[19].mxu1 }
 0x562   :  { %v1045_v2 = vadd.f32 %v3179_v0, %v1044_v1 }
 0x563   :  { %v4494_v3 = vadd.f32 %v1050_v54, %v4293_v35 }
 0x564   :  { %v4497_v62 = vadd.f32 %v1045_v2, %v4288_v33 }
 0x565   :  { %v1084_v63 = vsel %vm200_vm1, %v4494_v3, 0.0 }
 0x566   :  { %1085 = vadd.xlane.f32.xlu1 %v1084_v63  ;;  %v1081_v4 = vsel %vm200_vm1, %v4497_v62, 0.0 }
 0x567   :  { %1082 = vadd.xlane.f32.xlu0 %v1081_v4 }
 0x568   :  { %v3564_v7 = vpop.f32.mrb[20].mxu1 }
 0x569   :  { %v1060_v8 = vadd.f32 %v3564_v7, %v3179_v0  ;;  %v1054_v11 = vpop.f32.mrb[21].mxu1 }
 0x56a   :  { %v1055_v12 = vadd.f32 %v3179_v0, %v1054_v11 }
 0x56b   :  { %v4504_v13 = vadd.f32 %v1060_v8, %v4301_v39 }
 0x56c   :  { %v4507_v35 = vadd.f32 %v1055_v12, %v4295_v36 }
 0x56d   :  { %v1090_v33 = vsel %vm200_vm1, %v4504_v13, 0.0 }
 0x56e   :  { %1091 = vadd.xlane.f32.xlu0 %v1090_v33  ;;  %v1087_v18 = vsel %vm200_vm1, %v4507_v35, 0.0 }
 0x56f   :  { %v3567_v14 = vpop.f32.mrb[22].mxu1 }
 0x570   :  { %v1070_v15 = vadd.f32 %v3567_v14, %v3179_v0  ;;  %v1064_v16 = vpop.f32.mrb[23].mxu1 }
 0x571   :  { %v1065_v17 = vadd.f32 %v3179_v0, %v1064_v16  ;;  %v3825_v0 = vpack.c.bf16 %v1186_v61, %v1185_v60  ;;  %v1474_v60 = vld [vmem:[%s5120_s18 + $0x28] sm:$0xff] }
 0x572   :  { %v4514_v20 = vadd.f32 %v1070_v15, %v4309_v43  ;;  %1088 = vadd.xlane.f32.xlu0 %v1087_v18  ;;  %v3186_v15 = vld [vmem:[%s5116_s14] ss:$0 sm:$0xff]  ;;  %v3837_v61 = vpack.c.bf16 %v1474_v60, %v1473_v59 }
 0x573   :  { %v4517_v39 = vadd.f32 %v1065_v17, %v4303_v40  ;;  %3826 = vmatprep.subr.bf16.mxu0 %v3825_v0 }
 0x574   :  { %v1096_v36 = vsel %vm200_vm1, %v4514_v20, 0.0  ;;  %3828 = vmatpush3.bf16.msra.mxu0 %v3825_v0  ;;  %v1475_v0 = vld [vmem:[%s5120_s18 + $0x30] sm:$0xff] }
 0x575   :  { %1097 = vadd.xlane.f32.xlu1 %v1096_v36  ;;  %v1093_v21 = vsel %vm200_vm1, %v4517_v39, 0.0 }
 0x576   :  { %1094 = vadd.xlane.f32.xlu0 %v1093_v21 }
 0x5f3   :  { %v1086_v22 = vpop.xlane.xlu1 %1085 }
 0x5f4   :  { %v1100_v23 = vmul.f32 0.03125, %v1086_v22  ;;  %v1083_v24 = vpop.xlane.xlu0 %1082 }
 0x5f5   :  { %v1099_v25 = vmul.f32 0.03125, %v1083_v24  ;;  %v3187_v24 = vld [vmem:[%s5117_s15] ss:$0 sm:$0xff] }
 0x5f6   :  { %v1106_v26 = vsub.f32 %v4494_v3, %v1100_v23 }
 0x5f7   :  { %v4525_v43 = vsub.f32 %v4497_v62, %v1099_v25 }
 0x5f8   :  { %v1112_v27 = vmul.f32 %v1106_v26, %v1106_v26 }
 0x5f9   :  { %v1111_v40 = vmul.f32 %v4525_v43, %v4525_v43 }
 0x5fa   :  { %v1120_v28 = vsel %vm200_vm1, %v1112_v27, 0.0 }
 0x5fb   :  { %1121 = vadd.xlane.f32.xlu1 %v1120_v28  ;;  %v1117_v30 = vsel %vm200_vm1, %v1111_v40, 0.0  ;;  %v1092_v31 = vpop.xlane.xlu0 %1091 }
 0x5fc   :  { %1118 = vadd.xlane.f32.xlu0 %v1117_v30  ;;  %v1102_v32 = vmul.f32 0.03125, %v1092_v31 }
 0x5fe   :  { %v4532_v34 = vsub.f32 %v4504_v13, %v1102_v32 }
 0x5ff   :  { %v1089_v37 = vpop.xlane.xlu0 %1088 }
 0x600   :  { %v1101_v38 = vmul.f32 0.03125, %v1089_v37  ;;  %v1114_v41 = vmul.f32 %v4532_v34, %v4532_v34 }
 0x602   :  { %v4537_v42 = vsub.f32 %v4507_v35, %v1101_v38  ;;  %v1098_v19 = vpop.xlane.xlu1 %1097  ;;  %v1126_v44 = vsel %vm200_vm1, %v1114_v41, 0.0 }
 0x603   :  { %v1104_v29 = vmul.f32 0.03125, %v1098_v19  ;;  %1127 = vadd.xlane.f32.xlu1 %v1126_v44  ;;  %v1095_v45 = vpop.xlane.xlu0 %1094 }
 0x604   :  { %v1103_v46 = vmul.f32 0.03125, %v1095_v45  ;;  %v1113_v48 = vmul.f32 %v4537_v42, %v4537_v42 }
 0x605   :  { %v4543_v49 = vsub.f32 %v4514_v20, %v1104_v29 }
 0x606   :  { %v4546_v50 = vsub.f32 %v4517_v39, %v1103_v46  ;;  %v1123_v51 = vsel %vm200_vm1, %v1113_v48, 0.0 }
 0x607   :  { %1124 = vadd.xlane.f32.xlu0 %v1123_v51  ;;  %v1116_v52 = vmul.f32 %v4543_v49, %v4543_v49 }
 0x608   :  { %v1115_v55 = vmul.f32 %v4546_v50, %v4546_v50 }
 0x609   :  { %v1132_v56 = vsel %vm200_vm1, %v1116_v52, 0.0 }
 0x60a   :  { %1133 = vadd.xlane.f32.xlu1 %v1132_v56  ;;  %v1129_v57 = vsel %vm200_vm1, %v1115_v55, 0.0 }
 0x60b   :  { %1130 = vadd.xlane.f32.xlu0 %v1129_v57  ;;  %v1471_v57 = vld [vmem:[%s5120_s18 + $0x10] sm:$0xff] }
 0x60c   :  { %v3833_v58 = vpack.c.bf16 %v1472_v47, %v1471_v57 }
 0x688   :  { %v1122_v53 = vpop.xlane.xlu1 %1121 }
 0x689   :  { %v1136_v54 = vmul.f32 0.03125, %v1122_v53  ;;  %v1119_v1 = vpop.xlane.xlu0 %1118  ;;  %v1476_v53 = vld [vmem:[%s5120_s18 + $0x38] sm:$0xff] }
 0x68a   :  { %v1135_v2 = vmul.f32 0.03125, %v1119_v1  ;;  %v3188_v1 = vld [vmem:[%s5119_s17] ss:$0 sm:$0xff] }
 0x68b   :  { %v1142_v63 = vadd.f32 1e-05, %v1136_v54  ;;  %v3841_v54 = vpack.c.bf16 %v1476_v53, %v1475_v0 }
 0x68c   :  { %v1141_v4 = vadd.f32 1e-05, %v1135_v2 }
 0x68d   :  { %3969 = vrsqrt.f32 %v1142_v63 }
 0x68e   :  { %3971 = vrsqrt.f32 %v1141_v4 }
 0x690   :  { %v1128_v7 = vpop.xlane.xlu1 %1127 }
 0x691   :  { %v1138_v8 = vmul.f32 0.03125, %v1128_v7 }
 0x693   :  { %v1144_v11 = vadd.f32 1e-05, %v1138_v8 }
 0x694   :  { %v1125_v12 = vpop.xlane.xlu0 %1124 }
 0x695   :  { %3973 = vrsqrt.f32 %v1144_v11  ;;  %v1137_v33 = vmul.f32 0.03125, %v1125_v12 }
 0x697   :  { %v3970_v14 = vpop.eup %3969  ;;  %v1143_v18 = vadd.f32 1e-05, %v1137_v33  ;;  %v1134_v36 = vpop.xlane.xlu1 %1133 }
 0x698   :  { %v3972_v16 = vpop.eup %3971  ;;  %v1154_v17 = vmul.f32 %v3970_v14, %v1106_v26  ;;  %v1140_v21 = vmul.f32 0.03125, %v1134_v36  ;;  %v1131_v22 = vpop.xlane.xlu0 %1130 }
 0x699   :  { %v1153_v23 = vmul.f32 %v3972_v16, %v4525_v43  ;;  %3975 = vrsqrt.f32 %v1143_v18  ;;  %v1139_v27 = vmul.f32 0.03125, %v1131_v22 }
 0x69a   :  { %v1166_v25 = vmul.f32 %v3186_v15, %v1154_v17  ;;  %v1146_v40 = vadd.f32 1e-05, %v1140_v21 }
 0x69b   :  { %v1165_v28 = vmul.f32 %v3186_v15, %v1153_v23  ;;  %v1145_v30 = vadd.f32 1e-05, %v1139_v27 }
 0x69c   :  { %3977 = vrsqrt.f32 %v1146_v40  ;;  %v1178_v32 = vadd.f32 %v3187_v24, %v1166_v25 }
 0x69d   :  { %v1177_v31 = vadd.f32 %v3187_v24, %v1165_v28  ;;  %3979 = vrsqrt.f32 %v1145_v30 }
 0x69f   :  { %3576 = vmatprep.mubr.msk.f32.mxu0 %vm200_vm1, %v1177_v31  ;;  %v3974_v26 = vpop.eup %3973 }
 0x6a0   :  { %3577 = vmatmul.mubr.msk.f32.vlgmr.msra.gmra.mrb[18].mxu0 %vm200_vm1, %v1178_v32  ;;  %v1156_v43 = vmul.f32 %v3974_v26, %v4532_v34 }
 0x6a2   :  { %v1168_v41 = vmul.f32 %v3186_v15, %v1156_v43 }
 0x6a3   :  { %v3976_v37 = vpop.eup %3975 }
 0x6a4   :  { %v1155_v38 = vmul.f32 %v3976_v37, %v4537_v42  ;;  %v1180_v51 = vadd.f32 %v3187_v24, %v1168_v41  ;;  %v1469_v42 = vld [vmem:[%s5120_s18] sm:$0xff] }
 0x6a6   :  { %v3978_v19 = vpop.eup %3977  ;;  %v1167_v44 = vmul.f32 %v3186_v15, %v1155_v38 }
 0x6a7   :  { %v3980_v29 = vpop.eup %3979  ;;  %v1158_v45 = vmul.f32 %v3978_v19, %v4543_v49  ;;  %v1470_v49 = vld [vmem:[%s5120_s18 + $0x8] sm:$0xff] }
 0x6a8   :  { %v1179_v46 = vadd.f32 %v3187_v24, %v1167_v44  ;;  %v1157_v48 = vmul.f32 %v3980_v29, %v4546_v50  ;;  %v3829_v50 = vpack.c.bf16 %v1470_v49, %v1469_v42 }
 0x6a9   :  { %v1170_v52 = vmul.f32 %v3186_v15, %v1158_v45 }
 0x6aa   :  { %3579 = vmatprep.mubr.msk.f32.mxu0 %vm200_vm1, %v1179_v46  ;;  %v1169_v55 = vmul.f32 %v3186_v15, %v1157_v48  ;;  %3830 = vmatprep.subr.bf16.mxu1 %v3829_v50 }
 0x6ab   :  { %3580 = vmatmul.mubr.msk.f32.gmra.mrb[20].mxu0 %vm200_vm1, %v1180_v51  ;;  %v1182_v56 = vadd.f32 %v3187_v24, %v1170_v52  ;;  %3832 = vmatpush3.bf16.msra.mxu1 %v3829_v50 }
 0x6ac   :  { %v1181_v34 = vadd.f32 %v3187_v24, %v1169_v55  ;;  %3834 = vmatprep.subr.bf16.mxu1 %v3833_v58 }
 0x6ae   :  { %3582 = vmatprep.mubr.msk.f32.mxu0 %vm200_vm1, %v1181_v34 }
 0x6af   :  { %3583 = vmatmul.mubr.msk.f32.gmra.mrb[22].mxu0 %vm200_vm1, %v1182_v56  ;;  %3836 = vmatpush3.bf16.msra.mxu1 %v3833_v58 }
 0x6b0   :  { %3838 = vmatprep.subr.bf16.mxu1 %v3837_v61 }
 0x6b3   :  { %3840 = vmatpush3.bf16.msra.mxu1 %v3837_v61 }
 0x6b4   :  { %3842 = vmatprep.subr.bf16.mxu1 %v3841_v54 }
 0x6b7   :  { %3844 = vmatpush3.bf16.msra.mxu1 %v3841_v54 }
 0x6b8   :  { %3853 = vmatprep.subr.bf16.mxu1 %v4115_v5 }
 0x773   :  { %v3578_v2 = vpop.f32.mrb[18].mxu0 }
 0x774   :  { %v4612_v63 = vadd.f32 %v3578_v2, %v3188_v1  ;;  %v1278_v4 = vpop.f32.mrb[19].mxu0 }
 0x775   :  { %v4614_v7 = vadd.f32 %v3188_v1, %v1278_v4 }
 0x776   :  { %v4617_v8 = vmul.f32 0.70710677, %v4612_v63 }
 0x777   :  { %v4620_v11 = vmul.f32 0.70710677, %v4614_v7 }
 0x778   :  { %v1320_v12 = vand.u32 2147483647, %v4617_v8  ;;  %vm1440_vm3 = vcmp.ge.f32.partialorder %v4617_v8, 0.0 }
 0x779   :  { %v1319_v33 = vand.u32 2147483647, %v4620_v11  ;;  %vm1439_vm4 = vcmp.ge.f32.partialorder %v4620_v11, 0.0 }
 0x77a   :  { %v1326_v14 = vmul.f32 0.3275911, %v1320_v12  ;;  %v1404_v24 = vsub.f32 0.0, %v1320_v12 }
 0x77b   :  { %v1325_v15 = vmul.f32 0.3275911, %v1319_v33  ;;  %v1403_v31 = vsub.f32 0.0, %v1319_v33 }
 0x77c   :  { %v1332_v16 = vadd.f32 1.0, %v1326_v14  ;;  %v1410_v38 = vmul.f32 %v1404_v24, %v1320_v12 }
 0x77d   :  { %v1331_v17 = vadd.f32 1.0, %v1325_v15  ;;  %v1409_v51 = vmul.f32 %v1403_v31, %v1319_v33 }
 0x77e   :  { %3981 = vrcp.f32 %v1332_v16  ;;  %v3581_v18 = vpop.f32.mrb[20].mxu0  ;;  %v1417_v49 = vmul.f32 1.442695, %v1410_v38 }
 0x77f   :  { %3983 = vrcp.f32 %v1331_v17  ;;  %v4624_v36 = vadd.f32 %v3581_v18, %v3188_v1  ;;  %v1288_v21 = vpop.f32.mrb[21].mxu0  ;;  %v1415_v59 = vmul.f32 1.442695, %v1409_v51 }
 0x780   :  { %v4626_v22 = vadd.f32 %v3188_v1, %v1288_v21 }
 0x781   :  { %v4629_v23 = vmul.f32 0.70710677, %v4624_v36 }
 0x782   :  { %v4632_v25 = vmul.f32 0.70710677, %v4626_v22  ;;  %v3584_v27 = vpop.f32.mrb[22].mxu0 }
 0x783   :  { %v1322_v40 = vand.u32 2147483647, %v4629_v23  ;;  %v4635_v28 = vadd.f32 %v3584_v27, %v3188_v1  ;;  %v1298_v30 = vpop.f32.mrb[23].mxu0  ;;  %vm1442_vm5 = vcmp.ge.f32.partialorder %v4629_v23, 0.0 }
 0x784   :  { %v1321_v32 = vand.u32 2147483647, %v4632_v25  ;;  %v4638_v26 = vadd.f32 %v3188_v1, %v1298_v30  ;;  %vm1441_vm6 = vcmp.ge.f32.partialorder %v4632_v25, 0.0 }
 0x785   :  { %v1328_v43 = vmul.f32 0.3275911, %v1322_v40  ;;  %v4641_v37 = vmul.f32 0.70710677, %v4635_v28  ;;  %v1406_v61 = vsub.f32 0.0, %v1322_v40 }
 0x786   :  { %v1327_v41 = vmul.f32 0.3275911, %v1321_v32  ;;  %v4644_v19 = vmul.f32 0.70710677, %v4638_v26  ;;  %v1405_v1 = vsub.f32 0.0, %v1321_v32 }
 0x787   :  { %v1334_v29 = vadd.f32 1.0, %v1328_v43  ;;  %v1324_v45 = vand.u32 2147483647, %v4641_v37  ;;  %v1412_v12 = vmul.f32 %v1406_v61, %v1322_v40  ;;  %vm1444_vm7 = vcmp.ge.f32.partialorder %v4641_v37, 0.0  ;;  %v3195_v37 = vld [vmem:[%s5121_s19] ss:$0 sm:$0xff] }
 0x788   :  { %v3982_v44 = vpop.eup %3981  ;;  %v1333_v52 = vadd.f32 1.0, %v1327_v41  ;;  %v1323_v55 = vand.u32 2147483647, %v4644_v19  ;;  %v1411_v16 = vmul.f32 %v1405_v1, %v1321_v32  ;;  %vm1443_vm8 = vcmp.ge.f32.partialorder %v4644_v19, 0.0 }
 0x789   :  { %v3984_v46 = vpop.eup %3983  ;;  %v1350_v48 = vmul.f32 1.0614054, %v3982_v44  ;;  %3985 = vrcp.f32 %v1334_v29  ;;  %v1330_v56 = vmul.f32 0.3275911, %v1324_v45  ;;  %v1408_v17 = vsub.f32 0.0, %v1324_v45 }
 0x78a   :  { %v1349_v34 = vmul.f32 1.0614054, %v3984_v46  ;;  %3987 = vrcp.f32 %v1333_v52  ;;  %v1329_v47 = vmul.f32 0.3275911, %v1323_v55  ;;  %v1421_v30 = vmul.f32 1.442695, %v1412_v12 }
 0x78b   :  { %v1356_v42 = vadd.f32 -1.4531521, %v1350_v48  ;;  %v1336_v57 = vadd.f32 1.0, %v1330_v56  ;;  %v1407_v43 = vsub.f32 0.0, %v1323_v55  ;;  %v1419_v51 = vmul.f32 1.442695, %v1411_v16 }
 0x78c   :  { %v1355_v50 = vadd.f32 -1.4531521, %v1349_v34  ;;  %v1335_v0 = vadd.f32 1.0, %v1329_v47  ;;  %v1414_v52 = vmul.f32 %v1408_v17, %v1324_v45  ;;  %v1307_v56 = vmul.f32 0.5, %v4614_v7 }
 0x78d   :  { %v1362_v58 = vmul.f32 %v3982_v44, %v1356_v42  ;;  %3989 = vrcp.f32 %v1336_v57 }
 0x78e   :  { %v1361_v60 = vmul.f32 %v3984_v46, %v1355_v50  ;;  %3991 = vpow2.f32 %v1417_v49  ;;  %v1425_v7 = vmul.f32 1.442695, %v1414_v52 }
 0x78f   :  { %v1368_v53 = vadd.f32 1.4214138, %v1362_v58  ;;  %3993 = vrcp.f32 %v1335_v0  ;;  %v1413_v58 = vmul.f32 %v1407_v43, %v1323_v55 }
 0x790   :  { %v1367_v54 = vadd.f32 1.4214138, %v1361_v60  ;;  %3995 = vpow2.f32 %v1415_v59 }
 0x791   :  { %v1374_v2 = vmul.f32 %v3982_v44, %v1368_v53  ;;  %3997 = vpow2.f32 %v1421_v30  ;;  %v1423_v12 = vmul.f32 1.442695, %v1413_v58 }
 0x792   :  { %v1373_v4 = vmul.f32 %v3984_v46, %v1367_v54  ;;  %3999 = vpow2.f32 %v1419_v51 }
 0x793   :  { %v1380_v33 = vadd.f32 -0.28449672, %v1374_v2  ;;  %v4648_v14 = vpop.eup %3985  ;;  %4001 = vpow2.f32 %v1425_v7 }
 0x794   :  { %v1379_v15 = vadd.f32 -0.28449672, %v1373_v4  ;;  %v4650_v18 = vpop.eup %3987  ;;  %v1352_v24 = vmul.f32 1.0614054, %v4648_v14  ;;  %4003 = vpow2.f32 %v1423_v12 }
 0x795   :  { %v1386_v21 = vmul.f32 %v3982_v44, %v1380_v33  ;;  %v1351_v31 = vmul.f32 1.0614054, %v4650_v18 }
 0x796   :  { %v1385_v27 = vmul.f32 %v3984_v46, %v1379_v15  ;;  %v1358_v41 = vadd.f32 -1.4531521, %v1352_v24 }
 0x797   :  { %v1392_v38 = vadd.f32 0.2548296, %v1386_v21  ;;  %v4654_v29 = vpop.eup %3989  ;;  %v1357_v48 = vadd.f32 -1.4531521, %v1351_v31 }
 0x798   :  { %v1391_v40 = vadd.f32 0.2548296, %v1385_v27  ;;  %v3992_v32 = vpop.eup %3991  ;;  %v1364_v42 = vmul.f32 %v4648_v14, %v1358_v41  ;;  %v1354_v49 = vmul.f32 1.0614054, %v4654_v29 }
 0x799   :  { %v1398_v34 = vmul.f32 %v3982_v44, %v1392_v38  ;;  %v4659_v50 = vpop.eup %3993  ;;  %v1363_v47 = vmul.f32 %v4650_v18, %v1357_v48 }
 0x79a   :  { %v1397_v57 = vmul.f32 %v3984_v46, %v1391_v40  ;;  %v3996_v59 = vpop.eup %3995  ;;  %v1370_v61 = vadd.f32 1.4214138, %v1364_v42  ;;  %v1360_v0 = vadd.f32 -1.4531521, %v1354_v49  ;;  %v1353_v45 = vmul.f32 1.0614054, %v4659_v50 }
 0x79b   :  { %v1428_v60 = vmul.f32 %v3992_v32, %v1398_v34  ;;  %v1369_v53 = vadd.f32 1.4214138, %v1363_v47  ;;  %v3998_v11 = vpop.eup %3997  ;;  %v1308_v32 = vmul.f32 0.5, %v4612_v63 }
 0x79c   :  { %v1427_v44 = vmul.f32 %v3996_v59, %v1397_v57  ;;  %v1376_v1 = vmul.f32 %v4648_v14, %v1370_v61  ;;  %v1366_v2 = vmul.f32 %v4654_v29, %v1360_v0  ;;  %v1359_v46 = vadd.f32 -1.4531521, %v1353_v45  ;;  %v4000_v58 = vpop.eup %3999 }
 0x79d   :  { %v1434_v54 = vsub.f32 1.0, %v1428_v60  ;;  %v1375_v55 = vmul.f32 %v4650_v18, %v1369_v53  ;;  %v4002_v53 = vpop.eup %4001 }
 0x79e   :  { %v1433_v4 = vsub.f32 1.0, %v1427_v44  ;;  %v1382_v15 = vadd.f32 -0.28449672, %v1376_v1  ;;  %v1372_v16 = vadd.f32 1.4214138, %v1366_v2  ;;  %v1365_v17 = vmul.f32 %v4659_v50, %v1359_v46  ;;  %v4004_v2 = vpop.eup %4003 }
 0x79f   :  { %v1446_v33 = vsub.f32 0.0, %v1434_v54  ;;  %v1381_v24 = vadd.f32 -0.28449672, %v1375_v55 }
 0x7a0   :  { %v1445_v21 = vsub.f32 0.0, %v1433_v4  ;;  %v1388_v30 = vmul.f32 %v4648_v14, %v1382_v15  ;;  %v1378_v31 = vmul.f32 %v4654_v29, %v1372_v16  ;;  %v1371_v8 = vadd.f32 1.4214138, %v1365_v17 }
 0x7a1   :  { %v1452_v27 = vsel %vm1440_vm3, %v1434_v54, %v1446_v33  ;;  %v1387_v41 = vmul.f32 %v4650_v18, %v1381_v24  ;;  %v1309_v15 = vmul.f32 0.5, %v4626_v22 }
 0x7a2   :  { %v1458_v43 = vadd.f32 1.0, %v1452_v27  ;;  %v1451_v38 = vsel %vm1439_vm4, %v1433_v4, %v1445_v21  ;;  %v1394_v48 = vadd.f32 0.2548296, %v1388_v30  ;;  %v1384_v51 = vadd.f32 -0.28449672, %v1378_v31 }
 0x7a3   :  { %v1457_v40 = vadd.f32 1.0, %v1451_v38  ;;  %v1377_v52 = vmul.f32 %v4659_v50, %v1371_v8  ;;  %v1393_v34 = vadd.f32 0.2548296, %v1387_v41  ;;  %v1310_v21 = vmul.f32 0.5, %v4624_v36 }
 0x7a4   :  { %v1400_v49 = vmul.f32 %v4648_v14, %v1394_v48  ;;  %v1390_v57 = vmul.f32 %v4654_v29, %v1384_v51  ;;  %v1464_v59 = vmul.f32 %v1458_v43, %v1308_v32  ;;  %v1311_v8 = vmul.f32 0.5, %v4638_v26 }
 0x7a5   :  { %v1463_v42 = vmul.f32 %v1457_v40, %v1307_v56  ;;  %v1383_v47 = vadd.f32 -0.28449672, %v1377_v52  ;;  %v1399_v60 = vmul.f32 %v4650_v18, %v1393_v34  ;;  %v1312_v43 = vmul.f32 0.5, %v4635_v28 }
 0x7a6   :  { %v1430_v61 = vmul.f32 %v3998_v11, %v1400_v49  ;;  %v1396_v0 = vadd.f32 0.2548296, %v1390_v57 }
 0x7a7   :  { %v1389_v45 = vmul.f32 %v4659_v50, %v1383_v47  ;;  %3601 = vmatprep.mubr.msk.f32.mxu1 %vm80_vm0, %v1463_v42  ;;  %v1429_v44 = vmul.f32 %v4000_v58, %v1399_v60 }
 0x7a8   :  { %3602 = vmatmul.mubr.msk.f32.vlgmr.msra.gmra.mrb[24].mxu1 %vm80_vm0, %v1464_v59  ;;  %v1436_v63 = vsub.f32 1.0, %v1430_v61  ;;  %v1402_v56 = vmul.f32 %v4654_v29, %v1396_v0 }
 0x7a9   :  { %v1395_v14 = vadd.f32 0.2548296, %v1389_v45  ;;  %3855 = vmatpush3.bf16.msra.mxu1 %v4387_v6  ;;  %v1435_v7 = vsub.f32 1.0, %v1429_v44 }
 0x7aa   :  { %3856 = vmatprep.subr.bf16.mxu1 %v4115_v5  ;;  %v1448_v18 = vsub.f32 0.0, %v1436_v63  ;;  %v1432_v54 = vmul.f32 %v4002_v53, %v1402_v56 }
 0x7ab   :  { %v1401_v1 = vmul.f32 %v4659_v50, %v1395_v14  ;;  %v1447_v46 = vsub.f32 0.0, %v1435_v7 }
 0x7ac   :  { %v1454_v4 = vsel %vm1442_vm5, %v1436_v63, %v1448_v18  ;;  %v1438_v55 = vsub.f32 1.0, %v1432_v54 }
 0x7ad   :  { %v1431_v29 = vmul.f32 %v4004_v2, %v1401_v1  ;;  %3858 = vmatpush3.bf16.msra.mxu1 %v4399_v9  ;;  %v1460_v12 = vadd.f32 1.0, %v1454_v4  ;;  %v1453_v33 = vsel %vm1441_vm6, %v1435_v7, %v1447_v46 }
 0x7ae   :  { %3865 = vmatprep.subr.bf16.mxu1 %v4115_v5  ;;  %v1459_v16 = vadd.f32 1.0, %v1453_v33  ;;  %v1450_v17 = vsub.f32 0.0, %v1438_v55 }
 0x7af   :  { %v1437_v50 = vsub.f32 1.0, %v1431_v29  ;;  %v1466_v27 = vmul.f32 %v1460_v12, %v1310_v21 }
 0x7b0   :  { %v1465_v23 = vmul.f32 %v1459_v16, %v1309_v15  ;;  %v1456_v24 = vsel %vm1444_vm7, %v1438_v55, %v1450_v17 }
 0x7b1   :  { %v1449_v25 = vsub.f32 0.0, %v1437_v50  ;;  %v1462_v30 = vadd.f32 1.0, %v1456_v24 }
 0x7b2   :  { %3604 = vmatprep.mubr.msk.f32.mxu1 %vm80_vm0, %v1465_v23 }
 0x7b3   :  { %v1455_v31 = vsel %vm1443_vm8, %v1437_v50, %v1449_v25  ;;  %3605 = vmatmul.mubr.msk.f32.gmra.mrb[26].mxu1 %vm80_vm0, %v1466_v27  ;;  %v1468_v38 = vmul.f32 %v1462_v30, %v1312_v43 }
 0x7b4   :  { %v1461_v22 = vadd.f32 1.0, %v1455_v31 }
 0x7b6   :  { %v1467_v36 = vmul.f32 %v1461_v22, %v1311_v8 }
 0x7b8   :  { %3607 = vmatprep.mubr.msk.f32.mxu1 %vm80_vm0, %v1467_v36 }
 0x7b9   :  { %3608 = vmatmul.mubr.msk.f32.gmra.mrb[28].mxu1 %vm80_vm0, %v1468_v38 }
 0x7ba   :  { %3635 = vmatprep.mubr.msk.f32.mxu1 %vm4116_vm2, %v4117_v10 }
 0x87b   :  { %v3603_v19 = vpop.f32.mrb[24].mxu1 }
 0x87c   :  { %v1574_v26 = vadd.f32 %v3603_v19, %v3195_v37  ;;  %v1568_v41 = vpop.f32.mrb[25].mxu1  ;;  %v3206_v19 = vld [vmem:[%s5112_s10 + $0x20] sm:$0xff] }
 0x87d   :  { %v1569_v40 = vadd.f32 %v3195_v37, %v1568_v41 }
 0x87e   :  { %v1598_v48 = vadd.f32 %v1574_v26, %v4494_v3  ;;  %v3207_v26 = vld [vmem:[%s5112_s10 + $0x28] sm:$0xff] }
 0x87f   :  { %v1597_v28 = vadd.f32 %v1569_v40, %v4497_v62  ;;  %v3845_v41 = vpack.c.bf16 %v3207_v26, %v3206_v19  ;;  %v3208_v40 = vld [vmem:[%s5112_s10 + $0x30] sm:$0xff] }
 0x880   :  { %1604 = vst.msk [vmem:[#allocation2 + $0x8] sm:$0xff] %vm200_vm1, %v1598_v48  ;;  %v3209_v48 = vld [vmem:[%s5112_s10 + $0x38] sm:$0xff] }
 0x881   :  { %1603 = vst.msk [vmem:[#allocation2] sm:$0xff] %vm200_vm1, %v1597_v28  ;;  %3846 = vmatprep.subr.bf16.mxu0 %v3845_v41  ;;  %v3849_v28 = vpack.c.bf16 %v3209_v48, %v3208_v40 }
 0x882   :  { %3848 = vmatpush3.bf16.msra.mxu0 %v3845_v41 }
 0x883   :  { %3850 = vmatprep.subr.bf16.mxu0 %v3849_v28 }
 0x886   :  { %v3606_v51 = vpop.f32.mrb[26].mxu1  ;;  %3852 = vmatpush3.bf16.msra.mxu0 %v3849_v28 }
 0x887   :  { %v4707_v52 = vld [vmem:[#allocation2 + $0x8] sm:$0xff]  ;;  %v1584_v11 = vadd.f32 %v3606_v51, %v3195_v37  ;;  %v1578_v32 = vpop.f32.mrb[27].mxu1  ;;  %3859 = vmatprep.subr.bf16.mxu0 %v4115_v5 }
 0x888   :  { %v1622_v34 = vsel %vm200_vm1, %v4707_v52, 0.0  ;;  %v4711_v42 = vld [vmem:[#allocation2] sm:$0xff]  ;;  %v1579_v49 = vadd.f32 %v3195_v37, %v1578_v32 }
 0x889   :  { %1623 = vadd.xlane.f32.xlu1 %v1622_v34  ;;  %v1619_v3 = vsel %vm200_vm1, %v4711_v42, 0.0  ;;  %v1600_v62 = vadd.f32 %v1584_v11, %v4504_v13 }
 0x88a   :  { %1620 = vadd.xlane.f32.xlu0 %v1619_v3  ;;  %v1599_v57 = vadd.f32 %v1579_v49, %v4507_v35 }
 0x88b   :  { %1606 = vst.msk [vmem:[#allocation2 + $0x18] sm:$0xff] %vm200_vm1, %v1600_v62 }
 0x88c   :  { %v3609_v47 = vpop.f32.mrb[28].mxu1  ;;  %1605 = vst.msk [vmem:[#allocation2 + $0x10] sm:$0xff] %vm200_vm1, %v1599_v57 }
 0x88d   :  { %v1594_v58 = vadd.f32 %v3609_v47, %v3195_v37  ;;  %v1588_v59 = vpop.f32.mrb[29].mxu1 }
 0x88e   :  { %v1589_v60 = vadd.f32 %v3195_v37, %v1588_v59 }
 0x88f   :  { %v1602_v61 = vadd.f32 %v1594_v58, %v4514_v20 }
 0x890   :  { %v1601_v0 = vadd.f32 %v1589_v60, %v4517_v39  ;;  %v3204_v60 = vld [vmem:[%s5110_s8 + $0x1] ss:$0 sm:$0xff] }
 0x891   :  { %1608 = vst.msk [vmem:[#allocation2 + $0x28] sm:$0xff] %vm200_vm1, %v1602_v61 }
 0x892   :  { %1607 = vst.msk [vmem:[#allocation2 + $0x20] sm:$0xff] %vm200_vm1, %v1601_v0  ;;  %v4723_v13 = vld [vmem:[#allocation2 + $0x18] sm:$0xff] }
 0x893   :  { %v1628_v35 = vsel %vm200_vm1, %v4723_v13, 0.0  ;;  %v4727_v45 = vld [vmem:[#allocation2 + $0x10] sm:$0xff] }
 0x894   :  { %1629 = vadd.xlane.f32.xlu1 %v1628_v35  ;;  %v1625_v44 = vsel %vm200_vm1, %v4727_v45, 0.0 }
 0x895   :  { %1626 = vadd.xlane.f32.xlu0 %v1625_v44 }
 0x898   :  { %v4731_v63 = vld [vmem:[#allocation2 + $0x28] sm:$0xff] }
 0x899   :  { %v1634_v20 = vsel %vm200_vm1, %v4731_v63, 0.0  ;;  %v4735_v39 = vld [vmem:[#allocation2 + $0x20] sm:$0xff] }
 0x89a   :  { %1635 = vadd.xlane.f32.xlu1 %v1634_v20  ;;  %v1631_v56 = vsel %vm200_vm1, %v4735_v39, 0.0 }
 0x89b   :  { %1632 = vadd.xlane.f32.xlu0 %v1631_v56 }
 0x916   :  { %v1624_v14 = vpop.xlane.xlu1 %1623 }
 0x917   :  { %v1638_v53 = vmul.f32 0.03125, %v1624_v14  ;;  %v1621_v7 = vpop.xlane.xlu0 %1620  ;;  %v3205_v14 = vld [vmem:[%s5111_s9 + $0x1] ss:$0 sm:$0xff] }
 0x918   :  { %v1637_v18 = vmul.f32 0.03125, %v1621_v7 }
 0x919   :  { %v1644_v54 = vsub.f32 %v4707_v52, %v1638_v53 }
 0x91a   :  { %v1643_v1 = vsub.f32 %v4711_v42, %v1637_v18 }
 0x91b   :  { %v1650_v2 = vmul.f32 %v1644_v54, %v1644_v54 }
 0x91c   :  { %v1649_v46 = vmul.f32 %v1643_v1, %v1643_v1 }
 0x91d   :  { %v1658_v4 = vsel %vm200_vm1, %v1650_v2, 0.0 }
 0x91e   :  { %1659 = vadd.xlane.f32.xlu1 %v1658_v4  ;;  %v1655_v55 = vsel %vm200_vm1, %v1649_v46, 0.0 }
 0x91f   :  { %1656 = vadd.xlane.f32.xlu0 %v1655_v55 }
 0x921   :  { %v1630_v29 = vpop.xlane.xlu1 %1629 }
 0x922   :  { %v1640_v12 = vmul.f32 0.03125, %v1630_v29  ;;  %v1627_v33 = vpop.xlane.xlu0 %1626 }
 0x923   :  { %v1639_v15 = vmul.f32 0.03125, %v1627_v33 }
 0x924   :  { %v4744_v16 = vsub.f32 %v4723_v13, %v1640_v12 }
 0x925   :  { %v4747_v17 = vsub.f32 %v4727_v45, %v1639_v15 }
 0x926   :  { %v1652_v21 = vmul.f32 %v4744_v16, %v4744_v16 }
 0x927   :  { %v1636_v50 = vpop.xlane.xlu1 %1635  ;;  %v1651_v25 = vmul.f32 %v4747_v17, %v4747_v17 }
 0x928   :  { %v1642_v23 = vmul.f32 0.03125, %v1636_v50  ;;  %v1633_v24 = vpop.xlane.xlu0 %1632  ;;  %v1664_v30 = vsel %vm200_vm1, %v1652_v21, 0.0 }
 0x929   :  { %v1641_v27 = vmul.f32 0.03125, %v1633_v24  ;;  %1665 = vadd.xlane.f32.xlu1 %v1664_v30  ;;  %v1661_v8 = vsel %vm200_vm1, %v1651_v25, 0.0 }
 0x92a   :  { %v4755_v31 = vsub.f32 %v4731_v63, %v1642_v23  ;;  %1662 = vadd.xlane.f32.xlu0 %v1661_v8 }
 0x92b   :  { %v4759_v22 = vsub.f32 %v4735_v39, %v1641_v27 }
 0x92c   :  { %v1654_v43 = vmul.f32 %v4755_v31, %v4755_v31 }
 0x92d   :  { %v1653_v36 = vmul.f32 %v4759_v22, %v4759_v22 }
 0x92e   :  { %v1670_v38 = vsel %vm200_vm1, %v1654_v43, 0.0 }
 0x92f   :  { %1671 = vadd.xlane.f32.xlu1 %v1670_v38  ;;  %v1667_v37 = vsel %vm200_vm1, %v1653_v36, 0.0 }
 0x930   :  { %1668 = vadd.xlane.f32.xlu0 %v1667_v37 }
 0x9ab   :  { %v1660_v51 = vpop.xlane.xlu1 %1659 }
 0x9ac   :  { %v1674_v11 = vmul.f32 0.03125, %v1660_v51  ;;  %v1657_v32 = vpop.xlane.xlu0 %1656 }
 0x9ad   :  { %v1673_v34 = vmul.f32 0.03125, %v1657_v32 }
 0x9ae   :  { %v1680_v49 = vadd.f32 1e-05, %v1674_v11 }
 0x9af   :  { %v1679_v3 = vadd.f32 1e-05, %v1673_v34 }
 0x9b0   :  { %4005 = vrsqrt.f32 %v1680_v49 }
 0x9b1   :  { %4007 = vrsqrt.f32 %v1679_v3 }
 0x9b6   :  { %v1666_v62 = vpop.xlane.xlu1 %1665 }
 0x9b7   :  { %v1676_v57 = vmul.f32 0.03125, %v1666_v62  ;;  %v1663_v47 = vpop.xlane.xlu0 %1662 }
 0x9b8   :  { %v1675_v58 = vmul.f32 0.03125, %v1663_v47 }
 0x9b9   :  { %v1682_v61 = vadd.f32 1e-05, %v1676_v57 }
 0x9ba   :  { %v4006_v59 = vpop.eup %4005  ;;  %v1681_v44 = vadd.f32 1e-05, %v1675_v58 }
 0x9bb   :  { %v4008_v0 = vpop.eup %4007  ;;  %v1692_v35 = vmul.f32 %v4006_v59, %v1644_v54  ;;  %4009 = vrsqrt.f32 %v1682_v61 }
 0x9bc   :  { %v1672_v20 = vpop.xlane.xlu1 %1671  ;;  %v1691_v56 = vmul.f32 %v4008_v0, %v1643_v1  ;;  %4011 = vrsqrt.f32 %v1681_v44 }
 0x9bd   :  { %v1704_v53 = vmul.f32 %v3204_v60, %v1692_v35  ;;  %v1678_v7 = vmul.f32 0.03125, %v1672_v20  ;;  %v1669_v18 = vpop.xlane.xlu0 %1668 }
 0x9be   :  { %v1677_v2 = vmul.f32 0.03125, %v1669_v18  ;;  %v1703_v46 = vmul.f32 %v3204_v60, %v1691_v56 }
 0x9bf   :  { %v1684_v4 = vadd.f32 1e-05, %v1678_v7  ;;  %v1716_v12 = vadd.f32 %v3205_v14, %v1704_v53  ;;  %v3230_v53 = vld [vmem:[%s5114_s12 + $0x20] sm:$0xff]  ;;  %v3231_v7 = vld [vmem:[%s5114_s12 + $0x28] sm:$0xff] }
 0x9c0   :  { %v1683_v55 = vadd.f32 1e-05, %v1677_v2  ;;  %v1715_v29 = vadd.f32 %v3205_v14, %v1703_v46  ;;  %v3877_v18 = vpack.c.bf16 %v3231_v7, %v3230_v53  ;;  %v3232_v2 = vld [vmem:[%s5114_s12 + $0x30] sm:$0xff]  ;;  %v3233_v46 = vld [vmem:[%s5114_s12 + $0x38] sm:$0xff] }
 0x9c1   :  { %4013 = vrsqrt.f32 %v1684_v4  ;;  %v3881_v4 = vpack.c.bf16 %v3233_v46, %v3232_v2 }
 0x9c2   :  { %4015 = vrsqrt.f32 %v1683_v55  ;;  %3618 = vmatprep.mubr.msk.f32.mxu0 %vm200_vm1, %v1715_v29 }
 0x9c3   :  { %3619 = vmatmul.mubr.msk.f32.vlgmr.msra.gmra.mrb[24].mxu0 %vm200_vm1, %v1716_v12 }
 0x9c4   :  { %3861 = vmatpush3.bf16.msra.mxu0 %v4387_v6 }
 0x9c5   :  { %3862 = vmatprep.subr.bf16.mxu0 %v4115_v5  ;;  %v4010_v54 = vpop.eup %4009 }
 0x9c6   :  { %v4012_v1 = vpop.eup %4011  ;;  %v1694_v33 = vmul.f32 %v4010_v54, %v4744_v16 }
 0x9c7   :  { %v1693_v15 = vmul.f32 %v4012_v1, %v4747_v17 }
 0x9c8   :  { %3864 = vmatpush3.bf16.msra.mxu0 %v4399_v9  ;;  %v1706_v50 = vmul.f32 %v3204_v60, %v1694_v33 }
 0x9c9   :  { %3871 = vmatprep.subr.bf16.mxu0 %v4115_v5  ;;  %v1705_v21 = vmul.f32 %v3204_v60, %v1693_v15 }
 0x9ca   :  { %v1718_v30 = vadd.f32 %v3205_v14, %v1706_v50 }
 0x9cb   :  { %v4014_v23 = vpop.eup %4013  ;;  %v1717_v25 = vadd.f32 %v3205_v14, %v1705_v21 }
 0x9cc   :  { %v4016_v24 = vpop.eup %4015  ;;  %v1696_v27 = vmul.f32 %v4014_v23, %v4755_v31  ;;  %v3211_v31 = vld [vmem:[%s5113_s11 + $0x1] ss:$0 sm:$0xff] }
 0x9cd   :  { %v1695_v8 = vmul.f32 %v4016_v24, %v4759_v22  ;;  %3621 = vmatprep.mubr.msk.f32.mxu0 %vm200_vm1, %v1717_v25 }
 0x9ce   :  { %v1708_v43 = vmul.f32 %v3204_v60, %v1696_v27  ;;  %3622 = vmatmul.mubr.msk.f32.gmra.mrb[26].mxu0 %vm200_vm1, %v1718_v30 }
 0x9cf   :  { %v1707_v16 = vmul.f32 %v3204_v60, %v1695_v8 }
 0x9d0   :  { %v1720_v36 = vadd.f32 %v3205_v14, %v1708_v43 }
 0x9d1   :  { %v1719_v17 = vadd.f32 %v3205_v14, %v1707_v16 }
 0x9d3   :  { %3624 = vmatprep.mubr.msk.f32.mxu0 %vm200_vm1, %v1719_v17 }
 0x9d4   :  { %3625 = vmatmul.mubr.msk.f32.gmra.mrb[28].mxu0 %vm200_vm1, %v1720_v36 }
 0x9d5   :  { %3652 = vmatprep.mubr.msk.f32.mxu0 %vm4116_vm2, %v4117_v10 }
 0xa96   :  { %v3620_v22 = vpop.f32.mrb[24].mxu0 }
 0xa97   :  { %v1824_v38 = vadd.f32 %v3620_v22, %v3211_v31  ;;  %v1818_v37 = vpop.f32.mrb[25].mxu0 }
 0xa98   :  { %v1819_v19 = vadd.f32 %v3211_v31, %v1818_v37 }
 0xa99   :  { %1852 = vrot.lane.b32.xlu1 %v1824_v38, %s4118_s22 }
 0xa9a   :  { %1850 = vrot.lane.b32.xlu0 %v1819_v19, %s4118_s22 }
 0xaa1   :  { %v3623_v26 = vpop.f32.mrb[26].mxu0 }
 0xaa2   :  { %v1834_v41 = vadd.f32 %v3623_v26, %v3211_v31  ;;  %v1828_v40 = vpop.f32.mrb[27].mxu0 }
 0xaa3   :  { %v1829_v48 = vadd.f32 %v3211_v31, %v1828_v40 }
 0xaa4   :  { %1954 = vrot.lane.b32.xlu1 %v1834_v41, %s4118_s22 }
 0xaa5   :  { %1854 = vrot.lane.b32.xlu0 %v1829_v48, %s4118_s22 }
 0xaa7   :  { %v3626_v28 = vpop.f32.mrb[28].mxu0 }
 0xaa8   :  { %v1838_v51 = vpop.f32.mrb[29].mxu0  ;;  %v1844_v32 = vadd.f32 %v3626_v28, %v3211_v31 }
 0xaa9   :  { %v1839_v11 = vadd.f32 %v3211_v31, %v1838_v51  ;;  %2079 = vrot.lane.b32.xlu0 %v1819_v19, %s4119_s24 }
 0xaab   :  { %1956 = vrot.lane.b32.xlu1 %v1839_v11, %s4118_s22 }
 0xaad   :  { %2081 = vrot.lane.b32.xlu0 %v1824_v38, %s4119_s24 }
 0xaaf   :  { %1958 = vrot.lane.b32.xlu1 %v1844_v32, %s4118_s22  ;;  %s5136_s22 = sld [smem:[#allocation11_spill]] }
 0xab1   :  { %2083 = vrot.lane.b32.xlu0 %v1829_v48, %s4119_s24 }
 0xab3   :  { %2091 = vrot.lane.b32.xlu1 %v1834_v41, %s4119_s24 }
 0xab7   :  { %2093 = vrot.lane.b32.xlu1 %v1839_v11, %s4119_s24 }
 0xabb   :  { %2095 = vrot.lane.b32.xlu1 %v1844_v32, %s4119_s24 }
 0xb0b   :  { %v1853_v3 = vpop.permute.xlu1 %1852 }
 0xb0c   :  { %v1851_v34 = vpop.permute.xlu0 %1850  ;;  %v1860_v62 = vmul.f32 %v1853_v3, %v1824_v38 }
 0xb0d   :  { %v1859_v49 = vmul.f32 %v1851_v34, %v1819_v19  ;;  %v2115_v60 = vmul.f32 %v1851_v34, %v1834_v41 }
 0xb0f   :  { %3636 = vmatmul.mubr.msk.f32.vlgmr.msra.gmra.mrb[30].mxu1 %vm200_vm1, %v1859_v49 }
 0xb10   :  { %3638 = vmatprep.mubr.msk.f32.mxu1 %vm4116_vm2, %v4117_v10  ;;  %3867 = vmatpush3.bf16.msra.mxu1 %v4387_v6 }
 0xb11   :  { %3868 = vmatprep.subr.bf16.mxu1 %v4115_v5 }
 0xb13   :  { %3639 = vmatmul.mubr.msk.f32.gmra.mrb[32].mxu1 %vm200_vm1, %v1860_v62 }
 0xb14   :  { %3641 = vmatprep.mubr.msk.f32.mxu1 %vm4116_vm2, %v4117_v10  ;;  %3870 = vmatpush3.bf16.msra.mxu1 %v4399_v9 }
 0xb15   :  { %3878 = vmatprep.subr.bf16.mxu1 %v3877_v18 }
 0xb16   :  { %v1955_v57 = vpop.permute.xlu1 %1954 }
 0xb17   :  { %v1963_v47 = vmul.f32 %v1955_v57, %v1819_v19  ;;  %v1855_v58 = vpop.permute.xlu0 %1854 }
 0xb18   :  { %v1861_v59 = vmul.f32 %v1855_v58, %v1829_v48  ;;  %v2117_v20 = vmul.f32 %v1855_v58, %v1844_v32 }
 0xb19   :  { %3653 = vmatmul.mubr.msk.f32.vlgmr.msra.gmra.mrb[30].mxu0 %vm200_vm1, %v1963_v47 }
 0xb1a   :  { %3642 = vmatmul.mubr.msk.f32.gmra.mrb[34].mxu1 %vm200_vm1, %v1861_v59  ;;  %3873 = vmatpush3.bf16.msra.mxu0 %v4387_v6  ;;  %v2116_v6 = vmul.f32 %v1853_v3, %v1839_v11 }
 0xb1b   :  { %3669 = vmatprep.mubr.msk.f32.mxu1 %vm4116_vm2, %v4117_v10  ;;  %3655 = vmatprep.mubr.msk.f32.mxu0 %vm4116_vm2, %v4117_v10  ;;  %v2080_v34 = vpop.permute.xlu0 %2079 }
 0xb1c   :  { %3874 = vmatprep.subr.bf16.mxu0 %v4115_v5 }
 0xb1d   :  { %v1957_v61 = vpop.permute.xlu1 %1956 }
 0xb1e   :  { %v1964_v0 = vmul.f32 %v1957_v61, %v1824_v38  ;;  %3670 = vmatmul.mubr.msk.f32.vlgmr.msra.gmra.mrb[36].mxu1 %vm200_vm1, %v2115_v60  ;;  %3876 = vmatpush3.bf16.msra.mxu0 %v4399_v9  ;;  %v2207_v9 = vmul.f32 %v1955_v57, %v1834_v41  ;;  %v2208_v56 = vmul.f32 %v1957_v61, %v1839_v11 }
 0xb1f   :  { %3672 = vmatprep.mubr.msk.f32.mxu1 %vm4116_vm2, %v4117_v10  ;;  %3880 = vmatpush3.bf16.msra.mxu1 %v3877_v18  ;;  %v2082_v53 = vpop.permute.xlu0 %2081 }
 0xb20   :  { %3656 = vmatmul.mubr.msk.f32.gmra.mrb[32].mxu0 %vm200_vm1, %v1964_v0  ;;  %3882 = vmatprep.subr.bf16.mxu1 %v3881_v4 }
 0xb21   :  { %v1959_v35 = vpop.permute.xlu1 %1958  ;;  %3658 = vmatprep.mubr.msk.f32.mxu0 %vm4116_vm2, %v4117_v10 }
 0xb22   :  { %v1965_v44 = vmul.f32 %v1959_v35, %v1829_v48  ;;  %3673 = vmatmul.mubr.msk.f32.gmra.mrb[38].mxu1 %vm200_vm1, %v2116_v6  ;;  %v2209_v14 = vmul.f32 %v1959_v35, %v1844_v32 }
 0xb23   :  { %3675 = vmatprep.mubr.msk.f32.mxu1 %vm4116_vm2, %v4117_v10  ;;  %3884 = vmatpush3.bf16.msra.mxu1 %v3881_v4 }
 0xb24   :  { %3659 = vmatmul.mubr.msk.f32.gmra.mrb[34].mxu0 %vm200_vm1, %v1965_v44 }
 0xb25   :  { %3686 = vmatprep.mubr.msk.f32.mxu0 %vm4116_vm2, %v4117_v10  ;;  %v2092_v47 = vpop.permute.xlu1 %2091 }
 0xb26   :  { %3676 = vmatmul.mubr.msk.f32.gmra.mrb[40].mxu1 %vm200_vm1, %v2117_v20 }
 0xb28   :  { %3687 = vmatmul.mubr.msk.f32.vlgmr.msra.gmra.mrb[36].mxu0 %vm200_vm1, %v2207_v9 }
 0xb29   :  { %3689 = vmatprep.mubr.msk.f32.mxu0 %vm4116_vm2, %v4117_v10  ;;  %v2094_v18 = vpop.permute.xlu1 %2093 }
 0xb2c   :  { %3690 = vmatmul.mubr.msk.f32.gmra.mrb[38].mxu0 %vm200_vm1, %v2208_v56 }
 0xb2d   :  { %3692 = vmatprep.mubr.msk.f32.mxu0 %vm4116_vm2, %v4117_v10 }
 0xb30   :  { %3693 = vmatmul.mubr.msk.f32.gmra.mrb[40].mxu0 %vm200_vm1, %v2209_v14 }
 0xbe2   :  { %v1937_v55 = vpop.f32.mrb[30].mxu1 }
 0xbe3   :  { %v3637_v29 = vpop.f32.mrb[31].mxu1 }
 0xbe6   :  { %v1942_v12 = vpop.f32.mrb[32].mxu1 }
 0xbe7   :  { %v3640_v54 = vpop.f32.mrb[33].mxu1 }
 0xbec   :  { %v2041_v1 = vpop.f32.mrb[30].mxu0 }
 0xbed   :  { %v2055_v33 = vmax.f32 %v1937_v55, %v2041_v1  ;;  %v1947_v15 = vpop.f32.mrb[34].mxu1  ;;  %v3654_v50 = vpop.f32.mrb[31].mxu0 }
 0xbee   :  { %v3643_v21 = vpop.f32.mrb[35].mxu1 }
 0xbef   :  { %v2058_v23 = vsub.f32 %v1937_v55, %v2055_v33  ;;  %v2067_v24 = vsub.f32 %v2041_v1, %v2055_v33 }
 0xbf1   :  { %v2061_v25 = vmul.f32 1.442695, %v2058_v23  ;;  %v2070_v27 = vmul.f32 1.442695, %v2067_v24  ;;  %v2193_v30 = vpop.f32.mrb[36].mxu1 }
 0xbf2   :  { %v3671_v43 = vpop.f32.mrb[37].mxu1 }
 0xbf3   :  { %v2046_v8 = vpop.f32.mrb[32].mxu0  ;;  %4017 = vpow2.f32 %v2061_v25 }
 0xbf4   :  { %v2056_v16 = vmax.f32 %v1942_v12, %v2046_v8  ;;  %v3657_v17 = vpop.f32.mrb[33].mxu0  ;;  %4019 = vpow2.f32 %v2070_v27  ;;  %v2084_v27 = vpop.permute.xlu0 %2083 }
 0xbf5   :  { %v2198_v22 = vpop.f32.mrb[38].mxu1  ;;  %v2096_v17 = vpop.permute.xlu1 %2095 }
 0xbf6   :  { %v2059_v36 = vsub.f32 %v1942_v12, %v2056_v16  ;;  %v2068_v31 = vsub.f32 %v2046_v8, %v2056_v16  ;;  %v3674_v37 = vpop.f32.mrb[39].mxu1 }
 0xbf7   :  { %v2051_v38 = vpop.f32.mrb[34].mxu0 }
 0xbf8   :  { %v2063_v19 = vmul.f32 1.442695, %v2059_v36  ;;  %v2072_v26 = vmul.f32 1.442695, %v2068_v31  ;;  %v2057_v41 = vmax.f32 %v1947_v15, %v2051_v38  ;;  %v3660_v40 = vpop.f32.mrb[35].mxu0 }
 0xbf9   :  { %v2203_v51 = vpop.f32.mrb[40].mxu1 }
 0xbfa   :  { %4021 = vpow2.f32 %v2063_v19  ;;  %v2060_v48 = vsub.f32 %v1947_v15, %v2057_v41  ;;  %v2069_v28 = vsub.f32 %v2051_v38, %v2057_v41  ;;  %v3677_v11 = vpop.f32.mrb[41].mxu1 }
 0xbfb   :  { %4023 = vpow2.f32 %v2072_v26  ;;  %v2285_v32 = vpop.f32.mrb[36].mxu0 }
 0xbfc   :  { %v2065_v49 = vmul.f32 1.442695, %v2060_v48  ;;  %v2074_v3 = vmul.f32 1.442695, %v2069_v28  ;;  %v2299_v62 = vmax.f32 %v2193_v30, %v2285_v32  ;;  %v3688_v57 = vpop.f32.mrb[37].mxu0 }
 0xbfd   :  { %v4018_v58 = vpop.eup %4017 }
 0xbfe   :  { %4025 = vpow2.f32 %v2065_v49  ;;  %v2302_v59 = vsub.f32 %v2193_v30, %v2299_v62  ;;  %v2311_v60 = vsub.f32 %v2285_v32, %v2299_v62  ;;  %v4020_v61 = vpop.eup %4019  ;;  %v2088_v0 = vmul.f32 %v4018_v58, %v2080_v34 }
 0xbff   :  { %4027 = vpow2.f32 %v2074_v3  ;;  %v2290_v6 = vpop.f32.mrb[38].mxu0  ;;  %v2076_v35 = vadd.f32 %v4020_v61, %v4018_v58  ;;  %v2100_v44 = vmul.f32 %v4020_v61, %v2092_v47 }
 0xc00   :  { %v2305_v20 = vmul.f32 1.442695, %v2302_v59  ;;  %v2314_v9 = vmul.f32 1.442695, %v2311_v60  ;;  %v3691_v56 = vpop.f32.mrb[39].mxu0  ;;  %v2300_v14 = vmax.f32 %v2198_v22, %v2290_v6 }
 0xc01   :  { %v2103_v7 = vadd.f32 %v2100_v44, %v2088_v0  ;;  %4029 = vrcp.f32 %v2076_v35 }
 0xc02   :  { %4031 = vpow2.f32 %v2305_v20  ;;  %v2303_v2 = vsub.f32 %v2198_v22, %v2300_v14  ;;  %v2312_v46 = vsub.f32 %v2290_v6, %v2300_v14 }
 0xc03   :  { %v2295_v4 = vpop.f32.mrb[40].mxu0  ;;  %4033 = vpow2.f32 %v2314_v9 }
 0xc04   :  { %v4022_v55 = vpop.eup %4021  ;;  %v2301_v29 = vmax.f32 %v2203_v51, %v2295_v4  ;;  %v3694_v12 = vpop.f32.mrb[41].mxu0  ;;  %v2307_v33 = vmul.f32 1.442695, %v2303_v2  ;;  %v2316_v15 = vmul.f32 1.442695, %v2312_v46 }
 0xc05   :  { %v4024_v54 = vpop.eup %4023  ;;  %v2089_v1 = vmul.f32 %v4022_v55, %v2082_v53  ;;  %v3235_v12 = vld [vmem:[%s5115_s13 + $0x1] ss:$0 sm:$0xff] }
 0xc06   :  { %v2077_v50 = vadd.f32 %v4024_v54, %v4022_v55  ;;  %v2101_v21 = vmul.f32 %v4024_v54, %v2094_v18  ;;  %v2304_v23 = vsub.f32 %v2203_v51, %v2301_v29  ;;  %v2313_v24 = vsub.f32 %v2295_v4, %v2301_v29 }
 0xc07   :  { %4035 = vpow2.f32 %v2307_v33 }
 0xc08   :  { %v4026_v25 = vpop.eup %4025  ;;  %v2104_v30 = vadd.f32 %v2101_v21, %v2089_v1  ;;  %4037 = vrcp.f32 %v2077_v50  ;;  %v2309_v8 = vmul.f32 1.442695, %v2304_v23  ;;  %v2318_v43 = vmul.f32 1.442695, %v2313_v24 }
 0xc09   :  { %v4028_v16 = vpop.eup %4027  ;;  %v2090_v36 = vmul.f32 %v4026_v25, %v2084_v27  ;;  %4039 = vpow2.f32 %v2316_v15 }
 0xc0a   :  { %v2078_v31 = vadd.f32 %v4028_v16, %v4026_v25  ;;  %v2102_v22 = vmul.f32 %v4028_v16, %v2096_v17  ;;  %4041 = vpow2.f32 %v2309_v8 }
 0xc0b   :  { %4043 = vpow2.f32 %v2318_v43  ;;  %v4030_v38 = vpop.eup %4029 }
 0xc0c   :  { %v2105_v37 = vadd.f32 %v2102_v22, %v2090_v36  ;;  %4045 = vrcp.f32 %v2078_v31  ;;  %v4032_v19 = vpop.eup %4031  ;;  %v2107_v26 = vmul.f32 %v4030_v38, %v2103_v7 }
 0xc0d   :  { %v4034_v41 = vpop.eup %4033  ;;  %v2323_v40 = vmul.f32 %v4032_v19, %v2080_v34 }
 0xc0e   :  { %2112 = vst.msk [vmem:[#allocation3] sm:$0xff] %vm200_vm1, %v2107_v26  ;;  %v2320_v48 = vadd.f32 %v4034_v41, %v4032_v19  ;;  %v2326_v28 = vmul.f32 %v4034_v41, %v2092_v47 }
 0xc10   :  { %v2329_v11 = vadd.f32 %v2326_v28, %v2323_v40  ;;  %4047 = vrcp.f32 %v2320_v48 }
 0xc11   :  { %v4036_v51 = vpop.eup %4035 }
 0xc12   :  { %v4038_v32 = vpop.eup %4037  ;;  %v2324_v49 = vmul.f32 %v4036_v51, %v2082_v53 }
 0xc13   :  { %v4040_v3 = vpop.eup %4039  ;;  %v2109_v62 = vmul.f32 %v4038_v32, %v2104_v30 }
 0xc14   :  { %v4042_v57 = vpop.eup %4041  ;;  %v2321_v58 = vadd.f32 %v4040_v3, %v4036_v51  ;;  %v2327_v59 = vmul.f32 %v4040_v3, %v2094_v18 }
 0xc15   :  { %v4044_v60 = vpop.eup %4043  ;;  %2113 = vst.msk [vmem:[#allocation3 + $0x8] sm:$0xff] %vm200_vm1, %v2109_v62  ;;  %v2325_v61 = vmul.f32 %v4042_v57, %v2084_v27  ;;  %v2341_v47 = vld [vmem:[#allocation3] sm:$0xff] }
 0xc16   :  { %v4046_v0 = vpop.eup %4045  ;;  %v2330_v34 = vadd.f32 %v2327_v59, %v2324_v49  ;;  %4049 = vrcp.f32 %v2321_v58  ;;  %v2322_v6 = vadd.f32 %v4044_v60, %v4042_v57  ;;  %v2328_v35 = vmul.f32 %v4044_v60, %v2096_v17  ;;  %3703 = vmatprep.mubr.msk.f32.mxu1 %vm200_vm1, %v2341_v47  ;;  %v3248_v47 = vld [vmem:[%s5118_s16 + $0x30] sm:$0xff] }
 0xc17   :  { %v2111_v44 = vmul.f32 %v4046_v0, %v2105_v37 }
 0xc18   :  { %v2331_v20 = vadd.f32 %v2328_v35, %v2325_v61  ;;  %4051 = vrcp.f32 %v2322_v6  ;;  %v3246_v6 = vld [vmem:[%s5118_s16 + $0x20] sm:$0xff] }
 0xc19   :  { %2114 = vst.msk [vmem:[#allocation3 + $0x10] sm:$0xff] %vm200_vm1, %v2111_v44  ;;  %v3249_v44 = vld [vmem:[%s5118_s16 + $0x38] sm:$0xff] }
 0xc1a   :  { %v4048_v9 = vpop.eup %4047 }
 0xc1b   :  { %v2333_v56 = vmul.f32 %v4048_v9, %v2329_v11 }
 0xc1c   :  { %v2342_v14 = vld [vmem:[#allocation3 + $0x8] sm:$0xff] }
 0xc1d   :  { %3704 = vmatmul.mubr.msk.f32.vlgmr.msra.gmra.mrb[42].mxu1 %vm200_vm1, %v2342_v14  ;;  %2338 = vst.msk [vmem:[#allocation3 + $0x18] sm:$0xff] %vm200_vm1, %v2333_v56 }
 0xc20   :  { %v4050_v53 = vpop.eup %4049  ;;  %v2343_v7 = vld [vmem:[#allocation3 + $0x10] sm:$0xff] }
 0xc21   :  { %v2335_v18 = vmul.f32 %v4050_v53, %v2330_v34  ;;  %3706 = vmatprep.mubr.msk.f32.mxu1 %vm200_vm1, %v2343_v7 }
 0xc22   :  { %v4052_v2 = vpop.eup %4051 }
 0xc23   :  { %2339 = vst.msk [vmem:[#allocation3 + $0x20] sm:$0xff] %vm200_vm1, %v2335_v18  ;;  %v2337_v46 = vmul.f32 %v4052_v2, %v2331_v20  ;;  %v3889_v20 = vpack.c.bf16 %v3249_v44, %v3248_v47 }
 0xc24   :  { %v2344_v4 = vld [vmem:[#allocation3 + $0x18] sm:$0xff] }
 0xc25   :  { %2340 = vst.msk [vmem:[#allocation3 + $0x28] sm:$0xff] %vm200_vm1, %v2337_v46  ;;  %3707 = vmatmul.mubr.msk.f32.gmra.mrb[44].mxu1 %vm200_vm1, %v2344_v4 }
 0xc2a   :  { %v2345_v55 = vld [vmem:[#allocation3 + $0x20] sm:$0xff] }
 0xc2b   :  { %3709 = vmatprep.mubr.msk.f32.mxu1 %vm200_vm1, %v2345_v55 }
 0xc2c   :  { %v2346_v29 = vld [vmem:[#allocation3 + $0x28] sm:$0xff] }
 0xc2d   :  { %3710 = vmatmul.mubr.msk.f32.gmra.mrb[46].mxu1 %vm200_vm1, %v2346_v29 }
 0xcf0   :  { %v3705_v54 = vpop.f32.mrb[42].mxu1 }
 0xcf1   :  { %v2450_v1 = vadd.f32 %v3705_v54, %v3235_v12  ;;  %v2444_v33 = vpop.f32.mrb[43].mxu1  ;;  %v4944_v54 = vld [vmem:[%s5116_s14 + $0x1] ss:$0 sm:$0xff] }
 0xcf2   :  { %v2445_v15 = vadd.f32 %v3235_v12, %v2444_v33 }
 0xcf3   :  { %v4883_v50 = vadd.f32 %v2450_v1, %v4707_v52 }
 0xcf4   :  { %v4886_v21 = vadd.f32 %v2445_v15, %v4711_v42 }
 0xcf5   :  { %v2486_v23 = vsel %vm200_vm1, %v4883_v50, 0.0 }
 0xcf6   :  { %2487 = vadd.xlane.f32.xlu1 %v2486_v23  ;;  %v2483_v24 = vsel %vm200_vm1, %v4886_v21, 0.0 }
 0xcf7   :  { %2484 = vadd.xlane.f32.xlu0 %v2483_v24 }
 0xcf8   :  { %v3708_v25 = vpop.f32.mrb[44].mxu1 }
 0xcf9   :  { %v2454_v27 = vpop.f32.mrb[45].mxu1  ;;  %v2460_v30 = vadd.f32 %v3708_v25, %v3235_v12 }
 0xcfa   :  { %v2455_v8 = vadd.f32 %v3235_v12, %v2454_v27 }
 0xcfb   :  { %v4896_v52 = vadd.f32 %v2460_v30, %v4723_v13  ;;  %v4950_v30 = vld [vmem:[%s5117_s15 + $0x1] ss:$0 sm:$0xff] }
 0xcfc   :  { %v4893_v43 = vadd.f32 %v2455_v8, %v4727_v45 }
 0xcfd   :  { %v2492_v22 = vsel %vm200_vm1, %v4896_v52, 0.0 }
 0xcfe   :  { %v2489_v42 = vsel %vm200_vm1, %v4893_v43, 0.0 }
 0xcff   :  { %2490 = vadd.xlane.f32.xlu0 %v2489_v42 }
 0xd00   :  { %v3711_v16 = vpop.f32.mrb[46].mxu1 }
 0xd01   :  { %v2470_v17 = vadd.f32 %v3711_v16, %v3235_v12  ;;  %v2464_v36 = vpop.f32.mrb[47].mxu1 }
 0xd02   :  { %v2465_v31 = vadd.f32 %v3235_v12, %v2464_v36 }
 0xd03   :  { %2493 = vadd.xlane.f32.xlu0 %v2492_v22  ;;  %v4921_v61 = vadd.f32 %v2470_v17, %v4731_v63  ;;  %v3247_v63 = vld [vmem:[%s5118_s16 + $0x28] sm:$0xff] }
 0xd04   :  { %v4912_v57 = vadd.f32 %v2465_v31, %v4735_v39  ;;  %v3885_v35 = vpack.c.bf16 %v3247_v63, %v3246_v6  ;;  %v3265_v6 = vld [vmem:[%s5120_s18 + $0x78] sm:$0xff] }
 0xd05   :  { %v2498_v39 = vsel %vm200_vm1, %v4921_v61, 0.0 }
 0xd06   :  { %v2495_v0 = vsel %vm200_vm1, %v4912_v57, 0.0  ;;  %3886 = vmatprep.subr.bf16.mxu0 %v3885_v35 }
 0xd07   :  { %3888 = vmatpush3.bf16.msra.mxu0 %v3885_v35 }
 0xd08   :  { %3890 = vmatprep.subr.bf16.mxu0 %v3889_v20 }
 0xd0b   :  { %3892 = vmatpush3.bf16.msra.mxu0 %v3889_v20 }
 0xd0c   :  { %3909 = vmatprep.subr.bf16.mxu0 %v4115_v5 }
 0xd83   :  { %v2488_v38 = vpop.xlane.xlu1 %2487 }
 0xd84   :  { %v2502_v37 = vmul.f32 0.03125, %v2488_v38  ;;  %v2485_v19 = vpop.xlane.xlu0 %2484 }
 0xd85   :  { %v2501_v45 = vmul.f32 0.03125, %v2485_v19 }
 0xd86   :  { %v2508_v26 = vsub.f32 %v4883_v50, %v2502_v37 }
 0xd87   :  { %v2507_v13 = vsub.f32 %v4886_v21, %v2501_v45 }
 0xd88   :  { %v2514_v41 = vmul.f32 %v2508_v26, %v2508_v26 }
 0xd89   :  { %v2513_v40 = vmul.f32 %v2507_v13, %v2507_v13 }
 0xd8a   :  { %v2522_v48 = vsel %vm200_vm1, %v2514_v41, 0.0 }
 0xd8b   :  { %2523 = vadd.xlane.f32.xlu1 %v2522_v48  ;;  %v2519_v28 = vsel %vm200_vm1, %v2513_v40, 0.0 }
 0xd8c   :  { %2520 = vadd.xlane.f32.xlu0 %v2519_v28  ;;  %v2491_v51 = vpop.xlane.xlu0 %2490 }
 0xd8d   :  { %v2503_v11 = vmul.f32 0.03125, %v2491_v51 }
 0xd8f   :  { %v4907_v32 = vsub.f32 %v4893_v43, %v2503_v11 }
 0xd90   :  { %v2494_v49 = vpop.xlane.xlu0 %2493 }
 0xd91   :  { %v2504_v3 = vmul.f32 0.03125, %v2494_v49  ;;  %v2515_v62 = vmul.f32 %v4907_v32, %v4907_v32  ;;  %v3258_v49 = vld [vmem:[%s5120_s18 + $0x40] sm:$0xff] }
 0xd93   :  { %v4915_v58 = vsub.f32 %v4896_v52, %v2504_v3  ;;  %v2525_v59 = vsel %vm200_vm1, %v2515_v62, 0.0  ;;  %v3260_v62 = vld [vmem:[%s5120_s18 + $0x50] sm:$0xff] }
 0xd94   :  { %2526 = vadd.xlane.f32.xlu0 %v2525_v59 }
 0xd95   :  { %v2516_v60 = vmul.f32 %v4915_v58, %v4915_v58 }
 0xd97   :  { %v2528_v34 = vsel %vm200_vm1, %v2516_v60, 0.0  ;;  %v3262_v60 = vld [vmem:[%s5120_s18 + $0x60] sm:$0xff] }
 0xd98   :  { %2496 = vadd.xlane.f32.xlu0 %v2495_v0  ;;  %2529 = vadd.xlane.f32.xlu1 %v2528_v34  ;;  %v3263_v0 = vld [vmem:[%s5120_s18 + $0x68] sm:$0xff] }
 0xd99   :  { %v3901_v34 = vpack.c.bf16 %v3263_v0, %v3262_v60 }
 0xd9c   :  { %2499 = vadd.xlane.f32.xlu1 %v2498_v39  ;;  %v3264_v39 = vld [vmem:[%s5120_s18 + $0x70] sm:$0xff] }
 0xd9d   :  { %v3905_v63 = vpack.c.bf16 %v3265_v6, %v3264_v39 }
 0xe18   :  { %v2524_v9 = vpop.xlane.xlu1 %2523 }
 0xe19   :  { %v2538_v56 = vmul.f32 0.03125, %v2524_v9  ;;  %v2521_v14 = vpop.xlane.xlu0 %2520 }
 0xe1a   :  { %v2537_v53 = vmul.f32 0.03125, %v2521_v14 }
 0xe1b   :  { %v2544_v7 = vadd.f32 1e-05, %v2538_v56 }
 0xe1c   :  { %v2543_v18 = vadd.f32 1e-05, %v2537_v53 }
 0xe1d   :  { %4053 = vrsqrt.f32 %v2544_v7 }
 0xe1e   :  { %4055 = vrsqrt.f32 %v2543_v18 }
 0xe21   :  { %v2527_v2 = vpop.xlane.xlu0 %2526 }
 0xe22   :  { %v2539_v46 = vmul.f32 0.03125, %v2527_v2 }
 0xe24   :  { %v2545_v4 = vadd.f32 1e-05, %v2539_v46 }
 0xe25   :  { %v2530_v55 = vpop.xlane.xlu1 %2529  ;;  %v2497_v29 = vpop.xlane.xlu0 %2496 }
 0xe26   :  { %4057 = vrsqrt.f32 %v2545_v4  ;;  %v2540_v1 = vmul.f32 0.03125, %v2530_v55  ;;  %v2505_v33 = vmul.f32 0.03125, %v2497_v29  ;;  %v5004_v29 = vld [vmem:[%s5119_s17 + $0x1] ss:$0 sm:$0xff] }
 0xe27   :  { %v4054_v12 = vpop.eup %4053 }
 0xe28   :  { %v4056_v15 = vpop.eup %4055  ;;  %v2556_v23 = vmul.f32 %v4054_v12, %v2508_v26  ;;  %v2546_v24 = vadd.f32 1e-05, %v2540_v1  ;;  %v2511_v25 = vsub.f32 %v4912_v57, %v2505_v33 }
 0xe29   :  { %v2555_v27 = vmul.f32 %v4056_v15, %v2507_v13  ;;  %v2500_v42 = vpop.xlane.xlu1 %2499 }
 0xe2a   :  { %v2568_v8 = vmul.f32 %v4944_v54, %v2556_v23  ;;  %4059 = vrsqrt.f32 %v2546_v24  ;;  %v2506_v16 = vmul.f32 0.03125, %v2500_v42  ;;  %v2517_v17 = vmul.f32 %v2511_v25, %v2511_v25 }
 0xe2b   :  { %v2567_v36 = vmul.f32 %v4944_v54, %v2555_v27 }
 0xe2c   :  { %v2512_v31 = vsub.f32 %v4921_v61, %v2506_v16  ;;  %v2531_v22 = vsel %vm200_vm1, %v2517_v17, 0.0  ;;  %v2580_v37 = vadd.f32 %v4950_v30, %v2568_v8 }
 0xe2d   :  { %v2579_v38 = vadd.f32 %v4950_v30, %v2567_v36  ;;  %2532 = vadd.xlane.f32.xlu0 %v2531_v22 }
 0xe2e   :  { %v2518_v19 = vmul.f32 %v2512_v31, %v2512_v31 }
 0xe2f   :  { %3720 = vmatprep.mubr.msk.f32.mxu0 %vm200_vm1, %v2579_v38 }
 0xe30   :  { %3721 = vmatmul.mubr.msk.f32.vlgmr.msra.gmra.mrb[42].mxu0 %vm200_vm1, %v2580_v37  ;;  %v4058_v45 = vpop.eup %4057  ;;  %v2534_v26 = vsel %vm200_vm1, %v2518_v19, 0.0 }
 0xe31   :  { %2535 = vadd.xlane.f32.xlu1 %v2534_v26  ;;  %v2557_v13 = vmul.f32 %v4058_v45, %v4907_v32  ;;  %v3259_v32 = vld [vmem:[%s5120_s18 + $0x48] sm:$0xff] }
 0xe32   :  { %v3893_v3 = vpack.c.bf16 %v3259_v32, %v3258_v49 }
 0xe33   :  { %v2569_v41 = vmul.f32 %v4944_v54, %v2557_v13 }
 0xe34   :  { %v4060_v40 = vpop.eup %4059  ;;  %3894 = vmatprep.subr.bf16.mxu1 %v3893_v3 }
 0xe35   :  { %v2581_v48 = vadd.f32 %v4950_v30, %v2569_v41  ;;  %v2558_v28 = vmul.f32 %v4060_v40, %v4915_v58  ;;  %3896 = vmatpush3.bf16.msra.mxu1 %v3893_v3  ;;  %v3261_v58 = vld [vmem:[%s5120_s18 + $0x58] sm:$0xff] }
 0xe36   :  { %v3897_v59 = vpack.c.bf16 %v3261_v58, %v3260_v62 }
 0xe37   :  { %3723 = vmatprep.mubr.msk.f32.mxu0 %vm200_vm1, %v2581_v48  ;;  %v2570_v51 = vmul.f32 %v4944_v54, %v2558_v28 }
 0xe38   :  { %3898 = vmatprep.subr.bf16.mxu1 %v3897_v59 }
 0xe39   :  { %v2582_v11 = vadd.f32 %v4950_v30, %v2570_v51  ;;  %3900 = vmatpush3.bf16.msra.mxu1 %v3897_v59 }
 0xe3a   :  { %3902 = vmatprep.subr.bf16.mxu1 %v3901_v34 }
 0xe3b   :  { %3724 = vmatmul.mubr.msk.f32.gmra.mrb[44].mxu0 %vm200_vm1, %v2582_v11 }
 0xe3d   :  { %3904 = vmatpush3.bf16.msra.mxu1 %v3901_v34 }
 0xe3e   :  { %3906 = vmatprep.subr.bf16.mxu1 %v3905_v63 }
 0xe41   :  { %3908 = vmatpush3.bf16.msra.mxu1 %v3905_v63 }
 0xeba   :  { %v2533_v35 = vpop.xlane.xlu0 %2532 }
 0xebb   :  { %v2541_v47 = vmul.f32 0.03125, %v2533_v35 }
 0xebd   :  { %v2547_v44 = vadd.f32 1e-05, %v2541_v47 }
 0xebe   :  { %v2536_v20 = vpop.xlane.xlu1 %2535 }
 0xebf   :  { %4061 = vrsqrt.f32 %v2547_v44  ;;  %v2542_v9 = vmul.f32 0.03125, %v2536_v20 }
 0xec1   :  { %v2548_v56 = vadd.f32 1e-05, %v2542_v9 }
 0xec3   :  { %4063 = vrsqrt.f32 %v2548_v56 }
 0xec9   :  { %v4062_v14 = vpop.eup %4061 }
 0xeca   :  { %v2559_v53 = vmul.f32 %v4062_v14, %v2511_v25 }
 0xecc   :  { %v2571_v7 = vmul.f32 %v4944_v54, %v2559_v53 }
 0xecd   :  { %v4064_v18 = vpop.eup %4063 }
 0xece   :  { %v2583_v2 = vadd.f32 %v4950_v30, %v2571_v7  ;;  %v2560_v46 = vmul.f32 %v4064_v18, %v2512_v31 }
 0xed0   :  { %3726 = vmatprep.mubr.msk.f32.mxu0 %vm200_vm1, %v2583_v2  ;;  %v2572_v4 = vmul.f32 %v4944_v54, %v2560_v46 }
 0xed2   :  { %v2584_v55 = vadd.f32 %v4950_v30, %v2572_v4 }
 0xed4   :  { %3727 = vmatmul.mubr.msk.f32.gmra.mrb[46].mxu0 %vm200_vm1, %v2584_v55 }
 0xed5   :  { %3762 = vmatprep.mubr.msk.f32.mxu0 %vm4116_vm2, %v4117_v10  ;;  %vm3136_vm2 = vcmask 58368  }
 0xf03   :  { %v3722_v12 = vpop.f32.mrb[42].mxu0 }
 0xf04   :  { %v5007_v1 = vadd.f32 %v3722_v12, %v5004_v29  ;;  %v2682_v33 = vpop.f32.mrb[43].mxu0 }
 0xf05   :  { %v5010_v15 = vadd.f32 %v5004_v29, %v2682_v33 }
 0xf06   :  { %v5013_v54 = vmul.f32 0.70710677, %v5007_v1 }
 0xf07   :  { %v5016_v23 = vmul.f32 0.70710677, %v5010_v15 }
 0xf08   :  { %v2724_v10 = vand.u32 2147483647, %v5013_v54  ;;  %vm2844_vm9 = vcmp.ge.f32.partialorder %v5013_v54, 0.0 }
 0xf09   :  { %v2723_v24 = vand.u32 2147483647, %v5016_v23  ;;  %vm2843_vm10 = vcmp.ge.f32.partialorder %v5016_v23, 0.0 }
 0xf0a   :  { %v2730_v25 = vmul.f32 0.3275911, %v2724_v10  ;;  %v2808_v38 = vsub.f32 0.0, %v2724_v10 }
 0xf0b   :  { %v2729_v27 = vmul.f32 0.3275911, %v2723_v24  ;;  %v2807_v19 = vsub.f32 0.0, %v2723_v24 }
 0xf0c   :  { %v2736_v30 = vadd.f32 1.0, %v2730_v25  ;;  %v2814_v40 = vmul.f32 %v2808_v38, %v2724_v10 }
 0xf0d   :  { %v2735_v8 = vadd.f32 1.0, %v2729_v27  ;;  %v2813_v11 = vmul.f32 %v2807_v19, %v2723_v24 }
 0xf0e   :  { %4065 = vrcp.f32 %v2736_v30  ;;  %v3725_v42 = vpop.f32.mrb[44].mxu0  ;;  %v2821_v62 = vmul.f32 1.442695, %v2814_v40 }
 0xf0f   :  { %4067 = vrcp.f32 %v2735_v8  ;;  %v5021_v16 = vadd.f32 %v3725_v42, %v5004_v29  ;;  %v2692_v17 = vpop.f32.mrb[45].mxu0  ;;  %v2819_v60 = vmul.f32 1.442695, %v2813_v11 }
 0xf10   :  { %v5024_v36 = vadd.f32 %v5004_v29, %v2692_v17 }
 0xf11   :  { %v5027_v31 = vmul.f32 0.70710677, %v5021_v16 }
 0xf12   :  { %v5030_v22 = vmul.f32 0.70710677, %v5024_v36 }
 0xf13   :  { %v2726_v37 = vand.u32 2147483647, %v5027_v31  ;;  %vm2846_vm11 = vcmp.ge.f32.partialorder %v5027_v31, 0.0 }
 0xf14   :  { %v2725_v45 = vand.u32 2147483647, %v5030_v22  ;;  %vm2845_vm12 = vcmp.ge.f32.partialorder %v5030_v22, 0.0 }
 0xf15   :  { %v2732_v26 = vmul.f32 0.3275911, %v2726_v37  ;;  %v2810_v6 = vsub.f32 0.0, %v2726_v37 }
 0xf16   :  { %v2731_v13 = vmul.f32 0.3275911, %v2725_v45  ;;  %v2809_v35 = vsub.f32 0.0, %v2725_v45 }
 0xf17   :  { %v2738_v48 = vadd.f32 1.0, %v2732_v26  ;;  %v2816_v56 = vmul.f32 %v2810_v6, %v2726_v37 }
 0xf18   :  { %v4066_v41 = vpop.eup %4065  ;;  %v2737_v49 = vadd.f32 1.0, %v2731_v13  ;;  %v2815_v18 = vmul.f32 %v2809_v35, %v2725_v45 }
 0xf19   :  { %v4068_v28 = vpop.eup %4067  ;;  %v2754_v51 = vmul.f32 1.0614054, %v4066_v41  ;;  %4069 = vrcp.f32 %v2738_v48  ;;  %v2825_v33 = vmul.f32 1.442695, %v2816_v56 }
 0xf1a   :  { %v2753_v32 = vmul.f32 1.0614054, %v4068_v28  ;;  %4071 = vrcp.f32 %v2737_v49  ;;  %v2823_v27 = vmul.f32 1.442695, %v2815_v18 }
 0xf1b   :  { %v2760_v3 = vadd.f32 -1.4531521, %v2754_v51  ;;  %4073 = vpow2.f32 %v2821_v62 }
 0xf1c   :  { %v2759_v58 = vadd.f32 -1.4531521, %v2753_v32  ;;  %4075 = vpow2.f32 %v2819_v60 }
 0xf1d   :  { %v2766_v59 = vmul.f32 %v4066_v41, %v2760_v3  ;;  %4077 = vpow2.f32 %v2825_v33 }
 0xf1e   :  { %v2765_v0 = vmul.f32 %v4068_v28, %v2759_v58  ;;  %4079 = vpow2.f32 %v2823_v27 }
 0xf1f   :  { %v2772_v34 = vadd.f32 1.4214138, %v2766_v59  ;;  %v2711_v59 = vmul.f32 0.5, %v5010_v15 }
 0xf20   :  { %v2771_v39 = vadd.f32 1.4214138, %v2765_v0 }
 0xf21   :  { %v2778_v63 = vmul.f32 %v4066_v41, %v2772_v34  ;;  %v2712_v34 = vmul.f32 0.5, %v5007_v1 }
 0xf22   :  { %v2777_v47 = vmul.f32 %v4068_v28, %v2771_v39 }
 0xf23   :  { %v2784_v44 = vadd.f32 -0.28449672, %v2778_v63  ;;  %v4070_v20 = vpop.eup %4069 }
 0xf24   :  { %v2783_v9 = vadd.f32 -0.28449672, %v2777_v47  ;;  %v4072_v14 = vpop.eup %4071  ;;  %v2756_v7 = vmul.f32 1.0614054, %v4070_v20 }
 0xf25   :  { %v2790_v53 = vmul.f32 %v4066_v41, %v2784_v44  ;;  %v2755_v46 = vmul.f32 1.0614054, %v4072_v14  ;;  %v4074_v30 = vpop.eup %4073 }
 0xf26   :  { %v2789_v2 = vmul.f32 %v4068_v28, %v2783_v9  ;;  %v2762_v55 = vadd.f32 -1.4531521, %v2756_v7  ;;  %v4076_v17 = vpop.eup %4075 }
 0xf27   :  { %v2796_v4 = vadd.f32 0.2548296, %v2790_v53  ;;  %v2761_v10 = vadd.f32 -1.4531521, %v2755_v46  ;;  %v4078_v35 = vpop.eup %4077  ;;  %v2714_v46 = vmul.f32 0.5, %v5021_v16 }
 0xf28   :  { %v2795_v12 = vadd.f32 0.2548296, %v2789_v2  ;;  %v2768_v25 = vmul.f32 %v4070_v20, %v2762_v55  ;;  %v4080_v44 = vpop.eup %4079 }
 0xf29   :  { %v2802_v24 = vmul.f32 %v4066_v41, %v2796_v4  ;;  %v2767_v42 = vmul.f32 %v4072_v14, %v2761_v10 }
 0xf2a   :  { %v2801_v8 = vmul.f32 %v4068_v28, %v2795_v12  ;;  %v2774_v37 = vadd.f32 1.4214138, %v2768_v25 }
 0xf2b   :  { %v2832_v38 = vmul.f32 %v4074_v30, %v2802_v24  ;;  %v2773_v26 = vadd.f32 1.4214138, %v2767_v42 }
 0xf2c   :  { %v2831_v19 = vmul.f32 %v4076_v17, %v2801_v8  ;;  %v2780_v13 = vmul.f32 %v4070_v20, %v2774_v37 }
 0xf2d   :  { %v2838_v45 = vsub.f32 1.0, %v2832_v38  ;;  %v2779_v48 = vmul.f32 %v4072_v14, %v2773_v26 }
 0xf2e   :  { %v2837_v40 = vsub.f32 1.0, %v2831_v19  ;;  %v2786_v11 = vadd.f32 -0.28449672, %v2780_v13 }
 0xf2f   :  { %v2850_v51 = vsub.f32 0.0, %v2838_v45  ;;  %v2785_v49 = vadd.f32 -0.28449672, %v2779_v48 }
 0xf30   :  { %v2849_v41 = vsub.f32 0.0, %v2837_v40  ;;  %v2792_v28 = vmul.f32 %v4070_v20, %v2786_v11 }
 0xf31   :  { %v2856_v32 = vsel %vm2844_vm9, %v2838_v45, %v2850_v51  ;;  %v2791_v58 = vmul.f32 %v4072_v14, %v2785_v49 }
 0xf32   :  { %v2862_v3 = vadd.f32 1.0, %v2856_v32  ;;  %v2855_v62 = vsel %vm2843_vm10, %v2837_v40, %v2849_v41  ;;  %v2798_v0 = vadd.f32 0.2548296, %v2792_v28 }
 0xf33   :  { %v2861_v60 = vadd.f32 1.0, %v2855_v62  ;;  %v2797_v39 = vadd.f32 0.2548296, %v2791_v58 }
 0xf34   :  { %v2804_v63 = vmul.f32 %v4070_v20, %v2798_v0  ;;  %v2868_v54 = vmul.f32 %v2862_v3, %v2712_v34 }
 0xf35   :  { %v2867_v6 = vmul.f32 %v2861_v60, %v2711_v59  ;;  %v2803_v47 = vmul.f32 %v4072_v14, %v2797_v39  ;;  %v2713_v14 = vmul.f32 0.5, %v5024_v36 }
 0xf36   :  { %v2834_v9 = vmul.f32 %v4078_v35, %v2804_v63 }
 0xf37   :  { %3745 = vmatprep.mubr.msk.f32.mxu1 %vm80_vm0, %v2867_v6  ;;  %v2833_v23 = vmul.f32 %v4080_v44, %v2803_v47 }
 0xf38   :  { %3746 = vmatmul.mubr.msk.f32.vlgmr.msra.gmra.mrb[48].mxu1 %vm80_vm0, %v2868_v54  ;;  %v2840_v56 = vsub.f32 1.0, %v2834_v9 }
 0xf39   :  { %v2839_v53 = vsub.f32 1.0, %v2833_v23 }
 0xf3a   :  { %v2852_v15 = vsub.f32 0.0, %v2840_v56 }
 0xf3b   :  { %v2851_v7 = vsub.f32 0.0, %v2839_v53 }
 0xf3c   :  { %v2858_v1 = vsel %vm2846_vm11, %v2840_v56, %v2852_v15 }
 0xf3d   :  { %v2864_v20 = vadd.f32 1.0, %v2858_v1  ;;  %v2857_v18 = vsel %vm2845_vm12, %v2839_v53, %v2851_v7 }
 0xf3e   :  { %v2863_v2 = vadd.f32 1.0, %v2857_v18 }
 0xf3f   :  { %v2870_v55 = vmul.f32 %v2864_v20, %v2714_v46  ;;  %v3267_v46 = vld [vmem:[%s5121_s19 + $0x1] ss:$0 sm:$0xff] }
 0xf40   :  { %v2869_v4 = vmul.f32 %v2863_v2, %v2713_v14 }
 0xf42   :  { %3748 = vmatprep.mubr.msk.f32.mxu1 %vm80_vm0, %v2869_v4 }
 0xf43   :  { %3749 = vmatmul.mubr.msk.f32.gmra.mrb[50].mxu1 %vm80_vm0, %v2870_v55 }
 0xfa7   :  { %v3728_v12 = vpop.f32.mrb[46].mxu0 }
 0xfa8   :  { %v2708_v31 = vadd.f32 %v3728_v12, %v5004_v29  ;;  %v2702_v33 = vpop.f32.mrb[47].mxu0 }
 0xfa9   :  { %v2703_v10 = vadd.f32 %v5004_v29, %v2702_v33 }
 0xfaa   :  { %v2722_v22 = vmul.f32 0.70710677, %v2708_v31  ;;  %v2716_v18 = vmul.f32 0.5, %v2708_v31 }
 0xfab   :  { %v2721_v24 = vmul.f32 0.70710677, %v2703_v10  ;;  %v2715_v1 = vmul.f32 0.5, %v2703_v10 }
 0xfac   :  { %v2728_v25 = vand.u32 2147483647, %v2722_v22  ;;  %vm2848_vm13 = vcmp.ge.f32.partialorder %v2722_v22, 0.0 }
 0xfad   :  { %v2727_v27 = vand.u32 2147483647, %v2721_v24  ;;  %vm2847_vm14 = vcmp.ge.f32.partialorder %v2721_v24, 0.0 }
 0xfae   :  { %v2734_v36 = vmul.f32 0.3275911, %v2728_v25  ;;  %v2812_v42 = vsub.f32 0.0, %v2728_v25 }
 0xfaf   :  { %v2733_v30 = vmul.f32 0.3275911, %v2727_v27  ;;  %v2811_v17 = vsub.f32 0.0, %v2727_v27 }
 0xfb0   :  { %v2740_v8 = vadd.f32 1.0, %v2734_v36  ;;  %v2818_v37 = vmul.f32 %v2812_v42, %v2728_v25 }
 0xfb1   :  { %v2739_v16 = vadd.f32 1.0, %v2733_v30  ;;  %v2817_v45 = vmul.f32 %v2811_v17, %v2727_v27 }
 0xfb2   :  { %4081 = vrcp.f32 %v2740_v8  ;;  %v2829_v29 = vmul.f32 1.442695, %v2818_v37 }
 0xfb3   :  { %4083 = vrcp.f32 %v2739_v16  ;;  %v2827_v11 = vmul.f32 1.442695, %v2817_v45 }
 0xfb4   :  { %4085 = vpow2.f32 %v2829_v29 }
 0xfb5   :  { %4087 = vpow2.f32 %v2827_v11  ;;  %v3055_v11 = vld [vmem:[%s5108_s6 + $0x18] sm:$0xff] }
 0xfbc   :  { %v4082_v38 = vpop.eup %4081 }
 0xfbd   :  { %v4084_v19 = vpop.eup %4083  ;;  %v2758_v26 = vmul.f32 1.0614054, %v4082_v38 }
 0xfbe   :  { %v2757_v13 = vmul.f32 1.0614054, %v4084_v19  ;;  %v4086_v6 = vpop.eup %4085 }
 0xfbf   :  { %v2764_v40 = vadd.f32 -1.4531521, %v2758_v26  ;;  %v4088_v35 = vpop.eup %4087 }
 0xfc0   :  { %v2763_v48 = vadd.f32 -1.4531521, %v2757_v13 }
 0xfc1   :  { %v2770_v51 = vmul.f32 %v4082_v38, %v2764_v40 }
 0xfc2   :  { %v2769_v41 = vmul.f32 %v4084_v19, %v2763_v48  ;;  %v3052_v48 = vld [vmem:[%s5108_s6] sm:$0xff] }
 0xfc3   :  { %v2776_v49 = vadd.f32 1.4214138, %v2770_v51  ;;  %v3054_v51 = vld [vmem:[%s5108_s6 + $0x10] sm:$0xff] }
 0xfc4   :  { %v2775_v32 = vadd.f32 1.4214138, %v2769_v41  ;;  %v3913_v41 = vpack.c.bf16 %v3055_v11, %v3054_v51 }
 0xfc5   :  { %v2782_v28 = vmul.f32 %v4082_v38, %v2776_v49 }
 0xfc6   :  { %v2781_v3 = vmul.f32 %v4084_v19, %v2775_v32 }
 0xfc7   :  { %v2788_v62 = vadd.f32 -0.28449672, %v2782_v28 }
 0xfc8   :  { %v2787_v58 = vadd.f32 -0.28449672, %v2781_v3 }
 0xfc9   :  { %v2794_v59 = vmul.f32 %v4082_v38, %v2788_v62  ;;  %v3274_v62 = vld [vmem:[%s5136_s22] ss:$0 sm:$0xff] }
 0xfca   :  { %v2793_v60 = vmul.f32 %v4084_v19, %v2787_v58  ;;  %v3275_v58 = vld [vmem:[%s5107_s5] ss:$0 sm:$0xff] }
 0xfcb   :  { %v2800_v0 = vadd.f32 0.2548296, %v2794_v59 }
 0xfcc   :  { %v2799_v34 = vadd.f32 0.2548296, %v2793_v60 }
 0xfcd   :  { %v2806_v39 = vmul.f32 %v4082_v38, %v2800_v0  ;;  %v3276_v0 = vld [vmem:[%s5109_s7] ss:$0 sm:$0xff] }
 0xfce   :  { %v2805_v63 = vmul.f32 %v4084_v19, %v2799_v34 }
 0xfcf   :  { %v2836_v54 = vmul.f32 %v4086_v6, %v2806_v39 }
 0xfd0   :  { %v2835_v47 = vmul.f32 %v4088_v35, %v2805_v63 }
 0xfd1   :  { %v2842_v44 = vsub.f32 1.0, %v2836_v54 }
 0xfd2   :  { %v2841_v9 = vsub.f32 1.0, %v2835_v47 }
 0xfd3   :  { %v2854_v23 = vsub.f32 0.0, %v2842_v44 }
 0xfd4   :  { %v2853_v56 = vsub.f32 0.0, %v2841_v9 }
 0xfd5   :  { %v2860_v53 = vsel %vm2848_vm13, %v2842_v44, %v2854_v23 }
 0xfd6   :  { %v2866_v15 = vadd.f32 1.0, %v2860_v53  ;;  %v2859_v7 = vsel %vm2847_vm14, %v2841_v9, %v2853_v56 }
 0xfd7   :  { %v2865_v20 = vadd.f32 1.0, %v2859_v7 }
 0xfd8   :  { %v2872_v2 = vmul.f32 %v2866_v15, %v2716_v18 }
 0xfd9   :  { %v2871_v14 = vmul.f32 %v2865_v20, %v2715_v1 }
 0xfdb   :  { %3751 = vmatprep.mubr.msk.f32.mxu1 %vm80_vm0, %v2871_v14 }
 0xfdc   :  { %3752 = vmatmul.mubr.msk.f32.gmra.mrb[52].mxu1 %vm80_vm0, %v2872_v2  ;;  %vm3024_vm0 = vcmask 254976  }
0x100b   :  { %v3747_v4 = vpop.f32.mrb[48].mxu1 }
0x100c   :  { %v2980_v55 = vadd.f32 %v3747_v4, %v3267_v46  ;;  %v2974_v12 = vpop.f32.mrb[49].mxu1 }
0x100d   :  { %v2975_v33 = vadd.f32 %v3267_v46, %v2974_v12 }
0x100e   :  { %v3004_v22 = vadd.f32 %v2980_v55, %v4883_v50 }
0x100f   :  { %v3003_v10 = vadd.f32 %v2975_v33, %v4886_v21 }
0x1010   :  { %3010 = vst.msk [vmem:[#allocation2 + $0x8] sm:$0xff] %vm200_vm1, %v3004_v22 }
0x1011   :  { %3009 = vst.msk [vmem:[#allocation2] sm:$0xff] %vm200_vm1, %v3003_v10 }
0x1016   :  { %v3750_v31 = vpop.f32.mrb[50].mxu1 }
0x1017   :  { %v2990_v24 = vadd.f32 %v3750_v31, %v3267_v46  ;;  %v2984_v25 = vpop.f32.mrb[51].mxu1 }
0x1018   :  { %v2985_v27 = vadd.f32 %v3267_v46, %v2984_v25  ;;  %v3015_v21 = vld [vmem:[#allocation2] sm:$0xff] }
0x1019   :  { %v3006_v36 = vadd.f32 %v2990_v24, %v4896_v52 }
0x101a   :  { %v3005_v30 = vadd.f32 %v2985_v27, %v4893_v43 }
0x101b   :  { %3012 = vst.msk [vmem:[#allocation2 + $0x18] sm:$0xff] %vm200_vm1, %v3006_v36 }
0x101c   :  { %3011 = vst.msk [vmem:[#allocation2 + $0x10] sm:$0xff] %vm200_vm1, %v3005_v30 }
0x1022   :  { %v3016_v8 = vld [vmem:[#allocation2 + $0x18] sm:$0xff] }
0x1023   :  { %v3018_v50 = vrot.slane %v3016_v8, 7 }
0x1025   :  { %v3021_v16 = vsel %vm3020_vm15, %v3015_v21, %v3018_v50 }
0x1026   :  { %v3025_v42 = vsel %vm3024_vm0, %v3021_v16, 0.0 }
0x1027   :  { %3026 = vadd.xlane.f32.xlu0 %v3025_v42 }
0x10af   :  { %v3753_v17 = vpop.f32.mrb[52].mxu1 }
0x10b0   :  { %v3000_v38 = vadd.f32 %v3753_v17, %v3267_v46  ;;  %v2994_v37 = vpop.f32.mrb[53].mxu1 }
0x10b1   :  { %v2995_v19 = vadd.f32 %v3267_v46, %v2994_v37 }
0x10b2   :  { %v3008_v52 = vadd.f32 %v3000_v38, %v4921_v61  ;;  %v3053_v61 = vld [vmem:[%s5108_s6 + $0x8] sm:$0xff] }
0x10b3   :  { %v3007_v43 = vadd.f32 %v2995_v19, %v4912_v57  ;;  %v3910_v57 = vpack.c.bf16 %v3053_v61, %v3052_v48 }
0x10b4   :  { %3014 = vst.msk [vmem:[#allocation2 + $0x28] sm:$0xff] %vm200_vm1, %v3008_v52  ;;  %v3027_v26 = vpop.xlane.xlu0 %3026 }
0x10b5   :  { %3013 = vst.msk [vmem:[#allocation2 + $0x20] sm:$0xff] %vm200_vm1, %v3007_v43  ;;  %v3028_v45 = vmul.f32 0.03125, %v3027_v26  ;;  %3911 = vmatpush3.bf16.msra.mxu0 %v3910_v57 }
0x10b6   :  { %3912 = vmatprep.subr.bf16.mxu0 %v4115_v5 }
0x10b7   :  { %v3029_v13 = vsub.f32 %v3021_v16, %v3028_v45 }
0x10b9   :  { %v3030_v40 = vmul.f32 %v3029_v13, %v3029_v13  ;;  %3914 = vmatpush3.bf16.msra.mxu0 %v3913_v41 }
0x10bb   :  { %v3031_v29 = vsel %vm3024_vm0, %v3030_v40, 0.0 }
0x10bc   :  { %3032 = vadd.xlane.f32.xlu1 %v3031_v29 }
0x1149   :  { %v3033_v49 = vpop.xlane.xlu1 %3032 }
0x114a   :  { %v3034_v32 = vmul.f32 0.03125, %v3033_v49 }
0x114c   :  { %v3035_v28 = vadd.f32 1e-05, %v3034_v32 }
0x114e   :  { %4089 = vrsqrt.f32 %v3035_v28 }
0x1158   :  { %v4090_v3 = vpop.eup %4089 }
0x1159   :  { %v3037_v5 = vmul.f32 %v4090_v3, %v3029_v13 }
0x115b   :  { %v3044_v59 = vmul.f32 %v3274_v62, %v3037_v5 }
0x115d   :  { %v3051_v60 = vadd.f32 %v3275_v58, %v3044_v59 }
0x115f   :  { %3763 = vmatmul.mubr.msk.f32.vlgmr.msra.gmra.mrb[48].mxu0 %vm200_vm1, %v3051_v60 }
0x1232   :  { %v3132_v34 = vpop.f32.mrb[48].mxu0 }
0x1233   :  { %v3133_v39 = vadd.f32 %v3276_v0, %v3132_v34  ;;  %v3764_v6 = vpop.f32.mrb[49].mxu0 }
0x1235   :  { %3137 = vst.msk [vmem:[#allocation4] sm:$0x3] %vm3136_vm2, %v3133_v39 }
0x1236   :  { %4102 = shalt.err (!%p4099_p4)
}
0x1237   :  { %s4103_s28 = scalar_lea.hbm %s5122_s20, 32 }
0x1238   :  { %p4104_p5 = scmp.ne.s32.totalorder %s5122_s20, %s4103_s28  ;;  %p4107_p6 = scmp.lt.u32.totalorder %s4103_s28, %s5122_s20 }
0x123a   :  { %p4109_p7 = pnand %p4107_p6, %p4104_p5 }
0x123c   :  { %4112 = shalt.err (!%p4109_p7)
}
0x123d   :  { %3147 = dma.vmem_to_hbm [thread:$0]  %s3145_s27, 32, %s5122_s20, [#allocation5]  }
0x123e   :  { %4113 = dma.done.wait [#allocation5], 32  }
0x123f   :  { %4114 = vsyncadd [#allocation5], 4294967264 }
0x1240   :  { %3151 = vsyncpa [#allocation5], 1 }

</bundles_post_ra>
